<compile_context>
chip_gen: v7x
topology: tpu7x:2x2x1
jax: 0.10.0
libtpu: 0.0.40
codegen_flags: <defaults>
</compile_context>

<pallas_src>
import jax
import jax.numpy as jnp
from jax.experimental import pallas as pl
from jax.experimental.pallas import tpu as pltpu

C_IN = 512         # Conv1d in_channels (fixed by the module)
C_MID = 512        # Conv1d out_channels of conv1
NUM_CLASSES = 320  # default num_classes
K_TAPS = 3         # conv1 kernel size


def _round_up(x, m):
    return (x + m - 1) // m * m


def _fused_kernel(x_ref, w1_ref, b1_ref, w2a_ref, w2b_ref, b2_ref, out_ref):
    """One M-tile of both VQModel branches.

    x_ref  : (TM, 3*C_IN)       bf16  im2col rows  [x[t-1] | x[t] | x[t+1]]
    w1_ref : (3*C_IN, 2*C_MID)  bf16  branch-fused conv1 weights (tap-major)
    b1_ref : (1, 2*C_MID)       f32
    w2a_ref: (C_MID, NCP)       bf16  branch-1 conv2 (k=1) weights, lane-padded
    w2b_ref: (C_MID, NCP)       bf16  branch-2 conv2 (k=1) weights, lane-padded
    b2_ref : (1, 2*NCP)         f32   [b2a | 0 | b2b | 0]
    out_ref: (TM, 2*NCP)        f32   [branch-1 logits(+pad) | branch-2 logits(+pad)]
    """
    y = jnp.dot(x_ref[...], w1_ref[...], preferred_element_type=jnp.float32)
    y = y + b1_ref[...]                              # f32 bias
    h = jnp.maximum(y, 0.0).astype(jnp.bfloat16)     # ReLU in f32, bf16 into MXU
    # Split conv2: skip the zero half of the old block-diagonal matmul.
    # h lane-slices at 0:512 / 512:1024 are clean 4-vreg groups (no relayout).
    oa = jnp.dot(h[:, :C_MID], w2a_ref[...], preferred_element_type=jnp.float32)
    ob = jnp.dot(h[:, C_MID:], w2b_ref[...], preferred_element_type=jnp.float32)
    out_ref[...] = jnp.concatenate([oa, ob], axis=-1) + b2_ref[...]


def vq_classifier(x_nct, params, *, num_classes=NUM_CLASSES, tile_m=512,
                  vmem_limit_bytes=48 << 20):
    """x_nct: (B, 512, T) float32 (PyTorch NCW).  Returns (x1, x2), each (B, NC, T)."""
    w1cat, b1cat, w2a, w2b, b2pad = params
    B, C, T = x_nct.shape
    assert C == C_IN
    NCP = w2a.shape[1]            # lane-padded per-branch width (384 for nc=320)

    # NCW -> NWC; cast to bf16 BEFORE im2col so pad/concat traffic is halved.
    x = jnp.transpose(x_nct, (0, 2, 1)).astype(jnp.bfloat16)     # (B, T, C)
    xp = jnp.pad(x, ((0, 0), (1, 1), (0, 0)))                    # (B, T+2, C)
    xi = jnp.concatenate([xp[:, 0:T], xp[:, 1:T + 1], xp[:, 2:T + 2]],
                         axis=-1)                                # (B, T, 3C)
    M = B * T
    xi = xi.reshape(M, K_TAPS * C_IN)

    # Tile selection: big tiles amortize the ~0.35us/step pipeline overhead and
    # the MXU weight push; prefer an even grid so v7x's 2 TCs split it evenly.
    if M <= tile_m:
        tm = _round_up(M, 8)
    else:
        tm = tile_m
        half = tile_m // 2
        if ((_round_up(M, tm) // tm) % 2 == 1
                and (_round_up(M, half) // half) % 2 == 0):
            tm = half
    m_pad = _round_up(M, tm)
    if m_pad != M:
        xi = jnp.pad(xi, ((0, m_pad - M), (0, 0)))

    grid = (m_pad // tm,)
    flops = 2 * m_pad * (K_TAPS * C_IN * 2 * C_MID + 2 * C_MID * NCP)
    bytes_accessed = (xi.size * 2 + w1cat.size * 2 + (w2a.size + w2b.size) * 2
                      + b1cat.size * 4 + b2pad.size * 4 + m_pad * 2 * NCP * 4)

    out = pl.pallas_call(
        _fused_kernel,
        out_shape=jax.ShapeDtypeStruct((m_pad, 2 * NCP), jnp.float32),
        grid=grid,
        in_specs=[
            pl.BlockSpec((tm, K_TAPS * C_IN), lambda i: (i, 0)),
            pl.BlockSpec(w1cat.shape, lambda i: (0, 0)),   # constant index maps:
            pl.BlockSpec(b1cat.shape, lambda i: (0, 0)),   # weights fetched once,
            pl.BlockSpec(w2a.shape, lambda i: (0, 0)),     # not re-DMA'd per step
            pl.BlockSpec(w2b.shape, lambda i: (0, 0)),
            pl.BlockSpec(b2pad.shape, lambda i: (0, 0)),
        ],
        out_specs=pl.BlockSpec((tm, 2 * NCP), lambda i: (i, 0)),
        compiler_params=pltpu.CompilerParams(
            dimension_semantics=("parallel",),      # megacore sharding (v7x 2 TCs)
            vmem_limit_bytes=vmem_limit_bytes),     # < 64 MiB physical on v7x
        cost_estimate=pl.CostEstimate(flops=flops, transcendentals=0,
                                      bytes_accessed=bytes_accessed),
    )(xi, w1cat, b1cat, w2a, w2b, b2pad)

    out = out[:M].reshape(B, T, 2 * NCP)
    out1 = jnp.transpose(out[..., :num_classes], (0, 2, 1))          # (B, NC, T)
    out2 = jnp.transpose(out[..., NCP:NCP + num_classes], (0, 2, 1))
    return out1, out2


def fuse_params(torch_a, torch_b):
    """Convert two PyTorch-shaped VQModel param sets into fused kernel layouts."""
    W1a, b1a, W2a, b2a = torch_a
    W1b, b1b, W2b, b2b = torch_b
    nc = W2a.shape[0]
    ncp = _round_up(nc, 128)           # lane-pad each branch's output (320 -> 384)

    def tap_major(W1):   # (C_MID, C_IN, 3) -> (3*C_IN, C_MID), tap-major rows
        return jnp.transpose(W1, (2, 1, 0)).reshape(K_TAPS * C_IN, C_MID)

    w1cat = jnp.concatenate([tap_major(W1a), tap_major(W1b)], axis=1)  # (1536, 1024)
    b1cat = jnp.concatenate([b1a, b1b])[None, :]                       # (1, 1024)

    def pad_w2(W2):      # (nc, C_MID, 1) -> (C_MID, ncp), zero lane padding
        return jnp.pad(W2[:, :, 0].T, ((0, 0), (0, ncp - nc)))

    w2a = pad_w2(W2a)                                                  # (512, 384)
    w2b = pad_w2(W2b)                                                  # (512, 384)
    b2pad = jnp.concatenate([jnp.pad(b2a, (0, ncp - nc)),
                             jnp.pad(b2b, (0, ncp - nc))])[None, :]    # (1, 768)

    return (w1cat.astype(jnp.bfloat16), b1cat,
            w2a.astype(jnp.bfloat16), w2b.astype(jnp.bfloat16), b2pad)


def make_params(key, num_classes=NUM_CLASSES, scale=0.02):
    """Deterministic synthetic params in PyTorch shapes + fused kernel layouts."""
    keys = jax.random.split(key, 8)

    def branch(k1, k2, k3, k4):
        W1 = jax.random.normal(k1, (C_MID, C_IN, K_TAPS), jnp.float32) * scale
        b1 = jax.random.normal(k2, (C_MID,), jnp.float32) * scale
        W2 = jax.random.normal(k3, (num_classes, C_MID, 1), jnp.float32) * scale
        b2 = jax.random.normal(k4, (num_classes,), jnp.float32) * scale
        return W1, b1, W2, b2

    torch_a = branch(*keys[:4])
    torch_b = branch(*keys[4:])
    return torch_a, torch_b, fuse_params(torch_a, torch_b)


def ref_vqmodel(x_nct, W1, b1, W2, b2):
    """Pure-JAX f32 reference matching PyTorch Conv1d semantics (NCW)."""
    y = jax.lax.conv_general_dilated(
        x_nct, W1, window_strides=(1,), padding=[(1, 1)],
        dimension_numbers=('NCH', 'OIH', 'NCH')) + b1[None, :, None]
    y = jnp.maximum(y, 0.0)
    out = jax.lax.conv_general_dilated(
        y, W2, window_strides=(1,), padding=[(0, 0)],
        dimension_numbers=('NCH', 'OIH', 'NCH')) + b2[None, :, None]
    return out


if __name__ == "__main__":
    key = jax.random.PRNGKey(0)
    kx, kp = jax.random.split(key)

    B, T = 2, 16
    x = jax.random.normal(kx, (B, C_IN, T), jnp.float32)   # PyTorch NCW input

    torch_a, torch_b, kern_params = make_params(kp)

    x1, x2 = jax.jit(vq_classifier)(x, kern_params)
    jax.block_until_ready((x1, x2))

    # sanity check against an f32 pure-JAX reference (bf16 MXU operands -> loose tol,
    # intentional: classifier logits tolerate ~1e-2 relative error)
    r1 = ref_vqmodel(x, *torch_a)
    r2 = ref_vqmodel(x, *torch_b)
    assert x1.shape == (B, NUM_CLASSES, T) and x2.shape == (B, NUM_CLASSES, T)
    assert jnp.allclose(x1, r1, rtol=2e-2, atol=2e-2), float(jnp.max(jnp.abs(x1 - r1)))
    assert jnp.allclose(x2, r2, rtol=2e-2, atol=2e-2), float(jnp.max(jnp.abs(x2 - r2)))

    print("KERNEL_OK")
</pallas_src>

<mosaic_0001>
module attributes {stable_mosaic.version = 11 : i64} {
  func.func @_fused_kernel(%arg0: i32, %arg1: memref<32x1536xbf16, #tpu.memory_space<vmem>>, %arg2: memref<1536x1024xbf16, #tpu.memory_space<vmem>>, %arg3: memref<1x1024xf32, #tpu.memory_space<vmem>>, %arg4: memref<512x384xbf16, #tpu.memory_space<vmem>>, %arg5: memref<512x384xbf16, #tpu.memory_space<vmem>>, %arg6: memref<1x768xf32, #tpu.memory_space<vmem>>, %arg7: memref<32x768xf32, #tpu.memory_space<vmem>>) attributes {dimension_semantics = [#tpu.dimension_semantics<parallel>], iteration_bounds = array<i64: 1>, scalar_prefetch = 0 : i64, scratch_operands = 0 : i64, tpu.core_type = #tpu.core_type<tc>, window_params = [{transform_indices = @transform_0, window_bounds = array<i64: 32, 1536>}, {pipeline_mode = #tpu.pipeline_mode<synchronous>, transform_indices = @transform_1, window_bounds = array<i64: 1536, 1024>}, {pipeline_mode = #tpu.pipeline_mode<synchronous>, transform_indices = @transform_2, window_bounds = array<i64: 1, 1024>}, {pipeline_mode = #tpu.pipeline_mode<synchronous>, transform_indices = @transform_3, window_bounds = array<i64: 512, 384>}, {pipeline_mode = #tpu.pipeline_mode<synchronous>, transform_indices = @transform_4, window_bounds = array<i64: 512, 384>}, {pipeline_mode = #tpu.pipeline_mode<synchronous>, transform_indices = @transform_5, window_bounds = array<i64: 1, 768>}, {transform_indices = @transform_6, window_bounds = array<i64: 32, 768>}]} {
    %c0 = arith.constant 0 : index
    %c0_0 = arith.constant 0 : index
    %0 = vector.load %arg1[%c0, %c0_0] : memref<32x1536xbf16, #tpu.memory_space<vmem>>, vector<32x1536xbf16>
    %c0_1 = arith.constant 0 : index
    %c0_2 = arith.constant 0 : index
    %1 = vector.load %arg2[%c0_1, %c0_2] : memref<1536x1024xbf16, #tpu.memory_space<vmem>>, vector<1536x1024xbf16>
    %cst = arith.constant dense<0.000000e+00> : vector<32x1024xf32>
    %2 = tpu.matmul %0, %1, %cst {dimension_numbers = #tpu.dot_dimension_numbers<[1], [0], [0], [1], [0, 0, 1, 1], [], []>} : vector<32x1536xbf16>, vector<1536x1024xbf16>, vector<32x1024xf32> -> vector<32x1024xf32>
    %c0_3 = arith.constant 0 : index
    %c0_4 = arith.constant 0 : index
    %3 = vector.load %arg3[%c0_3, %c0_4] : memref<1x1024xf32, #tpu.memory_space<vmem>>, vector<1x1024xf32>
    %4 = vector.broadcast %3 : vector<1x1024xf32> to vector<32x1024xf32>
    %5 = arith.addf %2, %4 : vector<32x1024xf32>
    %cst_5 = arith.constant 0.000000e+00 : f32
    %6 = vector.broadcast %cst_5 : f32 to vector<32x1024xf32>
    %7 = arith.maximumf %5, %6 : vector<32x1024xf32>
    %8 = arith.truncf %7 : vector<32x1024xf32> to vector<32x1024xbf16>
    %9 = vector.extract_strided_slice %8 {offsets = [0, 0], sizes = [32, 512], strides = [1, 1]} : vector<32x1024xbf16> to vector<32x512xbf16>
    %c0_6 = arith.constant 0 : index
    %c0_7 = arith.constant 0 : index
    %10 = vector.load %arg4[%c0_6, %c0_7] : memref<512x384xbf16, #tpu.memory_space<vmem>>, vector<512x384xbf16>
    %cst_8 = arith.constant dense<0.000000e+00> : vector<32x384xf32>
    %11 = tpu.matmul %9, %10, %cst_8 {dimension_numbers = #tpu.dot_dimension_numbers<[1], [0], [0], [1], [0, 0, 1, 1], [], []>} : vector<32x512xbf16>, vector<512x384xbf16>, vector<32x384xf32> -> vector<32x384xf32>
    %12 = vector.extract_strided_slice %8 {offsets = [0, 512], sizes = [32, 512], strides = [1, 1]} : vector<32x1024xbf16> to vector<32x512xbf16>
    %c0_9 = arith.constant 0 : index
    %c0_10 = arith.constant 0 : index
    %13 = vector.load %arg5[%c0_9, %c0_10] : memref<512x384xbf16, #tpu.memory_space<vmem>>, vector<512x384xbf16>
    %cst_11 = arith.constant dense<0.000000e+00> : vector<32x384xf32>
    %14 = tpu.matmul %12, %13, %cst_11 {dimension_numbers = #tpu.dot_dimension_numbers<[1], [0], [0], [1], [0, 0, 1, 1], [], []>} : vector<32x512xbf16>, vector<512x384xbf16>, vector<32x384xf32> -> vector<32x384xf32>
    %15 = tpu.concatenate %11, %14 in 1 : vector<32x384xf32>, vector<32x384xf32> -> vector<32x768xf32>
    %c0_12 = arith.constant 0 : index
    %c0_13 = arith.constant 0 : index
    %16 = vector.load %arg6[%c0_12, %c0_13] : memref<1x768xf32, #tpu.memory_space<vmem>>, vector<1x768xf32>
    %17 = vector.broadcast %16 : vector<1x768xf32> to vector<32x768xf32>
    %18 = arith.addf %15, %17 : vector<32x768xf32>
    %c0_14 = arith.constant 0 : index
    %c0_15 = arith.constant 0 : index
    %19 = vector.load %arg7[%c0_14, %c0_15] : memref<32x768xf32, #tpu.memory_space<vmem>>, vector<32x768xf32>
    tpu.vector_store %arg7[%c0_14, %c0_15], %18 {strides = array<i32>} : memref<32x768xf32, #tpu.memory_space<vmem>>, vector<32x768xf32>,
    return
  }
  func.func @transform_0(%arg0: i32) -> (i32, i32) {
    %c0_i32 = arith.constant 0 : i32
    %c0_i32_0 = arith.constant 0 : i32
    return %arg0, %c0_i32 : i32, i32
  }
  func.func @transform_1(%arg0: i32) -> (i32, i32) {
    %c0_i32 = arith.constant 0 : i32
    %c0_i32_0 = arith.constant 0 : i32
    %c0_i32_1 = arith.constant 0 : i32
    return %c0_i32, %c0_i32_0 : i32, i32
  }
  func.func @transform_2(%arg0: i32) -> (i32, i32) {
    %c0_i32 = arith.constant 0 : i32
    %c0_i32_0 = arith.constant 0 : i32
    %c0_i32_1 = arith.constant 0 : i32
    return %c0_i32, %c0_i32_0 : i32, i32
  }
  func.func @transform_3(%arg0: i32) -> (i32, i32) {
    %c0_i32 = arith.constant 0 : i32
    %c0_i32_0 = arith.constant 0 : i32
    %c0_i32_1 = arith.constant 0 : i32
    return %c0_i32, %c0_i32_0 : i32, i32
  }
  func.func @transform_4(%arg0: i32) -> (i32, i32) {
    %c0_i32 = arith.constant 0 : i32
    %c0_i32_0 = arith.constant 0 : i32
    %c0_i32_1 = arith.constant 0 : i32
    return %c0_i32, %c0_i32_0 : i32, i32
  }
  func.func @transform_5(%arg0: i32) -> (i32, i32) {
    %c0_i32 = arith.constant 0 : i32
    %c0_i32_0 = arith.constant 0 : i32
    %c0_i32_1 = arith.constant 0 : i32
    return %c0_i32, %c0_i32_0 : i32, i32
  }
  func.func @transform_6(%arg0: i32) -> (i32, i32) {
    %c0_i32 = arith.constant 0 : i32
    %c0_i32_0 = arith.constant 0 : i32
    return %arg0, %c0_i32 : i32, i32
  }
}

</mosaic_0001>

<bundles_post_ra>
// kernel: vq_classifier.1
= control target key start
LH: loop header
LB: loop body
LE: loop exit
PB: predicated region body
PF: predicated region fallthrough
CT: control target
= control target key end

     0   :  { %11 = vsyncpa [#allocation3], 0  ;;  %s10179_s0 = inlined_call_operand.vmem [shape: bf16[32,1536], index: 0, kind: input, shape index: {}]   ;;  %s10180_s1 = inlined_call_operand.hbm [shape: bf16[1536,1024], index: 1, kind: input, shape index: {}]   ;;  %s10181_s2 = inlined_call_operand.hbm [shape: f32[1,1024], index: 2, kind: input, shape index: {}]   ;;  %s10182_s3 = inlined_call_operand.hbm [shape: bf16[512,384], index: 3, kind: input, shape index: {}]   ;;  %s10183_s4 = inlined_call_operand.hbm [shape: bf16[512,384], index: 4, kind: input, shape index: {}]   ;;  %s10184_s5 = inlined_call_operand.hbm [shape: f32[1,768], index: 5, kind: input, shape index: {}]   ;;  %s10185_s6 = inlined_call_operand.vmem [shape: f32[32,768], index: 6, kind: output, shape index: {}]  }
   0x1   :  { %12 = vsyncpa [#allocation5], 0 }
   0x2   :  { %13 = vsyncpa [#allocation8], 0  ;;  %s9723_s21 = smov [#allocation4]   ;;  %s9607_s25 = scalar_lea.hbm %s10181_s2, 128 }
   0x3   :  { %s34_s22 = sshll.u32 %s9723_s21, 4  ;;  %p9608_p0 = scmp.ne.s32.totalorder %s10181_s2, %s9607_s25  ;;  %s35_s22 = int_to_ptr.vmem [resolvable:$true] %s34_s22 }
   0x4   :  { %p9611_p1 = scmp.lt.u32.totalorder %s9607_s25, %s10181_s2 }
   0x6   :  { %p9613_p2 = pnand %p9611_p1, %p9608_p0 }
   0x8   :  { %9616 = shalt.err (!%p9613_p2)
}
   0x9   :  { %s9617_s30 = scalar_lea.vmem %s35_s22, 128  ;;  %p9622_p4 = scmp.lt.s32.totalorder %s35_s22, %s35_s22 }
   0xa   :  { %p9618_p3 = scmp.ne.s32.totalorder %s35_s22, %s9617_s30  ;;  %p9623_p5 = scmp.lt.s32.totalorder %s9617_s30, %s9617_s30 }
   0xc   :  { %p9624_p6 = por %p9623_p5, %p9622_p4 }
   0xe   :  { %p9625_p7 = pnand %p9624_p6, %p9618_p3 }
  0x10   :  { %9628 = shalt.err (!%p9625_p7)
}
  0x11   :  { %37 = dma.hbm_to_vmem [thread:$0]  %s10181_s2, 128, %s35_s22, [#allocation5]  }
  0x12   :  { %s9724_s9 = smov [#allocation7]   ;;  %s9725_s11 = smov [#allocation2]  }
  0x13   :  { %s55_s10 = sshll.u32 %s9724_s9, 4  ;;  %s21_s12 = sshll.u32 %s9725_s11, 4  ;;  %s56_s10 = int_to_ptr.vmem [resolvable:$true] %s55_s10  ;;  %s22_s12 = int_to_ptr.vmem [resolvable:$true] %s21_s12 }
  0x14   :  { %s9629_s15 = scalar_lea.hbm %s10183_s4, 12288 }
  0x15   :  { %p9630_p8 = scmp.ne.s32.totalorder %s10183_s4, %s9629_s15  ;;  %p9633_p9 = scmp.lt.u32.totalorder %s9629_s15, %s10183_s4 }
  0x17   :  { %p9635_p10 = pnand %p9633_p9, %p9630_p8 }
  0x19   :  { %9638 = shalt.err (!%p9635_p10)
}
  0x1a   :  { %s9639_s2 = scalar_lea.vmem %s56_s10, 12288  ;;  %p9644_p12 = scmp.lt.s32.totalorder %s56_s10, %s56_s10 }
  0x1b   :  { %p9640_p11 = scmp.ne.s32.totalorder %s56_s10, %s9639_s2  ;;  %p9645_p13 = scmp.lt.s32.totalorder %s9639_s2, %s9639_s2 }
  0x1d   :  { %p9646_p0 = por %p9645_p13, %p9644_p12 }
  0x1f   :  { %p9647_p1 = pnand %p9646_p0, %p9640_p11 }
  0x21   :  { %9650 = shalt.err (!%p9647_p1)
}
  0x22   :  { %s9726_s20 = smov 192   ;;  %s9727_s21 = smov 12  }
  0x23   :  { %61 = dma.hbm_to_vmem [thread:$0]  %s10183_s4, 12288, %s56_s10, [#allocation8], %s9726_s20, %s9726_s20, %s9727_s21  }
  0x24   :  { %s9651_s26 = scalar_lea.hbm %s10180_s1, 98304 }
  0x25   :  { %p9652_p2 = scmp.ne.s32.totalorder %s10180_s1, %s9651_s26  ;;  %p9655_p3 = scmp.lt.u32.totalorder %s9651_s26, %s10180_s1 }
  0x27   :  { %p9657_p4 = pnand %p9655_p3, %p9652_p2 }
  0x29   :  { %9660 = shalt.err (!%p9657_p4)
}
  0x2a   :  { %s9661_s7 = scalar_lea.vmem %s22_s12, 98304  ;;  %p9666_p6 = scmp.lt.s32.totalorder %s22_s12, %s22_s12 }
  0x2b   :  { %p9662_p5 = scmp.ne.s32.totalorder %s22_s12, %s9661_s7  ;;  %p9667_p7 = scmp.lt.s32.totalorder %s9661_s7, %s9661_s7 }
  0x2d   :  { %p9668_p8 = por %p9667_p7, %p9666_p6 }
  0x2f   :  { %p9669_p9 = pnand %p9668_p8, %p9662_p5 }
  0x31   :  { %9672 = shalt.err (!%p9669_p9)
}
  0x32   :  { %s9728_s4 = smov 512   ;;  %s9729_s8 = smov 32  }
  0x33   :  { %27 = dma.hbm_to_vmem [thread:$0]  %s10180_s1, 98304, %s22_s12, [#allocation3], %s9728_s4, %s9728_s4, %s9729_s8  }
  0x34   :  { %s9730_s11 = smov [#allocation6]   ;;  %s9731_s14 = smov [#allocation9]  }
  0x35   :  { %s43_s13 = sshll.u32 %s9730_s11, 4  ;;  %s68_s15 = sshll.u32 %s9731_s14, 4  ;;  %s44_s13 = int_to_ptr.vmem [resolvable:$true] %s43_s13  ;;  %s69_s15 = int_to_ptr.vmem [resolvable:$true] %s68_s15 }
  0x36   :  { %s9673_s18 = scalar_lea.hbm %s10182_s3, 12288 }
  0x37   :  { %p9674_p10 = scmp.ne.s32.totalorder %s10182_s3, %s9673_s18  ;;  %p9677_p11 = scmp.lt.u32.totalorder %s9673_s18, %s10182_s3 }
  0x39   :  { %p9679_p12 = pnand %p9677_p11, %p9674_p10 }
  0x3b   :  { %9682 = shalt.err (!%p9679_p12)
}
  0x3c   :  { %s9683_s1 = scalar_lea.vmem %s44_s13, 12288  ;;  %p9688_p0 = scmp.lt.s32.totalorder %s44_s13, %s44_s13 }
  0x3d   :  { %p9684_p13 = scmp.ne.s32.totalorder %s44_s13, %s9683_s1  ;;  %p9689_p1 = scmp.lt.s32.totalorder %s9683_s1, %s9683_s1 }
  0x3f   :  { %p9690_p2 = por %p9689_p1, %p9688_p0 }
  0x41   :  { %p9691_p3 = pnand %p9690_p2, %p9684_p13 }
  0x43   :  { %9694 = shalt.err (!%p9691_p3)
}
  0x44   :  { %49 = dma.hbm_to_vmem [thread:$0]  %s10182_s3, 12288, %s44_s13, [#allocation5], %s9726_s20, %s9726_s20, %s9727_s21  }
  0x45   :  { %s9695_s27 = scalar_lea.hbm %s10184_s5, 96 }
  0x46   :  { %p9696_p4 = scmp.ne.s32.totalorder %s10184_s5, %s9695_s27  ;;  %p9699_p5 = scmp.lt.u32.totalorder %s9695_s27, %s10184_s5 }
  0x48   :  { %p9701_p6 = pnand %p9699_p5, %p9696_p4 }
  0x4a   :  { %9704 = shalt.err (!%p9701_p6)
}
  0x4b   :  { %s9705_s4 = scalar_lea.vmem %s69_s15, 96  ;;  %p9710_p8 = scmp.lt.s32.totalorder %s69_s15, %s69_s15 }
  0x4c   :  { %p9706_p7 = scmp.ne.s32.totalorder %s69_s15, %s9705_s4  ;;  %p9711_p9 = scmp.lt.s32.totalorder %s9705_s4, %s9705_s4 }
  0x4e   :  { %p9712_p10 = por %p9711_p9, %p9710_p8 }
  0x50   :  { %p9713_p11 = pnand %p9712_p10, %p9706_p7 }
  0x52   :  { %9716 = shalt.err (!%p9713_p11)
}
  0x53   :  { %71 = dma.hbm_to_vmem [thread:$0]  %s10184_s5, 96, %s69_s15, [#allocation8]  }
  0x54   :  { %9717 = dma.done.wait [#allocation3], 98304  }
  0x55   :  { %9718 = vsyncadd [#allocation3], 4294868992 }
  0x56   :  { %9719 = dma.done.wait [#allocation5], 12416  }
  0x57   :  { %9720 = vsyncadd [#allocation5], 4294954880 }
  0x58   :  { %9721 = dma.done.wait [#allocation8], 12384  }
  0x59   :  { %9722 = vsyncadd [#allocation8], 4294954912  ;;  %v112_v0 = vld [vmem:[#allocation2] sm:$0xff]  ;;  %v113_v2 = vld [vmem:[#allocation2 + $0x8] sm:$0xff] }
  0x5a   :  { %v116_v1 = vld [vmem:[#allocation2 + $0x20] sm:$0xff]  ;;  %v117_v4 = vld [vmem:[#allocation2 + $0x28] sm:$0xff] }
  0x5b   :  { %v8002_v3 = vcombine.high %v112_v0, %v116_v1  ;;  %v8001_v5 = vcombine.low %v112_v0, %v116_v1  ;;  %v120_v6 = vld [vmem:[#allocation2 + $0x40] sm:$0xff]  ;;  %v8004_v8 = vcombine.high %v113_v2, %v117_v4  ;;  %v8003_v9 = vcombine.low %v113_v2, %v117_v4  ;;  %v121_v11 = vld [vmem:[#allocation2 + $0x48] sm:$0xff] }
  0x5c   :  { %v124_v7 = vld [vmem:[#allocation2 + $0x60] sm:$0xff]  ;;  %v125_v12 = vld [vmem:[#allocation2 + $0x68] sm:$0xff] }
  0x5d   :  { %v8010_v10 = vcombine.high %v120_v6, %v124_v7  ;;  %v128_v13 = vld [vmem:[#allocation2 + $0x80] sm:$0xff]  ;;  %4882 = vmatprep.subr.bf16.mxu0 %v8002_v3  ;;  %v8012_v14 = vcombine.high %v121_v11, %v125_v12  ;;  %v129_v16 = vld [vmem:[#allocation2 + $0x88] sm:$0xff]  ;;  %5200 = vmatprep.subr.bf16.mxu1 %v8004_v8  ;;  %v8009_v18 = vcombine.low %v120_v6, %v124_v7 }
  0x5e   :  { %v132_v15 = vld [vmem:[#allocation2 + $0xa0] sm:$0xff]  ;;  %v133_v17 = vld [vmem:[#allocation2 + $0xa8] sm:$0xff]  ;;  %4883 = vmatpush1.bf16.msra.mxu0 %v8001_v5  ;;  %5201 = vmatpush1.bf16.msra.mxu1 %v8003_v9  ;;  %v8011_v19 = vcombine.low %v121_v11, %v125_v12 }
  0x5f   :  { %4884 = vmatprep.subr.bf16.mxu0 %v8010_v10  ;;  %v8018_v20 = vcombine.high %v128_v13, %v132_v15  ;;  %5202 = vmatprep.subr.bf16.mxu1 %v8012_v14  ;;  %v8020_v21 = vcombine.high %v129_v16, %v133_v17  ;;  %v136_v22 = vld [vmem:[#allocation2 + $0xc0] sm:$0xff]  ;;  %v137_v24 = vld [vmem:[#allocation2 + $0xc8] sm:$0xff]  ;;  %v8017_v26 = vcombine.low %v128_v13, %v132_v15 }
  0x60   :  { %v140_v23 = vld [vmem:[#allocation2 + $0xe0] sm:$0xff]  ;;  %v141_v25 = vld [vmem:[#allocation2 + $0xe8] sm:$0xff]  ;;  %v8019_v27 = vcombine.low %v129_v16, %v133_v17 }
  0x61   :  { %v8026_v28 = vcombine.high %v136_v22, %v140_v23  ;;  %v8028_v29 = vcombine.high %v137_v24, %v141_v25  ;;  %v144_v30 = vld [vmem:[#allocation2 + $0x100] sm:$0xff]  ;;  %v145_v32 = vld [vmem:[#allocation2 + $0x108] sm:$0xff]  ;;  %v8025_v34 = vcombine.low %v136_v22, %v140_v23  ;;  %v8027_v35 = vcombine.low %v137_v24, %v141_v25 }
  0x62   :  { %4885 = vmatpush1.bf16.msra.mxu0 %v8009_v18  ;;  %5203 = vmatpush1.bf16.msra.mxu1 %v8011_v19  ;;  %v148_v31 = vld [vmem:[#allocation2 + $0x120] sm:$0xff]  ;;  %v149_v33 = vld [vmem:[#allocation2 + $0x128] sm:$0xff] }
  0x63   :  { %4886 = vmatprep.subr.bf16.mxu0 %v8018_v20  ;;  %5204 = vmatprep.subr.bf16.mxu1 %v8020_v21  ;;  %v8034_v36 = vcombine.high %v144_v30, %v148_v31  ;;  %v8036_v37 = vcombine.high %v145_v32, %v149_v33  ;;  %v152_v38 = vld [vmem:[#allocation2 + $0x140] sm:$0xff]  ;;  %v153_v40 = vld [vmem:[#allocation2 + $0x148] sm:$0xff]  ;;  %v8033_v42 = vcombine.low %v144_v30, %v148_v31 }
  0x64   :  { %v156_v39 = vld [vmem:[#allocation2 + $0x160] sm:$0xff]  ;;  %v157_v41 = vld [vmem:[#allocation2 + $0x168] sm:$0xff]  ;;  %v8035_v43 = vcombine.low %v145_v32, %v149_v33 }
  0x65   :  { %v8042_v44 = vcombine.high %v152_v38, %v156_v39  ;;  %v8044_v45 = vcombine.high %v153_v40, %v157_v41  ;;  %v160_v46 = vld [vmem:[#allocation2 + $0x180] sm:$0xff]  ;;  %v161_v48 = vld [vmem:[#allocation2 + $0x188] sm:$0xff]  ;;  %v8041_v50 = vcombine.low %v152_v38, %v156_v39  ;;  %v8043_v51 = vcombine.low %v153_v40, %v157_v41 }
  0x66   :  { %4887 = vmatpush1.bf16.msra.mxu0 %v8017_v26  ;;  %5205 = vmatpush1.bf16.msra.mxu1 %v8019_v27  ;;  %v164_v47 = vld [vmem:[#allocation2 + $0x1a0] sm:$0xff]  ;;  %v165_v49 = vld [vmem:[#allocation2 + $0x1a8] sm:$0xff] }
  0x67   :  { %4888 = vmatprep.subr.bf16.mxu0 %v8026_v28  ;;  %5206 = vmatprep.subr.bf16.mxu1 %v8028_v29  ;;  %v8050_v52 = vcombine.high %v160_v46, %v164_v47  ;;  %v8052_v53 = vcombine.high %v161_v48, %v165_v49  ;;  %v168_v54 = vld [vmem:[#allocation2 + $0x1c0] sm:$0xff]  ;;  %v169_v57 = vld [vmem:[#allocation2 + $0x1c8] sm:$0xff]  ;;  %v8049_v59 = vcombine.low %v160_v46, %v164_v47 }
  0x68   :  { %v172_v55 = vld [vmem:[#allocation2 + $0x1e0] sm:$0xff]  ;;  %v173_v58 = vld [vmem:[#allocation2 + $0x1e8] sm:$0xff]  ;;  %v8051_v60 = vcombine.low %v161_v48, %v165_v49 }
  0x69   :  { %v9290_v56 = vld [vmem:[%s10179_s0 + $0x4] ss:$48 sps:$4 sm:$0xff]   ;;  %v8058_v61 = vcombine.high %v168_v54, %v172_v55  ;;  %v8060_v62 = vcombine.high %v169_v57, %v173_v58  ;;  %v177_v1 = vld [vmem:[#allocation2 + $0x208] sm:$0xff]  ;;  %v8057_v3 = vcombine.low %v168_v54, %v172_v55  ;;  %v8059_v4 = vcombine.low %v169_v57, %v173_v58 }
  0x6a   :  { %4889 = vmatpush1.bf16.msra.mxu0 %v8025_v34  ;;  %5207 = vmatpush1.bf16.msra.mxu1 %v8027_v35  ;;  %v176_v63 = vld [vmem:[#allocation2 + $0x200] sm:$0xff]  ;;  %v181_v2 = vld [vmem:[#allocation2 + $0x228] sm:$0xff] }
  0x6b   :  { %4890 = vmatprep.subr.bf16.mxu0 %v8034_v36  ;;  %5208 = vmatprep.subr.bf16.mxu1 %v8036_v37  ;;  %v180_v0 = vld [vmem:[#allocation2 + $0x220] sm:$0xff]  ;;  %v8068_v6 = vcombine.high %v177_v1, %v181_v2  ;;  %v185_v9 = vld [vmem:[#allocation2 + $0x248] sm:$0xff]  ;;  %v8067_v12 = vcombine.low %v177_v1, %v181_v2 }
  0x6c   :  { %4914 = vmatprep.mubr.bf16.mxu0 %v9290_v56  ;;  %5232 = vmatprep.mubr.bf16.mxu1 %v9290_v56  ;;  %v8066_v5 = vcombine.high %v176_v63, %v180_v0  ;;  %v184_v7 = vld [vmem:[#allocation2 + $0x240] sm:$0xff]  ;;  %v189_v10 = vld [vmem:[#allocation2 + $0x268] sm:$0xff]  ;;  %v8065_v11 = vcombine.low %v176_v63, %v180_v0 }
  0x6d   :  { %v188_v8 = vld [vmem:[#allocation2 + $0x260] sm:$0xff]  ;;  %v8076_v14 = vcombine.high %v185_v9, %v189_v10  ;;  %v193_v17 = vld [vmem:[#allocation2 + $0x288] sm:$0xff]  ;;  %v8075_v20 = vcombine.low %v185_v9, %v189_v10 }
  0x6e   :  { %4891 = vmatpush1.bf16.msra.mxu0 %v8033_v42  ;;  %5209 = vmatpush1.bf16.msra.mxu1 %v8035_v43  ;;  %v8074_v13 = vcombine.high %v184_v7, %v188_v8  ;;  %v192_v15 = vld [vmem:[#allocation2 + $0x280] sm:$0xff]  ;;  %v197_v18 = vld [vmem:[#allocation2 + $0x2a8] sm:$0xff]  ;;  %v8073_v19 = vcombine.low %v184_v7, %v188_v8 }
  0x6f   :  { %4892 = vmatprep.subr.bf16.mxu0 %v8042_v44  ;;  %5210 = vmatprep.subr.bf16.mxu1 %v8044_v45  ;;  %v196_v16 = vld [vmem:[#allocation2 + $0x2a0] sm:$0xff]  ;;  %v8084_v22 = vcombine.high %v193_v17, %v197_v18  ;;  %v201_v25 = vld [vmem:[#allocation2 + $0x2c8] sm:$0xff]  ;;  %v8083_v28 = vcombine.low %v193_v17, %v197_v18 }
  0x70   :  { %v8082_v21 = vcombine.high %v192_v15, %v196_v16  ;;  %v200_v23 = vld [vmem:[#allocation2 + $0x2c0] sm:$0xff]  ;;  %v205_v26 = vld [vmem:[#allocation2 + $0x2e8] sm:$0xff]  ;;  %v8081_v27 = vcombine.low %v192_v15, %v196_v16 }
  0x71   :  { %v204_v24 = vld [vmem:[#allocation2 + $0x2e0] sm:$0xff]  ;;  %v8092_v30 = vcombine.high %v201_v25, %v205_v26  ;;  %v209_v33 = vld [vmem:[#allocation2 + $0x308] sm:$0xff]  ;;  %v8091_v36 = vcombine.low %v201_v25, %v205_v26 }
  0x72   :  { %4893 = vmatpush1.bf16.msra.mxu0 %v8041_v50  ;;  %5211 = vmatpush1.bf16.msra.mxu1 %v8043_v51  ;;  %v8090_v29 = vcombine.high %v200_v23, %v204_v24  ;;  %v208_v31 = vld [vmem:[#allocation2 + $0x300] sm:$0xff]  ;;  %v213_v34 = vld [vmem:[#allocation2 + $0x328] sm:$0xff]  ;;  %v8089_v35 = vcombine.low %v200_v23, %v204_v24 }
  0x73   :  { %4894 = vmatprep.subr.bf16.mxu0 %v8050_v52  ;;  %5212 = vmatprep.subr.bf16.mxu1 %v8052_v53  ;;  %v212_v32 = vld [vmem:[#allocation2 + $0x320] sm:$0xff]  ;;  %v8100_v38 = vcombine.high %v209_v33, %v213_v34  ;;  %v217_v41 = vld [vmem:[#allocation2 + $0x348] sm:$0xff]  ;;  %v8099_v44 = vcombine.low %v209_v33, %v213_v34 }
  0x74   :  { %v8098_v37 = vcombine.high %v208_v31, %v212_v32  ;;  %v216_v39 = vld [vmem:[#allocation2 + $0x340] sm:$0xff]  ;;  %v221_v42 = vld [vmem:[#allocation2 + $0x368] sm:$0xff]  ;;  %v8097_v43 = vcombine.low %v208_v31, %v212_v32 }
  0x75   :  { %v220_v40 = vld [vmem:[#allocation2 + $0x360] sm:$0xff]  ;;  %v8108_v46 = vcombine.high %v217_v41, %v221_v42  ;;  %v225_v49 = vld [vmem:[#allocation2 + $0x388] sm:$0xff]  ;;  %v8107_v52 = vcombine.low %v217_v41, %v221_v42 }
  0x76   :  { %4895 = vmatpush1.bf16.msra.mxu0 %v8049_v59  ;;  %5213 = vmatpush1.bf16.msra.mxu1 %v8051_v60  ;;  %v8106_v45 = vcombine.high %v216_v39, %v220_v40  ;;  %v224_v47 = vld [vmem:[#allocation2 + $0x380] sm:$0xff]  ;;  %v229_v50 = vld [vmem:[#allocation2 + $0x3a8] sm:$0xff]  ;;  %v8105_v51 = vcombine.low %v216_v39, %v220_v40 }
  0x77   :  { %4896 = vmatprep.subr.bf16.mxu0 %v8058_v61  ;;  %5214 = vmatprep.subr.bf16.mxu1 %v8060_v62  ;;  %v228_v48 = vld [vmem:[#allocation2 + $0x3a0] sm:$0xff]  ;;  %v8116_v54 = vcombine.high %v225_v49, %v229_v50  ;;  %v233_v57 = vld [vmem:[#allocation2 + $0x3c8] sm:$0xff]  ;;  %v8115_v60 = vcombine.low %v225_v49, %v229_v50 }
  0x78   :  { %v8114_v53 = vcombine.high %v224_v47, %v228_v48  ;;  %v232_v55 = vld [vmem:[#allocation2 + $0x3c0] sm:$0xff]  ;;  %v237_v58 = vld [vmem:[#allocation2 + $0x3e8] sm:$0xff]  ;;  %v8113_v59 = vcombine.low %v224_v47, %v228_v48 }
  0x79   :  { %v236_v56 = vld [vmem:[#allocation2 + $0x3e0] sm:$0xff]  ;;  %v8124_v62 = vcombine.high %v233_v57, %v237_v58  ;;  %v241_v1 = vld [vmem:[#allocation2 + $0x408] sm:$0xff] }
  0x7a   :  { %4897 = vmatpush1.bf16.msra.mxu0 %v8057_v3  ;;  %5215 = vmatpush1.bf16.msra.mxu1 %v8059_v4  ;;  %v8122_v61 = vcombine.high %v232_v55, %v236_v56  ;;  %v240_v63 = vld [vmem:[#allocation2 + $0x400] sm:$0xff]  ;;  %v245_v2 = vld [vmem:[#allocation2 + $0x428] sm:$0xff]  ;;  %v8121_v3 = vcombine.low %v232_v55, %v236_v56  ;;  %v8123_v4 = vcombine.low %v233_v57, %v237_v58 }
  0x7b   :  { %4898 = vmatprep.subr.bf16.mxu0 %v8066_v5  ;;  %5216 = vmatprep.subr.bf16.mxu1 %v8068_v6  ;;  %v244_v0 = vld [vmem:[#allocation2 + $0x420] sm:$0xff]  ;;  %v8132_v6 = vcombine.high %v241_v1, %v245_v2  ;;  %v249_v10 = vld [vmem:[#allocation2 + $0x448] sm:$0xff] }
  0x7c   :  { %v8130_v5 = vcombine.high %v240_v63, %v244_v0  ;;  %v248_v7 = vld [vmem:[#allocation2 + $0x440] sm:$0xff] }
  0x7d   :  { %v252_v8 = vld [vmem:[#allocation2 + $0x460] sm:$0xff] }
  0x7e   :  { %4899 = vmatpush1.bf16.msra.mxu0 %v8065_v11  ;;  %5217 = vmatpush1.bf16.msra.mxu1 %v8067_v12  ;;  %v9292_v9 = vld [vmem:[%s10179_s0] ss:$48 sps:$4 sm:$0xff]   ;;  %v253_v11 = vld [vmem:[#allocation2 + $0x468] sm:$0xff]  ;;  %v8129_v12 = vcombine.low %v240_v63, %v244_v0  ;;  %v9293_v18 = vld [vmem:[%s10179_s0 + $0x64] ss:$48 sps:$4 sm:$0xff]  }
  0x7f   :  { %4900 = vmatprep.subr.bf16.mxu0 %v8074_v13  ;;  %5218 = vmatprep.subr.bf16.mxu1 %v8076_v14  ;;  %v8131_v13 = vcombine.low %v241_v1, %v245_v2  ;;  %v8138_v14 = vcombine.high %v248_v7, %v252_v8  ;;  %v8140_v15 = vcombine.high %v249_v10, %v253_v11  ;;  %v256_v16 = vld [vmem:[#allocation2 + $0x480] sm:$0xff] }
  0x80   :  { %v260_v17 = vld [vmem:[#allocation2 + $0x4a0] sm:$0xff] }
  0x81   :  { %v8146_v23 = vcombine.high %v256_v16, %v260_v17  ;;  %v264_v25 = vld [vmem:[#allocation2 + $0x4c0] sm:$0xff] }
  0x82   :  { %4901 = vmatpush1.bf16.msra.mxu0 %v8073_v19  ;;  %5219 = vmatpush1.bf16.msra.mxu1 %v8075_v20  ;;  %v257_v19 = vld [vmem:[#allocation2 + $0x488] sm:$0xff]  ;;  %v268_v26 = vld [vmem:[#allocation2 + $0x4e0] sm:$0xff] }
  0x83   :  { %4902 = vmatprep.subr.bf16.mxu0 %v8082_v21  ;;  %5220 = vmatprep.subr.bf16.mxu1 %v8084_v22  ;;  %v261_v20 = vld [vmem:[#allocation2 + $0x4a8] sm:$0xff]  ;;  %v8137_v21 = vcombine.low %v248_v7, %v252_v8  ;;  %v8139_v22 = vcombine.low %v249_v10, %v253_v11  ;;  %v8154_v32 = vcombine.high %v264_v25, %v268_v26  ;;  %v272_v33 = vld [vmem:[#allocation2 + $0x500] sm:$0xff] }
  0x84   :  { %v8148_v24 = vcombine.high %v257_v19, %v261_v20  ;;  %v8147_v31 = vcombine.low %v257_v19, %v261_v20  ;;  %v276_v34 = vld [vmem:[#allocation2 + $0x520] sm:$0xff]  ;;  %v8153_v39 = vcombine.low %v264_v25, %v268_v26  ;;  %v321_v20 = vld [vmem:[#allocation2 + $0x688] sm:$0xff] }
  0x85   :  { %v8162_v41 = vcombine.high %v272_v33, %v276_v34  ;;  %v280_v42 = vld [vmem:[#allocation2 + $0x540] sm:$0xff]  ;;  %v8161_v47 = vcombine.low %v272_v33, %v276_v34 }
  0x86   :  { %4903 = vmatpush1.bf16.msra.mxu0 %v8081_v27  ;;  %5221 = vmatpush1.bf16.msra.mxu1 %v8083_v28  ;;  %v265_v27 = vld [vmem:[#allocation2 + $0x4c8] sm:$0xff]  ;;  %v288_v50 = vld [vmem:[#allocation2 + $0x580] sm:$0xff] }
  0x87   :  { %4904 = vmatprep.subr.bf16.mxu0 %v8090_v29  ;;  %5222 = vmatprep.subr.bf16.mxu1 %v8092_v30  ;;  %v269_v28 = vld [vmem:[#allocation2 + $0x4e8] sm:$0xff]  ;;  %v9295_v29 = vld [vmem:[%s10179_s0 + $0x60] ss:$48 sps:$4 sm:$0xff]   ;;  %v8145_v30 = vcombine.low %v256_v16, %v260_v17 }
  0x88   :  { %v8155_v40 = vcombine.low %v265_v27, %v269_v28  ;;  %v296_v58 = vld [vmem:[#allocation2 + $0x5c0] sm:$0xff] }
  0x89   :  { %v304_v2 = vld [vmem:[#allocation2 + $0x600] sm:$0xff] }
  0x8a   :  { %4905 = vmatpush1.bf16.msra.mxu0 %v8089_v35  ;;  %5223 = vmatpush1.bf16.msra.mxu1 %v8091_v36  ;;  %v273_v35 = vld [vmem:[#allocation2 + $0x508] sm:$0xff]  ;;  %v8156_v36 = vcombine.high %v265_v27, %v269_v28  ;;  %v312_v10 = vld [vmem:[#allocation2 + $0x640] sm:$0xff] }
  0x8b   :  { %4906 = vmatprep.subr.bf16.mxu0 %v8098_v37  ;;  %5224 = vmatprep.subr.bf16.mxu1 %v8100_v38  ;;  %v277_v37 = vld [vmem:[#allocation2 + $0x528] sm:$0xff]  ;;  %v316_v11 = vld [vmem:[#allocation2 + $0x660] sm:$0xff] }
  0x8c   :  { %v9298_v38 = vld [vmem:[%s10179_s0 + $0xc] ss:$48 sps:$4 sm:$0xff]   ;;  %v8163_v48 = vcombine.low %v273_v35, %v277_v37  ;;  %v8202_v17 = vcombine.high %v312_v10, %v316_v11  ;;  %v324_v19 = vld [vmem:[#allocation2 + $0x6a0] sm:$0xff] }
  0x8d   :  { %v328_v26 = vld [vmem:[#allocation2 + $0x6c0] sm:$0xff]  ;;  %v329_v28 = vld [vmem:[#allocation2 + $0x6c8] sm:$0xff] }
  0x8e   :  { %4907 = vmatpush1.bf16.msra.mxu0 %v8097_v43  ;;  %5225 = vmatpush1.bf16.msra.mxu1 %v8099_v44  ;;  %v284_v43 = vld [vmem:[#allocation2 + $0x560] sm:$0xff]  ;;  %v281_v44 = vld [vmem:[#allocation2 + $0x548] sm:$0xff] }
  0x8f   :  { %4908 = vmatprep.subr.bf16.mxu0 %v8106_v45  ;;  %5226 = vmatprep.subr.bf16.mxu1 %v8108_v46  ;;  %v8164_v45 = vcombine.high %v273_v35, %v277_v37  ;;  %v285_v46 = vld [vmem:[#allocation2 + $0x568] sm:$0xff]  ;;  %v8170_v49 = vcombine.high %v280_v42, %v284_v43  ;;  %v8169_v55 = vcombine.low %v280_v42, %v284_v43  ;;  %v332_v27 = vld [vmem:[#allocation2 + $0x6e0] sm:$0xff] }
  0x90   :  { %v8171_v56 = vcombine.low %v281_v44, %v285_v46  ;;  %v8218_v33 = vcombine.high %v328_v26, %v332_v27  ;;  %v336_v34 = vld [vmem:[#allocation2 + $0x700] sm:$0xff] }
  0x91   :  { %v340_v35 = vld [vmem:[#allocation2 + $0x720] sm:$0xff] }
  0x92   :  { %4909 = vmatpush1.bf16.msra.mxu0 %v8105_v51  ;;  %5227 = vmatpush1.bf16.msra.mxu1 %v8107_v52  ;;  %v292_v51 = vld [vmem:[#allocation2 + $0x5a0] sm:$0xff]  ;;  %v289_v52 = vld [vmem:[#allocation2 + $0x588] sm:$0xff] }
  0x93   :  { %4910 = vmatprep.subr.bf16.mxu0 %v8114_v53  ;;  %5228 = vmatprep.subr.bf16.mxu1 %v8116_v54  ;;  %v8172_v53 = vcombine.high %v281_v44, %v285_v46  ;;  %v293_v54 = vld [vmem:[#allocation2 + $0x5a8] sm:$0xff]  ;;  %v8178_v57 = vcombine.high %v288_v50, %v292_v51  ;;  %v8177_v63 = vcombine.low %v288_v50, %v292_v51  ;;  %v344_v42 = vld [vmem:[#allocation2 + $0x740] sm:$0xff] }
  0x94   :  { %v8179_v0 = vcombine.low %v289_v52, %v293_v54  ;;  %v348_v43 = vld [vmem:[#allocation2 + $0x760] sm:$0xff]  ;;  %v345_v44 = vld [vmem:[#allocation2 + $0x748] sm:$0xff] }
  0x95   :  { %v349_v46 = vld [vmem:[#allocation2 + $0x768] sm:$0xff]  ;;  %v352_v50 = vld [vmem:[#allocation2 + $0x780] sm:$0xff] }
  0x96   :  { %4911 = vmatpush1.bf16.msra.mxu0 %v8113_v59  ;;  %5229 = vmatpush1.bf16.msra.mxu1 %v8115_v60  ;;  %v300_v59 = vld [vmem:[#allocation2 + $0x5e0] sm:$0xff]  ;;  %v297_v60 = vld [vmem:[#allocation2 + $0x5c8] sm:$0xff] }
  0x97   :  { %4912 = vmatprep.subr.bf16.mxu0 %v8122_v61  ;;  %5230 = vmatprep.subr.bf16.mxu1 %v8124_v62  ;;  %v8180_v61 = vcombine.high %v289_v52, %v293_v54  ;;  %v301_v62 = vld [vmem:[#allocation2 + $0x5e8] sm:$0xff]  ;;  %v8186_v1 = vcombine.high %v296_v58, %v300_v59  ;;  %v8185_v7 = vcombine.low %v296_v58, %v300_v59  ;;  %v356_v51 = vld [vmem:[#allocation2 + $0x7a0] sm:$0xff] }
  0x98   :  { %v8187_v8 = vcombine.low %v297_v60, %v301_v62  ;;  %v353_v52 = vld [vmem:[#allocation2 + $0x788] sm:$0xff]  ;;  %v360_v58 = vld [vmem:[#allocation2 + $0x7c0] sm:$0xff] }
  0x99   :  { %v357_v54 = vld [vmem:[#allocation2 + $0x7a8] sm:$0xff]  ;;  %v364_v59 = vld [vmem:[#allocation2 + $0x7e0] sm:$0xff] }
  0x9a   :  { %4913 = vmatpush1.bf16.msra.mxu0 %v8121_v3  ;;  %5231 = vmatpush1.bf16.msra.mxu1 %v8123_v4  ;;  %v308_v3 = vld [vmem:[#allocation2 + $0x620] sm:$0xff]  ;;  %v305_v4 = vld [vmem:[#allocation2 + $0x608] sm:$0xff] }
  0x9b   :  { %4935 = vmatprep.subr.bf16.mxu0 %v8130_v5  ;;  %5253 = vmatprep.subr.bf16.mxu1 %v8132_v6  ;;  %v8188_v5 = vcombine.high %v297_v60, %v301_v62  ;;  %v309_v6 = vld [vmem:[#allocation2 + $0x628] sm:$0xff] }
  0x9c   :  { %v8195_v16 = vcombine.low %v305_v4, %v309_v6  ;;  %v361_v60 = vld [vmem:[#allocation2 + $0x7c8] sm:$0xff] }
  0x9d   :  { %4915 = vmatmul.mubr.bf16.vlgmr.msra.gmra.mrb[0].mxu0 %v9292_v9  ;;  %5233 = vmatmul.mubr.bf16.vlgmr.msra.gmra.mrb[0].mxu1 %v9292_v9  ;;  %v8194_v9 = vcombine.high %v304_v2, %v308_v3  ;;  %v365_v62 = vld [vmem:[#allocation2 + $0x7e8] sm:$0xff] }
  0x9e   :  { %4936 = vmatpush1.bf16.msra.mxu0 %v8129_v12  ;;  %5254 = vmatpush1.bf16.msra.mxu1 %v8131_v13  ;;  %v313_v12 = vld [vmem:[#allocation2 + $0x648] sm:$0xff]  ;;  %v8196_v13 = vcombine.high %v305_v4, %v309_v6  ;;  %v372_v4 = vld [vmem:[#allocation2 + $0x820] sm:$0xff] }
  0x9f   :  { %4937 = vmatprep.subr.bf16.mxu0 %v8138_v14  ;;  %5255 = vmatprep.subr.bf16.mxu1 %v8140_v15  ;;  %v317_v14 = vld [vmem:[#allocation2 + $0x668] sm:$0xff]  ;;  %v8193_v15 = vcombine.low %v304_v2, %v308_v3  ;;  %v368_v2 = vld [vmem:[#allocation2 + $0x800] sm:$0xff]  ;;  %v8252_v3 = vcombine.high %v361_v60, %v365_v62 }
  0xa0   :  { %4924 = vmatprep.mubr.bf16.mxu0 %v9293_v18  ;;  %5242 = vmatprep.mubr.bf16.mxu1 %v9293_v18  ;;  %v320_v18 = vld [vmem:[#allocation2 + $0x680] sm:$0xff]  ;;  %v373_v6 = vld [vmem:[#allocation2 + $0x828] sm:$0xff] }
  0xa1   :  { %v8210_v25 = vcombine.high %v320_v18, %v324_v19 }
  0xa2   :  { %4938 = vmatpush1.bf16.msra.mxu0 %v8137_v21  ;;  %5256 = vmatpush1.bf16.msra.mxu1 %v8139_v22  ;;  %v8204_v21 = vcombine.high %v313_v12, %v317_v14  ;;  %v325_v22 = vld [vmem:[#allocation2 + $0x6a8] sm:$0xff] }
  0xa3   :  { %4939 = vmatprep.subr.bf16.mxu0 %v8146_v23  ;;  %5257 = vmatprep.subr.bf16.mxu1 %v8148_v24  ;;  %v8201_v23 = vcombine.low %v312_v10, %v316_v11  ;;  %v8203_v24 = vcombine.low %v313_v12, %v317_v14  ;;  %v8258_v10 = vcombine.high %v368_v2, %v372_v4  ;;  %v376_v11 = vld [vmem:[#allocation2 + $0x840] sm:$0xff] }
  0xa4   :  { %v380_v12 = vld [vmem:[#allocation2 + $0x860] sm:$0xff] }
  0xa5   :  { %4925 = vmatmul.mubr.bf16.gmra.mrb[4].mxu0 %v9295_v29  ;;  %5243 = vmatmul.mubr.bf16.gmra.mrb[4].mxu1 %v9295_v29  ;;  %v8212_v29 = vcombine.high %v321_v20, %v325_v22 }
  0xa6   :  { %4940 = vmatpush1.bf16.msra.mxu0 %v8145_v30  ;;  %5258 = vmatpush1.bf16.msra.mxu1 %v8147_v31  ;;  %v333_v30 = vld [vmem:[#allocation2 + $0x6e8] sm:$0xff]  ;;  %v8209_v31 = vcombine.low %v320_v18, %v324_v19  ;;  %v8266_v18 = vcombine.high %v376_v11, %v380_v12  ;;  %v384_v19 = vld [vmem:[#allocation2 + $0x880] sm:$0xff] }
  0xa7   :  { %4941 = vmatprep.subr.bf16.mxu0 %v8154_v32  ;;  %5259 = vmatprep.subr.bf16.mxu1 %v8156_v36  ;;  %v8211_v32 = vcombine.low %v321_v20, %v325_v22  ;;  %v337_v36 = vld [vmem:[#allocation2 + $0x708] sm:$0xff]  ;;  %v8220_v37 = vcombine.high %v329_v28, %v333_v30  ;;  %v388_v20 = vld [vmem:[#allocation2 + $0x8a0] sm:$0xff] }
  0xa8   :  { %4967 = vmatprep.mubr.bf16.mxu0 %v9298_v38  ;;  %5285 = vmatprep.mubr.bf16.mxu1 %v9298_v38  ;;  %v341_v38 = vld [vmem:[#allocation2 + $0x728] sm:$0xff] }
  0xa9   :  { %v385_v22 = vld [vmem:[#allocation2 + $0x888] sm:$0xff] }
  0xaa   :  { %4942 = vmatpush1.bf16.msra.mxu0 %v8153_v39  ;;  %5260 = vmatpush1.bf16.msra.mxu1 %v8155_v40  ;;  %v8217_v39 = vcombine.low %v328_v26, %v332_v27  ;;  %v8219_v40 = vcombine.low %v329_v28, %v333_v30  ;;  %v392_v26 = vld [vmem:[#allocation2 + $0x8c0] sm:$0xff]  ;;  %v8274_v28 = vcombine.high %v384_v19, %v388_v20  ;;  %v393_v30 = vld [vmem:[#allocation2 + $0x8c8] sm:$0xff] }
  0xab   :  { %4943 = vmatprep.subr.bf16.mxu0 %v8162_v41  ;;  %5261 = vmatprep.subr.bf16.mxu1 %v8164_v45  ;;  %v8226_v41 = vcombine.high %v336_v34, %v340_v35  ;;  %v8228_v45 = vcombine.high %v337_v36, %v341_v38 }
  0xae   :  { %4944 = vmatpush1.bf16.msra.mxu0 %v8161_v47  ;;  %5262 = vmatpush1.bf16.msra.mxu1 %v8163_v48  ;;  %v8225_v47 = vcombine.low %v336_v34, %v340_v35  ;;  %v8227_v48 = vcombine.low %v337_v36, %v341_v38  ;;  %v8273_v34 = vcombine.low %v384_v19, %v388_v20  ;;  %v400_v35 = vld [vmem:[#allocation2 + $0x900] sm:$0xff] }
  0xaf   :  { %4945 = vmatprep.subr.bf16.mxu0 %v8170_v49  ;;  %5263 = vmatprep.subr.bf16.mxu1 %v8172_v53  ;;  %v8234_v49 = vcombine.high %v344_v42, %v348_v43  ;;  %v8236_v53 = vcombine.high %v345_v44, %v349_v46  ;;  %v404_v38 = vld [vmem:[#allocation2 + $0x920] sm:$0xff] }
  0xb2   :  { %4946 = vmatpush1.bf16.msra.mxu0 %v8169_v55  ;;  %5264 = vmatpush1.bf16.msra.mxu1 %v8171_v56  ;;  %v8233_v55 = vcombine.low %v344_v42, %v348_v43  ;;  %v8235_v56 = vcombine.low %v345_v44, %v349_v46  ;;  %v9304_v42 = vld [vmem:[%s10179_s0 + $0x14] ss:$48 sps:$4 sm:$0xff]  }
  0xb3   :  { %4947 = vmatprep.subr.bf16.mxu0 %v8178_v57  ;;  %5265 = vmatprep.subr.bf16.mxu1 %v8180_v61  ;;  %v8242_v57 = vcombine.high %v352_v50, %v356_v51  ;;  %v8244_v61 = vcombine.high %v353_v52, %v357_v54  ;;  %v408_v46 = vld [vmem:[#allocation2 + $0x940] sm:$0xff] }
  0xb6   :  { %4948 = vmatpush1.bf16.msra.mxu0 %v8177_v63  ;;  %5266 = vmatpush1.bf16.msra.mxu1 %v8179_v0  ;;  %v8241_v63 = vcombine.low %v352_v50, %v356_v51  ;;  %v8243_v0 = vcombine.low %v353_v52, %v357_v54  ;;  %v413_v50 = vld [vmem:[#allocation2 + $0x968] sm:$0xff]  ;;  %v8289_v51 = vcombine.low %v400_v35, %v404_v38  ;;  %v416_v54 = vld [vmem:[#allocation2 + $0x980] sm:$0xff] }
  0xb7   :  { %4949 = vmatprep.subr.bf16.mxu0 %v8186_v1  ;;  %5267 = vmatprep.subr.bf16.mxu1 %v8188_v5  ;;  %v8250_v1 = vcombine.high %v360_v58, %v364_v59  ;;  %v369_v5 = vld [vmem:[#allocation2 + $0x808] sm:$0xff] }
  0xb8   :  { %v8260_v14 = vcombine.high %v369_v5, %v373_v6 }
  0xba   :  { %4950 = vmatpush1.bf16.msra.mxu0 %v8185_v7  ;;  %5268 = vmatpush1.bf16.msra.mxu1 %v8187_v8  ;;  %v8249_v7 = vcombine.low %v360_v58, %v364_v59  ;;  %v8251_v8 = vcombine.low %v361_v60, %v365_v62  ;;  %v421_v58 = vld [vmem:[#allocation2 + $0x9a8] sm:$0xff]  ;;  %v424_v62 = vld [vmem:[#allocation2 + $0x9c0] sm:$0xff] }
  0xbb   :  { %4951 = vmatprep.subr.bf16.mxu0 %v8194_v9  ;;  %5269 = vmatprep.subr.bf16.mxu1 %v8196_v13  ;;  %v9296_v9 = vld [vmem:[%s10179_s0 + $0x8] ss:$48 sps:$4 sm:$0xff]  }
  0xbc   :  { %v377_v13 = vld [vmem:[#allocation2 + $0x848] sm:$0xff] }
  0xbe   :  { %4952 = vmatpush1.bf16.msra.mxu0 %v8193_v15  ;;  %5270 = vmatpush1.bf16.msra.mxu1 %v8195_v16  ;;  %v381_v15 = vld [vmem:[#allocation2 + $0x868] sm:$0xff]  ;;  %v8257_v16 = vcombine.low %v368_v2, %v372_v4 }
  0xbf   :  { %4953 = vmatprep.subr.bf16.mxu0 %v8202_v17  ;;  %5271 = vmatprep.subr.bf16.mxu1 %v8204_v21  ;;  %v8259_v17 = vcombine.low %v369_v5, %v373_v6  ;;  %v8268_v21 = vcombine.high %v377_v13, %v381_v15  ;;  %v8267_v27 = vcombine.low %v377_v13, %v381_v15  ;;  %v429_v2 = vld [vmem:[#allocation2 + $0x9e8] sm:$0xff]  ;;  %v432_v6 = vld [vmem:[#allocation2 + $0xa00] sm:$0xff] }
  0xc0   :  { %v444_v15 = vld [vmem:[#allocation2 + $0xa60] sm:$0xff] }
  0xc2   :  { %4954 = vmatpush1.bf16.msra.mxu0 %v8201_v23  ;;  %5272 = vmatpush1.bf16.msra.mxu1 %v8203_v24  ;;  %v389_v23 = vld [vmem:[#allocation2 + $0x8a8] sm:$0xff] }
  0xc3   :  { %4955 = vmatprep.subr.bf16.mxu0 %v8210_v25  ;;  %5273 = vmatprep.subr.bf16.mxu1 %v8212_v29  ;;  %v9299_v24 = vld [vmem:[%s10179_s0 + $0x6c] ss:$48 sps:$4 sm:$0xff]   ;;  %v8265_v25 = vcombine.low %v376_v11, %v380_v12  ;;  %v396_v29 = vld [vmem:[#allocation2 + $0x8e0] sm:$0xff]  ;;  %v8275_v36 = vcombine.low %v385_v22, %v389_v23 }
  0xc4   :  { %v8281_v43 = vcombine.low %v392_v26, %v396_v29 }
  0xc6   :  { %4956 = vmatpush1.bf16.msra.mxu0 %v8209_v31  ;;  %5274 = vmatpush1.bf16.msra.mxu1 %v8211_v32  ;;  %v397_v31 = vld [vmem:[#allocation2 + $0x8e8] sm:$0xff]  ;;  %v8276_v32 = vcombine.high %v385_v22, %v389_v23  ;;  %v448_v22 = vld [vmem:[#allocation2 + $0xa80] sm:$0xff] }
  0xc7   :  { %4957 = vmatprep.subr.bf16.mxu0 %v8218_v33  ;;  %5275 = vmatprep.subr.bf16.mxu1 %v8220_v37  ;;  %v9301_v33 = vld [vmem:[%s10179_s0 + $0x68] ss:$48 sps:$4 sm:$0xff]   ;;  %v8282_v37 = vcombine.high %v392_v26, %v396_v29  ;;  %v8283_v44 = vcombine.low %v393_v30, %v397_v31  ;;  %v452_v23 = vld [vmem:[#allocation2 + $0xaa0] sm:$0xff] }
  0xc8   :  { %v453_v26 = vld [vmem:[#allocation2 + $0xaa8] sm:$0xff]  ;;  %v8338_v29 = vcombine.high %v448_v22, %v452_v23 }
  0xca   :  { %4958 = vmatpush1.bf16.msra.mxu0 %v8217_v39  ;;  %5276 = vmatpush1.bf16.msra.mxu1 %v8219_v40  ;;  %v401_v39 = vld [vmem:[#allocation2 + $0x908] sm:$0xff] }
  0xcb   :  { %4959 = vmatprep.subr.bf16.mxu0 %v8226_v41  ;;  %5277 = vmatprep.subr.bf16.mxu1 %v8228_v45  ;;  %v405_v40 = vld [vmem:[#allocation2 + $0x928] sm:$0xff]  ;;  %v8284_v41 = vcombine.high %v393_v30, %v397_v31  ;;  %v8290_v45 = vcombine.high %v400_v35, %v404_v38  ;;  %v456_v30 = vld [vmem:[#allocation2 + $0xac0] sm:$0xff]  ;;  %v8337_v35 = vcombine.low %v448_v22, %v452_v23 }
  0xcc   :  { %v8291_v52 = vcombine.low %v401_v39, %v405_v40  ;;  %v460_v31 = vld [vmem:[#allocation2 + $0xae0] sm:$0xff] }
  0xcd   :  { %v464_v38 = vld [vmem:[#allocation2 + $0xb00] sm:$0xff] }
  0xce   :  { %4960 = vmatpush1.bf16.msra.mxu0 %v8225_v47  ;;  %5278 = vmatpush1.bf16.msra.mxu1 %v8227_v48  ;;  %v412_v47 = vld [vmem:[#allocation2 + $0x960] sm:$0xff]  ;;  %v409_v48 = vld [vmem:[#allocation2 + $0x948] sm:$0xff] }
  0xcf   :  { %4961 = vmatprep.subr.bf16.mxu0 %v8234_v49  ;;  %5279 = vmatprep.subr.bf16.mxu1 %v8236_v53  ;;  %v8292_v49 = vcombine.high %v401_v39, %v405_v40  ;;  %v8298_v53 = vcombine.high %v408_v46, %v412_v47  ;;  %v8297_v59 = vcombine.low %v408_v46, %v412_v47  ;;  %v468_v39 = vld [vmem:[#allocation2 + $0xb20] sm:$0xff]  ;;  %v465_v40 = vld [vmem:[#allocation2 + $0xb08] sm:$0xff] }
  0xd0   :  { %v8299_v60 = vcombine.low %v409_v48, %v413_v50  ;;  %v472_v46 = vld [vmem:[#allocation2 + $0xb40] sm:$0xff] }
  0xd1   :  { %v476_v47 = vld [vmem:[#allocation2 + $0xb60] sm:$0xff] }
  0xd2   :  { %4962 = vmatpush1.bf16.msra.mxu0 %v8233_v55  ;;  %5280 = vmatpush1.bf16.msra.mxu1 %v8235_v56  ;;  %v420_v55 = vld [vmem:[#allocation2 + $0x9a0] sm:$0xff]  ;;  %v417_v56 = vld [vmem:[#allocation2 + $0x988] sm:$0xff] }
  0xd3   :  { %4963 = vmatprep.subr.bf16.mxu0 %v8242_v57  ;;  %5281 = vmatprep.subr.bf16.mxu1 %v8244_v61  ;;  %v8300_v57 = vcombine.high %v409_v48, %v413_v50  ;;  %v8306_v61 = vcombine.high %v416_v54, %v420_v55  ;;  %v8307_v4 = vcombine.low %v417_v56, %v421_v58  ;;  %v473_v48 = vld [vmem:[#allocation2 + $0xb48] sm:$0xff]  ;;  %v512_v23 = vld [vmem:[#allocation2 + $0xc80] sm:$0xff] }
  0xd4   :  { %v477_v50 = vld [vmem:[#allocation2 + $0xb68] sm:$0xff] }
  0xd6   :  { %4964 = vmatpush1.bf16.msra.mxu0 %v8241_v63  ;;  %5282 = vmatpush1.bf16.msra.mxu1 %v8243_v0  ;;  %v428_v63 = vld [vmem:[#allocation2 + $0x9e0] sm:$0xff]  ;;  %v425_v0 = vld [vmem:[#allocation2 + $0x9c8] sm:$0xff] }
  0xd7   :  { %4965 = vmatprep.subr.bf16.mxu0 %v8250_v1  ;;  %5283 = vmatprep.subr.bf16.mxu1 %v8252_v3  ;;  %v8308_v1 = vcombine.high %v417_v56, %v421_v58  ;;  %v8305_v3 = vcombine.low %v416_v54, %v420_v55  ;;  %v8314_v5 = vcombine.high %v424_v62, %v428_v63  ;;  %v480_v54 = vld [vmem:[#allocation2 + $0xb80] sm:$0xff]  ;;  %v481_v56 = vld [vmem:[#allocation2 + $0xb88] sm:$0xff] }
  0xd8   :  { %v8313_v11 = vcombine.low %v424_v62, %v428_v63  ;;  %v8315_v12 = vcombine.low %v425_v0, %v429_v2  ;;  %v484_v55 = vld [vmem:[#allocation2 + $0xba0] sm:$0xff]  ;;  %v485_v58 = vld [vmem:[#allocation2 + $0xba8] sm:$0xff] }
  0xd9   :  { %v488_v62 = vld [vmem:[#allocation2 + $0xbc0] sm:$0xff] }
  0xda   :  { %4966 = vmatpush1.bf16.msra.mxu0 %v8249_v7  ;;  %5284 = vmatpush1.bf16.msra.mxu1 %v8251_v8  ;;  %v436_v7 = vld [vmem:[#allocation2 + $0xa20] sm:$0xff]  ;;  %v433_v8 = vld [vmem:[#allocation2 + $0xa08] sm:$0xff] }
  0xdb   :  { %4988 = vmatprep.subr.bf16.mxu0 %v8258_v10  ;;  %5306 = vmatprep.subr.bf16.mxu1 %v8260_v14  ;;  %v437_v10 = vld [vmem:[#allocation2 + $0xa28] sm:$0xff]  ;;  %v8322_v13 = vcombine.high %v432_v6, %v436_v7  ;;  %v440_v14 = vld [vmem:[#allocation2 + $0xa40] sm:$0xff]  ;;  %v8321_v19 = vcombine.low %v432_v6, %v436_v7 }
  0xdc   :  { %v8323_v20 = vcombine.low %v433_v8, %v437_v10  ;;  %v492_v63 = vld [vmem:[#allocation2 + $0xbe0] sm:$0xff] }
  0xdd   :  { %4968 = vmatmul.mubr.bf16.vlgmr.msra.gmra.mrb[0].mxu0 %v9296_v9  ;;  %5286 = vmatmul.mubr.bf16.vlgmr.msra.gmra.mrb[0].mxu1 %v9296_v9  ;;  %v8316_v9 = vcombine.high %v425_v0, %v429_v2  ;;  %v489_v0 = vld [vmem:[#allocation2 + $0xbc8] sm:$0xff]  ;;  %v496_v6 = vld [vmem:[#allocation2 + $0xc00] sm:$0xff] }
  0xde   :  { %4989 = vmatpush1.bf16.msra.mxu0 %v8257_v16  ;;  %5307 = vmatpush1.bf16.msra.mxu1 %v8259_v17  ;;  %v441_v16 = vld [vmem:[#allocation2 + $0xa48] sm:$0xff]  ;;  %v8324_v17 = vcombine.high %v433_v8, %v437_v10  ;;  %v500_v8 = vld [vmem:[#allocation2 + $0xc20] sm:$0xff] }
  0xdf   :  { %4990 = vmatprep.subr.bf16.mxu0 %v8266_v18  ;;  %5308 = vmatprep.subr.bf16.mxu1 %v8268_v21  ;;  %v445_v18 = vld [vmem:[#allocation2 + $0xa68] sm:$0xff]  ;;  %v8330_v21 = vcombine.high %v440_v14, %v444_v15 }
  0xe0   :  { %4977 = vmatprep.mubr.bf16.mxu0 %v9299_v24  ;;  %5295 = vmatprep.mubr.bf16.mxu1 %v9299_v24  ;;  %v449_v24 = vld [vmem:[#allocation2 + $0xa88] sm:$0xff] }
  0xe1   :  { %v493_v2 = vld [vmem:[#allocation2 + $0xbe8] sm:$0xff] }
  0xe2   :  { %4991 = vmatpush1.bf16.msra.mxu0 %v8265_v25  ;;  %5309 = vmatpush1.bf16.msra.mxu1 %v8267_v27  ;;  %v8332_v25 = vcombine.high %v441_v16, %v445_v18  ;;  %v8329_v27 = vcombine.low %v440_v14, %v444_v15  ;;  %v8380_v7 = vcombine.high %v489_v0, %v493_v2  ;;  %v501_v10 = vld [vmem:[#allocation2 + $0xc28] sm:$0xff]  ;;  %v504_v15 = vld [vmem:[#allocation2 + $0xc40] sm:$0xff] }
  0xe3   :  { %4992 = vmatprep.subr.bf16.mxu0 %v8274_v28  ;;  %5310 = vmatprep.subr.bf16.mxu1 %v8276_v32  ;;  %v8331_v28 = vcombine.low %v441_v16, %v445_v18  ;;  %v457_v32 = vld [vmem:[#allocation2 + $0xac8] sm:$0xff]  ;;  %v8386_v14 = vcombine.high %v496_v6, %v500_v8  ;;  %v508_v16 = vld [vmem:[#allocation2 + $0xc60] sm:$0xff] }
  0xe4   :  { %v8394_v22 = vcombine.high %v504_v15, %v508_v16 }
  0xe5   :  { %4978 = vmatmul.mubr.bf16.gmra.mrb[4].mxu0 %v9301_v33  ;;  %5296 = vmatmul.mubr.bf16.gmra.mrb[4].mxu1 %v9301_v33  ;;  %v8340_v33 = vcombine.high %v449_v24, %v453_v26 }
  0xe6   :  { %4993 = vmatpush1.bf16.msra.mxu0 %v8273_v34  ;;  %5311 = vmatpush1.bf16.msra.mxu1 %v8275_v36  ;;  %v461_v34 = vld [vmem:[#allocation2 + $0xae8] sm:$0xff]  ;;  %v8339_v36 = vcombine.low %v449_v24, %v453_v26  ;;  %v516_v24 = vld [vmem:[#allocation2 + $0xca0] sm:$0xff] }
  0xe7   :  { %4994 = vmatprep.subr.bf16.mxu0 %v8282_v37  ;;  %5312 = vmatprep.subr.bf16.mxu1 %v8284_v41  ;;  %v8346_v37 = vcombine.high %v456_v30, %v460_v31  ;;  %v8348_v41 = vcombine.high %v457_v32, %v461_v34  ;;  %v513_v26 = vld [vmem:[#allocation2 + $0xc88] sm:$0xff] }
  0xe8   :  { %5020 = vmatprep.mubr.bf16.mxu0 %v9304_v42  ;;  %5338 = vmatprep.mubr.bf16.mxu1 %v9304_v42  ;;  %v469_v42 = vld [vmem:[#allocation2 + $0xb28] sm:$0xff] }
  0xea   :  { %4995 = vmatpush1.bf16.msra.mxu0 %v8281_v43  ;;  %5313 = vmatpush1.bf16.msra.mxu1 %v8283_v44  ;;  %v8345_v43 = vcombine.low %v456_v30, %v460_v31  ;;  %v8347_v44 = vcombine.low %v457_v32, %v461_v34  ;;  %v520_v30 = vld [vmem:[#allocation2 + $0xcc0] sm:$0xff]  ;;  %v8402_v32 = vcombine.high %v512_v23, %v516_v24  ;;  %v521_v34 = vld [vmem:[#allocation2 + $0xcc8] sm:$0xff] }
  0xeb   :  { %4996 = vmatprep.subr.bf16.mxu0 %v8290_v45  ;;  %5314 = vmatprep.subr.bf16.mxu1 %v8292_v49  ;;  %v8354_v45 = vcombine.high %v464_v38, %v468_v39  ;;  %v8356_v49 = vcombine.high %v465_v40, %v469_v42 }
  0xee   :  { %4997 = vmatpush1.bf16.msra.mxu0 %v8289_v51  ;;  %5315 = vmatpush1.bf16.msra.mxu1 %v8291_v52  ;;  %v8353_v51 = vcombine.low %v464_v38, %v468_v39  ;;  %v8355_v52 = vcombine.low %v465_v40, %v469_v42  ;;  %v8401_v38 = vcombine.low %v512_v23, %v516_v24  ;;  %v528_v39 = vld [vmem:[#allocation2 + $0xd00] sm:$0xff] }
  0xef   :  { %4998 = vmatprep.subr.bf16.mxu0 %v8298_v53  ;;  %5316 = vmatprep.subr.bf16.mxu1 %v8300_v57  ;;  %v8362_v53 = vcombine.high %v472_v46, %v476_v47  ;;  %v8364_v57 = vcombine.high %v473_v48, %v477_v50  ;;  %v532_v42 = vld [vmem:[#allocation2 + $0xd20] sm:$0xff] }
  0xf2   :  { %4999 = vmatpush1.bf16.msra.mxu0 %v8297_v59  ;;  %5317 = vmatpush1.bf16.msra.mxu1 %v8299_v60  ;;  %v8361_v59 = vcombine.low %v472_v46, %v476_v47  ;;  %v8363_v60 = vcombine.low %v473_v48, %v477_v50  ;;  %v9310_v46 = vld [vmem:[%s10179_s0 + $0x1c] ss:$48 sps:$4 sm:$0xff]   ;;  %v536_v50 = vld [vmem:[#allocation2 + $0xd40] sm:$0xff] }
  0xf3   :  { %5000 = vmatprep.subr.bf16.mxu0 %v8306_v61  ;;  %5318 = vmatprep.subr.bf16.mxu1 %v8308_v1  ;;  %v8370_v61 = vcombine.high %v480_v54, %v484_v55  ;;  %v8372_v1 = vcombine.high %v481_v56, %v485_v58 }
  0xf6   :  { %5001 = vmatpush1.bf16.msra.mxu0 %v8305_v3  ;;  %5319 = vmatpush1.bf16.msra.mxu1 %v8307_v4  ;;  %v8369_v3 = vcombine.low %v480_v54, %v484_v55  ;;  %v8371_v4 = vcombine.low %v481_v56, %v485_v58  ;;  %v541_v54 = vld [vmem:[#allocation2 + $0xd68] sm:$0xff]  ;;  %v8417_v55 = vcombine.low %v528_v39, %v532_v42  ;;  %v544_v58 = vld [vmem:[#allocation2 + $0xd80] sm:$0xff] }
  0xf7   :  { %5002 = vmatprep.subr.bf16.mxu0 %v8314_v5  ;;  %5320 = vmatprep.subr.bf16.mxu1 %v8316_v9  ;;  %v8378_v5 = vcombine.high %v488_v62, %v492_v63  ;;  %v497_v9 = vld [vmem:[#allocation2 + $0xc08] sm:$0xff] }
  0xf8   :  { %v8388_v18 = vcombine.high %v497_v9, %v501_v10 }
  0xfa   :  { %5003 = vmatpush1.bf16.msra.mxu0 %v8313_v11  ;;  %5321 = vmatpush1.bf16.msra.mxu1 %v8315_v12  ;;  %v8377_v11 = vcombine.low %v488_v62, %v492_v63  ;;  %v8379_v12 = vcombine.low %v489_v0, %v493_v2  ;;  %v549_v62 = vld [vmem:[#allocation2 + $0xda8] sm:$0xff] }
  0xfb   :  { %5004 = vmatprep.subr.bf16.mxu0 %v8322_v13  ;;  %5322 = vmatprep.subr.bf16.mxu1 %v8324_v17  ;;  %v9302_v13 = vld [vmem:[%s10179_s0 + $0x10] ss:$48 sps:$4 sm:$0xff]   ;;  %v505_v17 = vld [vmem:[#allocation2 + $0xc48] sm:$0xff] }
  0xfe   :  { %5005 = vmatpush1.bf16.msra.mxu0 %v8321_v19  ;;  %5323 = vmatpush1.bf16.msra.mxu1 %v8323_v20  ;;  %v509_v19 = vld [vmem:[#allocation2 + $0xc68] sm:$0xff]  ;;  %v8385_v20 = vcombine.low %v496_v6, %v500_v8 }
  0xff   :  { %5006 = vmatprep.subr.bf16.mxu0 %v8330_v21  ;;  %5324 = vmatprep.subr.bf16.mxu1 %v8332_v25  ;;  %v8387_v21 = vcombine.low %v497_v9, %v501_v10  ;;  %v8396_v25 = vcombine.high %v505_v17, %v509_v19  ;;  %v8395_v31 = vcombine.low %v505_v17, %v509_v19  ;;  %v557_v6 = vld [vmem:[#allocation2 + $0xde8] sm:$0xff]  ;;  %v568_v19 = vld [vmem:[#allocation2 + $0xe40] sm:$0xff] }
 0x102   :  { %5007 = vmatpush1.bf16.msra.mxu0 %v8329_v27  ;;  %5325 = vmatpush1.bf16.msra.mxu1 %v8331_v28  ;;  %v517_v27 = vld [vmem:[#allocation2 + $0xca8] sm:$0xff]  ;;  %v9305_v28 = vld [vmem:[%s10179_s0 + $0x74] ss:$48 sps:$4 sm:$0xff]  }
 0x103   :  { %5008 = vmatprep.subr.bf16.mxu0 %v8338_v29  ;;  %5326 = vmatprep.subr.bf16.mxu1 %v8340_v33  ;;  %v8393_v29 = vcombine.low %v504_v15, %v508_v16  ;;  %v524_v33 = vld [vmem:[#allocation2 + $0xce0] sm:$0xff]  ;;  %v8403_v40 = vcombine.low %v513_v26, %v517_v27 }
 0x104   :  { %v8409_v47 = vcombine.low %v520_v30, %v524_v33 }
 0x106   :  { %5009 = vmatpush1.bf16.msra.mxu0 %v8337_v35  ;;  %5327 = vmatpush1.bf16.msra.mxu1 %v8339_v36  ;;  %v525_v35 = vld [vmem:[#allocation2 + $0xce8] sm:$0xff]  ;;  %v8404_v36 = vcombine.high %v513_v26, %v517_v27  ;;  %v576_v27 = vld [vmem:[#allocation2 + $0xe80] sm:$0xff] }
 0x107   :  { %5010 = vmatprep.subr.bf16.mxu0 %v8346_v37  ;;  %5328 = vmatprep.subr.bf16.mxu1 %v8348_v41  ;;  %v9307_v37 = vld [vmem:[%s10179_s0 + $0x70] ss:$48 sps:$4 sm:$0xff]   ;;  %v8410_v41 = vcombine.high %v520_v30, %v524_v33  ;;  %v8411_v48 = vcombine.low %v521_v34, %v525_v35  ;;  %v581_v30 = vld [vmem:[#allocation2 + $0xea8] sm:$0xff] }
 0x10a   :  { %5011 = vmatpush1.bf16.msra.mxu0 %v8345_v43  ;;  %5329 = vmatpush1.bf16.msra.mxu1 %v8347_v44  ;;  %v529_v43 = vld [vmem:[#allocation2 + $0xd08] sm:$0xff] }
 0x10b   :  { %5012 = vmatprep.subr.bf16.mxu0 %v8354_v45  ;;  %5330 = vmatprep.subr.bf16.mxu1 %v8356_v49  ;;  %v533_v44 = vld [vmem:[#allocation2 + $0xd28] sm:$0xff]  ;;  %v8412_v45 = vcombine.high %v521_v34, %v525_v35  ;;  %v8418_v49 = vcombine.high %v528_v39, %v532_v42  ;;  %v584_v35 = vld [vmem:[#allocation2 + $0xec0] sm:$0xff] }
 0x10c   :  { %v8419_v56 = vcombine.low %v529_v43, %v533_v44 }
 0x10e   :  { %5013 = vmatpush1.bf16.msra.mxu0 %v8353_v51  ;;  %5331 = vmatpush1.bf16.msra.mxu1 %v8355_v52  ;;  %v540_v51 = vld [vmem:[#allocation2 + $0xd60] sm:$0xff]  ;;  %v537_v52 = vld [vmem:[#allocation2 + $0xd48] sm:$0xff] }
 0x10f   :  { %5014 = vmatprep.subr.bf16.mxu0 %v8362_v53  ;;  %5332 = vmatprep.subr.bf16.mxu1 %v8364_v57  ;;  %v8420_v53 = vcombine.high %v529_v43, %v533_v44  ;;  %v8426_v57 = vcombine.high %v536_v50, %v540_v51  ;;  %v8425_v63 = vcombine.low %v536_v50, %v540_v51  ;;  %v592_v43 = vld [vmem:[#allocation2 + $0xf00] sm:$0xff] }
 0x110   :  { %v8427_v0 = vcombine.low %v537_v52, %v541_v54  ;;  %v596_v44 = vld [vmem:[#allocation2 + $0xf20] sm:$0xff] }
 0x111   :  { %v600_v51 = vld [vmem:[#allocation2 + $0xf40] sm:$0xff] }
 0x112   :  { %5015 = vmatpush1.bf16.msra.mxu0 %v8361_v59  ;;  %5333 = vmatpush1.bf16.msra.mxu1 %v8363_v60  ;;  %v548_v59 = vld [vmem:[#allocation2 + $0xda0] sm:$0xff]  ;;  %v545_v60 = vld [vmem:[#allocation2 + $0xd88] sm:$0xff] }
 0x113   :  { %5016 = vmatprep.subr.bf16.mxu0 %v8370_v61  ;;  %5334 = vmatprep.subr.bf16.mxu1 %v8372_v1  ;;  %v8428_v61 = vcombine.high %v537_v52, %v541_v54  ;;  %v8434_v1 = vcombine.high %v544_v58, %v548_v59  ;;  %v8436_v2 = vcombine.high %v545_v60, %v549_v62  ;;  %v604_v52 = vld [vmem:[#allocation2 + $0xf60] sm:$0xff]  ;;  %v605_v54 = vld [vmem:[#allocation2 + $0xf68] sm:$0xff] }
 0x114   :  { %v8435_v8 = vcombine.low %v545_v60, %v549_v62  ;;  %v612_v60 = vld [vmem:[#allocation2 + $0xfa0] sm:$0xff]  ;;  %v613_v62 = vld [vmem:[#allocation2 + $0xfa8] sm:$0xff] }
 0x116   :  { %5017 = vmatpush1.bf16.msra.mxu0 %v8369_v3  ;;  %5335 = vmatpush1.bf16.msra.mxu1 %v8371_v4  ;;  %v552_v3 = vld [vmem:[#allocation2 + $0xdc0] sm:$0xff] }
 0x117   :  { %5018 = vmatprep.subr.bf16.mxu0 %v8378_v5  ;;  %5336 = vmatprep.subr.bf16.mxu1 %v8380_v7  ;;  %v556_v4 = vld [vmem:[#allocation2 + $0xde0] sm:$0xff]  ;;  %v553_v5 = vld [vmem:[#allocation2 + $0xdc8] sm:$0xff]  ;;  %v8433_v7 = vcombine.low %v544_v58, %v548_v59 }
 0x118   :  { %v8442_v9 = vcombine.high %v552_v3, %v556_v4  ;;  %v8444_v10 = vcombine.high %v553_v5, %v557_v6  ;;  %v8441_v15 = vcombine.low %v552_v3, %v556_v4  ;;  %v8443_v16 = vcombine.low %v553_v5, %v557_v6  ;;  %v608_v59 = vld [vmem:[#allocation2 + $0xf80] sm:$0xff]  ;;  %v617_v5 = vld [vmem:[#allocation2 + $0xfc8] sm:$0xff] }
 0x119   :  { %v616_v3 = vld [vmem:[#allocation2 + $0xfc0] sm:$0xff]  ;;  %v621_v6 = vld [vmem:[#allocation2 + $0xfe8] sm:$0xff] }
 0x11a   :  { %5019 = vmatpush1.bf16.msra.mxu0 %v8377_v11  ;;  %5337 = vmatpush1.bf16.msra.mxu1 %v8379_v12  ;;  %v560_v11 = vld [vmem:[#allocation2 + $0xe00] sm:$0xff] }
 0x11b   :  { %5041 = vmatprep.subr.bf16.mxu0 %v8386_v14  ;;  %5359 = vmatprep.subr.bf16.mxu1 %v8388_v18  ;;  %v564_v12 = vld [vmem:[#allocation2 + $0xe20] sm:$0xff]  ;;  %v565_v14 = vld [vmem:[#allocation2 + $0xe28] sm:$0xff] }
 0x11c   :  { %v8450_v17 = vcombine.high %v560_v11, %v564_v12  ;;  %v8449_v23 = vcombine.low %v560_v11, %v564_v12  ;;  %v620_v4 = vld [vmem:[#allocation2 + $0xfe0] sm:$0xff] }
 0x11d   :  { %5021 = vmatmul.mubr.bf16.vlgmr.msra.gmra.mrb[0].mxu0 %v9302_v13  ;;  %5339 = vmatmul.mubr.bf16.vlgmr.msra.gmra.mrb[0].mxu1 %v9302_v13  ;;  %v561_v13 = vld [vmem:[#allocation2 + $0xe08] sm:$0xff]  ;;  %v624_v11 = vld [vmem:[#allocation2 + $0x1000] sm:$0xff] }
 0x11e   :  { %5042 = vmatpush1.bf16.msra.mxu0 %v8385_v20  ;;  %5360 = vmatpush1.bf16.msra.mxu1 %v8387_v21  ;;  %v8452_v18 = vcombine.high %v561_v13, %v565_v14  ;;  %v572_v20 = vld [vmem:[#allocation2 + $0xe60] sm:$0xff]  ;;  %v569_v21 = vld [vmem:[#allocation2 + $0xe48] sm:$0xff]  ;;  %v8451_v24 = vcombine.low %v561_v13, %v565_v14 }
 0x11f   :  { %5043 = vmatprep.subr.bf16.mxu0 %v8394_v22  ;;  %5361 = vmatprep.subr.bf16.mxu1 %v8396_v25  ;;  %v573_v22 = vld [vmem:[#allocation2 + $0xe68] sm:$0xff]  ;;  %v8458_v25 = vcombine.high %v568_v19, %v572_v20  ;;  %v628_v12 = vld [vmem:[#allocation2 + $0x1020] sm:$0xff] }
 0x120   :  { %5030 = vmatprep.mubr.bf16.mxu0 %v9305_v28  ;;  %5348 = vmatprep.mubr.bf16.mxu1 %v9305_v28  ;;  %v8460_v26 = vcombine.high %v569_v21, %v573_v22  ;;  %v580_v28 = vld [vmem:[#allocation2 + $0xea0] sm:$0xff]  ;;  %v625_v13 = vld [vmem:[#allocation2 + $0x1008] sm:$0xff] }
 0x121   :  { %v8466_v33 = vcombine.high %v576_v27, %v580_v28  ;;  %v8465_v39 = vcombine.low %v576_v27, %v580_v28  ;;  %v629_v14 = vld [vmem:[#allocation2 + $0x1028] sm:$0xff]  ;;  %v640_v28 = vld [vmem:[#allocation2 + $0x1080] sm:$0xff] }
 0x122   :  { %5044 = vmatpush1.bf16.msra.mxu0 %v8393_v29  ;;  %5362 = vmatpush1.bf16.msra.mxu1 %v8395_v31  ;;  %v577_v29 = vld [vmem:[#allocation2 + $0xe88] sm:$0xff]  ;;  %v8457_v31 = vcombine.low %v568_v19, %v572_v20  ;;  %v632_v19 = vld [vmem:[#allocation2 + $0x1040] sm:$0xff] }
 0x123   :  { %5045 = vmatprep.subr.bf16.mxu0 %v8402_v32  ;;  %5363 = vmatprep.subr.bf16.mxu1 %v8404_v36  ;;  %v8459_v32 = vcombine.low %v569_v21, %v573_v22  ;;  %v8468_v34 = vcombine.high %v577_v29, %v581_v30  ;;  %v588_v36 = vld [vmem:[#allocation2 + $0xee0] sm:$0xff]  ;;  %v9308_v21 = vld [vmem:[%s10179_s0 + $0x18] ss:$48 sps:$4 sm:$0xff]  }
 0x124   :  { %v636_v20 = vld [vmem:[#allocation2 + $0x1060] sm:$0xff]  ;;  %v633_v22 = vld [vmem:[#allocation2 + $0x1048] sm:$0xff] }
 0x125   :  { %5031 = vmatmul.mubr.bf16.gmra.mrb[4].mxu0 %v9307_v37  ;;  %5349 = vmatmul.mubr.bf16.gmra.mrb[4].mxu1 %v9307_v37  ;;  %v585_v37 = vld [vmem:[#allocation2 + $0xec8] sm:$0xff] }
 0x126   :  { %5046 = vmatpush1.bf16.msra.mxu0 %v8401_v38  ;;  %5364 = vmatpush1.bf16.msra.mxu1 %v8403_v40  ;;  %v589_v38 = vld [vmem:[#allocation2 + $0xee8] sm:$0xff]  ;;  %v8467_v40 = vcombine.low %v577_v29, %v581_v30  ;;  %v644_v29 = vld [vmem:[#allocation2 + $0x10a0] sm:$0xff] }
 0x127   :  { %5047 = vmatprep.subr.bf16.mxu0 %v8410_v41  ;;  %5365 = vmatprep.subr.bf16.mxu1 %v8412_v45  ;;  %v8474_v41 = vcombine.high %v584_v35, %v588_v36  ;;  %v8476_v42 = vcombine.high %v585_v37, %v589_v38  ;;  %v593_v45 = vld [vmem:[#allocation2 + $0xf08] sm:$0xff] }
 0x128   :  { %5073 = vmatprep.mubr.bf16.mxu0 %v9310_v46  ;;  %5391 = vmatprep.mubr.bf16.mxu1 %v9310_v46  ;;  %v597_v46 = vld [vmem:[#allocation2 + $0xf28] sm:$0xff] }
 0x129   :  { %v8484_v50 = vcombine.high %v593_v45, %v597_v46  ;;  %v9311_v30 = vld [vmem:[%s10179_s0 + $0x7c] ss:$48 sps:$4 sm:$0xff]  }
 0x12a   :  { %5048 = vmatpush1.bf16.msra.mxu0 %v8409_v47  ;;  %5366 = vmatpush1.bf16.msra.mxu1 %v8411_v48  ;;  %v8473_v47 = vcombine.low %v584_v35, %v588_v36  ;;  %v8475_v48 = vcombine.low %v585_v37, %v589_v38  ;;  %v8530_v35 = vcombine.high %v640_v28, %v644_v29  ;;  %v648_v37 = vld [vmem:[#allocation2 + $0x10c0] sm:$0xff] }
 0x12b   :  { %5049 = vmatprep.subr.bf16.mxu0 %v8418_v49  ;;  %5367 = vmatprep.subr.bf16.mxu1 %v8420_v53  ;;  %v8482_v49 = vcombine.high %v592_v43, %v596_v44  ;;  %v601_v53 = vld [vmem:[#allocation2 + $0xf48] sm:$0xff]  ;;  %v652_v38 = vld [vmem:[#allocation2 + $0x10e0] sm:$0xff] }
 0x12c   :  { %v8492_v58 = vcombine.high %v601_v53, %v605_v54 }
 0x12e   :  { %5050 = vmatpush1.bf16.msra.mxu0 %v8417_v55  ;;  %5368 = vmatpush1.bf16.msra.mxu1 %v8419_v56  ;;  %v8481_v55 = vcombine.low %v592_v43, %v596_v44  ;;  %v8483_v56 = vcombine.low %v593_v45, %v597_v46  ;;  %v8538_v44 = vcombine.high %v648_v37, %v652_v38  ;;  %v656_v46 = vld [vmem:[#allocation2 + $0x1100] sm:$0xff] }
 0x12f   :  { %5051 = vmatprep.subr.bf16.mxu0 %v8426_v57  ;;  %5369 = vmatprep.subr.bf16.mxu1 %v8428_v61  ;;  %v8490_v57 = vcombine.high %v600_v51, %v604_v52  ;;  %v609_v61 = vld [vmem:[#allocation2 + $0xf88] sm:$0xff] }
 0x132   :  { %5052 = vmatpush1.bf16.msra.mxu0 %v8425_v63  ;;  %5370 = vmatpush1.bf16.msra.mxu1 %v8427_v0  ;;  %v8489_v63 = vcombine.low %v600_v51, %v604_v52  ;;  %v8491_v0 = vcombine.low %v601_v53, %v605_v54  ;;  %v8537_v51 = vcombine.low %v648_v37, %v652_v38 }
 0x133   :  { %5053 = vmatprep.subr.bf16.mxu0 %v8434_v1  ;;  %5371 = vmatprep.subr.bf16.mxu1 %v8436_v2  ;;  %v8498_v1 = vcombine.high %v608_v59, %v612_v60  ;;  %v8500_v2 = vcombine.high %v609_v61, %v613_v62 }
 0x136   :  { %5054 = vmatpush1.bf16.msra.mxu0 %v8433_v7  ;;  %5372 = vmatpush1.bf16.msra.mxu1 %v8435_v8  ;;  %v8497_v7 = vcombine.low %v608_v59, %v612_v60  ;;  %v8499_v8 = vcombine.low %v609_v61, %v613_v62 }
 0x137   :  { %5055 = vmatprep.subr.bf16.mxu0 %v8442_v9  ;;  %5373 = vmatprep.subr.bf16.mxu1 %v8444_v10  ;;  %v8506_v9 = vcombine.high %v616_v3, %v620_v4  ;;  %v8508_v10 = vcombine.high %v617_v5, %v621_v6 }
 0x13a   :  { %5056 = vmatpush1.bf16.msra.mxu0 %v8441_v15  ;;  %5374 = vmatpush1.bf16.msra.mxu1 %v8443_v16  ;;  %v8505_v15 = vcombine.low %v616_v3, %v620_v4  ;;  %v8507_v16 = vcombine.low %v617_v5, %v621_v6 }
 0x13b   :  { %5057 = vmatprep.subr.bf16.mxu0 %v8450_v17  ;;  %5375 = vmatprep.subr.bf16.mxu1 %v8452_v18  ;;  %v8514_v17 = vcombine.high %v624_v11, %v628_v12  ;;  %v8516_v18 = vcombine.high %v625_v13, %v629_v14 }
 0x13e   :  { %5058 = vmatpush1.bf16.msra.mxu0 %v8449_v23  ;;  %5376 = vmatpush1.bf16.msra.mxu1 %v8451_v24  ;;  %v637_v23 = vld [vmem:[#allocation2 + $0x1068] sm:$0xff]  ;;  %v8513_v24 = vcombine.low %v624_v11, %v628_v12 }
 0x13f   :  { %5059 = vmatprep.subr.bf16.mxu0 %v8458_v25  ;;  %5377 = vmatprep.subr.bf16.mxu1 %v8460_v26  ;;  %v8515_v25 = vcombine.low %v625_v13, %v629_v14  ;;  %v8522_v26 = vcombine.high %v632_v19, %v636_v20  ;;  %v8524_v27 = vcombine.high %v633_v22, %v637_v23 }
 0x142   :  { %5060 = vmatpush1.bf16.msra.mxu0 %v8457_v31  ;;  %5378 = vmatpush1.bf16.msra.mxu1 %v8459_v32  ;;  %v641_v31 = vld [vmem:[#allocation2 + $0x1088] sm:$0xff] }
 0x143   :  { %5061 = vmatprep.subr.bf16.mxu0 %v8466_v33  ;;  %5379 = vmatprep.subr.bf16.mxu1 %v8468_v34  ;;  %v645_v32 = vld [vmem:[#allocation2 + $0x10a8] sm:$0xff]  ;;  %v8521_v33 = vcombine.low %v632_v19, %v636_v20  ;;  %v8523_v34 = vcombine.low %v633_v22, %v637_v23  ;;  %v696_v23 = vld [vmem:[#allocation2 + $0x1240] sm:$0xff] }
 0x144   :  { %v8532_v36 = vcombine.high %v641_v31, %v645_v32  ;;  %v8531_v43 = vcombine.low %v641_v31, %v645_v32  ;;  %v704_v31 = vld [vmem:[#allocation2 + $0x1280] sm:$0xff] }
 0x145   :  { %v708_v32 = vld [vmem:[#allocation2 + $0x12a0] sm:$0xff] }
 0x146   :  { %5062 = vmatpush1.bf16.msra.mxu0 %v8465_v39  ;;  %5380 = vmatpush1.bf16.msra.mxu1 %v8467_v40  ;;  %v649_v39 = vld [vmem:[#allocation2 + $0x10c8] sm:$0xff]  ;;  %v8594_v37 = vcombine.high %v704_v31, %v708_v32 }
 0x147   :  { %5063 = vmatprep.subr.bf16.mxu0 %v8474_v41  ;;  %5381 = vmatprep.subr.bf16.mxu1 %v8476_v42  ;;  %v653_v40 = vld [vmem:[#allocation2 + $0x10e8] sm:$0xff]  ;;  %v8529_v42 = vcombine.low %v640_v28, %v644_v29 }
 0x148   :  { %v9313_v41 = vld [vmem:[%s10179_s0 + $0x78] ss:$48 sps:$4 sm:$0xff]   ;;  %v8540_v45 = vcombine.high %v649_v39, %v653_v40  ;;  %v8539_v52 = vcombine.low %v649_v39, %v653_v40  ;;  %v712_v39 = vld [vmem:[#allocation2 + $0x12c0] sm:$0xff] }
 0x149   :  { %v716_v40 = vld [vmem:[#allocation2 + $0x12e0] sm:$0xff] }
 0x14a   :  { %5064 = vmatpush1.bf16.msra.mxu0 %v8473_v47  ;;  %5382 = vmatpush1.bf16.msra.mxu1 %v8475_v48  ;;  %v660_v47 = vld [vmem:[#allocation2 + $0x1120] sm:$0xff] }
 0x14b   :  { %5065 = vmatprep.subr.bf16.mxu0 %v8482_v49  ;;  %5383 = vmatprep.subr.bf16.mxu1 %v8484_v50  ;;  %v9316_v48 = vld [vmem:[%s10179_s0 + $0x24] ss:$48 sps:$4 sm:$0xff]   ;;  %v657_v49 = vld [vmem:[#allocation2 + $0x1108] sm:$0xff]  ;;  %v8546_v53 = vcombine.high %v656_v46, %v660_v47  ;;  %v8545_v59 = vcombine.low %v656_v46, %v660_v47 }
 0x14c   :  { %v661_v50 = vld [vmem:[#allocation2 + $0x1128] sm:$0xff]  ;;  %v720_v47 = vld [vmem:[#allocation2 + $0x1300] sm:$0xff] }
 0x14d   :  { %v8548_v54 = vcombine.high %v657_v49, %v661_v50  ;;  %v8547_v60 = vcombine.low %v657_v49, %v661_v50  ;;  %v721_v49 = vld [vmem:[#allocation2 + $0x1308] sm:$0xff] }
 0x14e   :  { %5066 = vmatpush1.bf16.msra.mxu0 %v8481_v55  ;;  %5384 = vmatpush1.bf16.msra.mxu1 %v8483_v56  ;;  %v664_v55 = vld [vmem:[#allocation2 + $0x1140] sm:$0xff]  ;;  %v725_v50 = vld [vmem:[#allocation2 + $0x1328] sm:$0xff] }
 0x14f   :  { %5067 = vmatprep.subr.bf16.mxu0 %v8490_v57  ;;  %5385 = vmatprep.subr.bf16.mxu1 %v8492_v58  ;;  %v668_v56 = vld [vmem:[#allocation2 + $0x1160] sm:$0xff]  ;;  %v665_v57 = vld [vmem:[#allocation2 + $0x1148] sm:$0xff] }
 0x150   :  { %v669_v58 = vld [vmem:[#allocation2 + $0x1168] sm:$0xff]  ;;  %v8554_v61 = vcombine.high %v664_v55, %v668_v56  ;;  %v8553_v3 = vcombine.low %v664_v55, %v668_v56  ;;  %v728_v55 = vld [vmem:[#allocation2 + $0x1340] sm:$0xff] }
 0x151   :  { %v8556_v62 = vcombine.high %v665_v57, %v669_v58  ;;  %v8555_v4 = vcombine.low %v665_v57, %v669_v58  ;;  %v732_v56 = vld [vmem:[#allocation2 + $0x1360] sm:$0xff]  ;;  %v729_v57 = vld [vmem:[#allocation2 + $0x1348] sm:$0xff] }
 0x152   :  { %5068 = vmatpush1.bf16.msra.mxu0 %v8489_v63  ;;  %5386 = vmatpush1.bf16.msra.mxu1 %v8491_v0  ;;  %v672_v63 = vld [vmem:[#allocation2 + $0x1180] sm:$0xff]  ;;  %v733_v58 = vld [vmem:[#allocation2 + $0x1368] sm:$0xff] }
 0x153   :  { %5069 = vmatprep.subr.bf16.mxu0 %v8498_v1  ;;  %5387 = vmatprep.subr.bf16.mxu1 %v8500_v2  ;;  %v676_v0 = vld [vmem:[#allocation2 + $0x11a0] sm:$0xff]  ;;  %v673_v1 = vld [vmem:[#allocation2 + $0x1188] sm:$0xff] }
 0x154   :  { %v677_v2 = vld [vmem:[#allocation2 + $0x11a8] sm:$0xff]  ;;  %v8562_v5 = vcombine.high %v672_v63, %v676_v0  ;;  %v8561_v11 = vcombine.low %v672_v63, %v676_v0  ;;  %v736_v63 = vld [vmem:[#allocation2 + $0x1380] sm:$0xff] }
 0x155   :  { %v8564_v6 = vcombine.high %v673_v1, %v677_v2  ;;  %v8563_v12 = vcombine.low %v673_v1, %v677_v2  ;;  %v740_v0 = vld [vmem:[#allocation2 + $0x13a0] sm:$0xff]  ;;  %v737_v1 = vld [vmem:[#allocation2 + $0x1388] sm:$0xff] }
 0x156   :  { %5070 = vmatpush1.bf16.msra.mxu0 %v8497_v7  ;;  %5388 = vmatpush1.bf16.msra.mxu1 %v8499_v8  ;;  %v680_v7 = vld [vmem:[#allocation2 + $0x11c0] sm:$0xff]  ;;  %v741_v2 = vld [vmem:[#allocation2 + $0x13a8] sm:$0xff] }
 0x157   :  { %5071 = vmatprep.subr.bf16.mxu0 %v8506_v9  ;;  %5389 = vmatprep.subr.bf16.mxu1 %v8508_v10  ;;  %v684_v8 = vld [vmem:[#allocation2 + $0x11e0] sm:$0xff]  ;;  %v681_v9 = vld [vmem:[#allocation2 + $0x11c8] sm:$0xff] }
 0x158   :  { %v685_v10 = vld [vmem:[#allocation2 + $0x11e8] sm:$0xff]  ;;  %v8570_v13 = vcombine.high %v680_v7, %v684_v8  ;;  %v8569_v19 = vcombine.low %v680_v7, %v684_v8  ;;  %v744_v7 = vld [vmem:[#allocation2 + $0x13c0] sm:$0xff] }
 0x159   :  { %v8572_v14 = vcombine.high %v681_v9, %v685_v10  ;;  %v8571_v20 = vcombine.low %v681_v9, %v685_v10  ;;  %v748_v8 = vld [vmem:[#allocation2 + $0x13e0] sm:$0xff]  ;;  %v745_v9 = vld [vmem:[#allocation2 + $0x13c8] sm:$0xff] }
 0x15a   :  { %5072 = vmatpush1.bf16.msra.mxu0 %v8505_v15  ;;  %5390 = vmatpush1.bf16.msra.mxu1 %v8507_v16  ;;  %v688_v15 = vld [vmem:[#allocation2 + $0x1200] sm:$0xff]  ;;  %v749_v10 = vld [vmem:[#allocation2 + $0x13e8] sm:$0xff] }
 0x15b   :  { %5094 = vmatprep.subr.bf16.mxu0 %v8514_v17  ;;  %5412 = vmatprep.subr.bf16.mxu1 %v8516_v18  ;;  %v692_v16 = vld [vmem:[#allocation2 + $0x1220] sm:$0xff]  ;;  %v689_v17 = vld [vmem:[#allocation2 + $0x1208] sm:$0xff] }
 0x15c   :  { %v693_v18 = vld [vmem:[#allocation2 + $0x1228] sm:$0xff] }
 0x15d   :  { %5074 = vmatmul.mubr.bf16.vlgmr.msra.gmra.mrb[0].mxu0 %v9308_v21  ;;  %5392 = vmatmul.mubr.bf16.vlgmr.msra.gmra.mrb[0].mxu1 %v9308_v21  ;;  %v8578_v21 = vcombine.high %v688_v15, %v692_v16  ;;  %v8580_v22 = vcombine.high %v689_v17, %v693_v18  ;;  %v8579_v28 = vcombine.low %v689_v17, %v693_v18  ;;  %v753_v17 = vld [vmem:[#allocation2 + $0x1408] sm:$0xff] }
 0x15e   :  { %5095 = vmatpush1.bf16.msra.mxu0 %v8513_v24  ;;  %5413 = vmatpush1.bf16.msra.mxu1 %v8515_v25  ;;  %v700_v24 = vld [vmem:[#allocation2 + $0x1260] sm:$0xff]  ;;  %v697_v25 = vld [vmem:[#allocation2 + $0x1248] sm:$0xff] }
 0x15f   :  { %5096 = vmatprep.subr.bf16.mxu0 %v8522_v26  ;;  %5414 = vmatprep.subr.bf16.mxu1 %v8524_v27  ;;  %v701_v26 = vld [vmem:[#allocation2 + $0x1268] sm:$0xff]  ;;  %v8577_v27 = vcombine.low %v688_v15, %v692_v16  ;;  %v8586_v29 = vcombine.high %v696_v23, %v700_v24  ;;  %v752_v15 = vld [vmem:[#allocation2 + $0x1400] sm:$0xff] }
 0x160   :  { %5083 = vmatprep.mubr.bf16.mxu0 %v9311_v30  ;;  %5401 = vmatprep.mubr.bf16.mxu1 %v9311_v30  ;;  %v8588_v30 = vcombine.high %v697_v25, %v701_v26  ;;  %v756_v16 = vld [vmem:[#allocation2 + $0x1420] sm:$0xff]  ;;  %v757_v18 = vld [vmem:[#allocation2 + $0x1428] sm:$0xff] }
 0x162   :  { %5097 = vmatpush1.bf16.msra.mxu0 %v8521_v33  ;;  %5415 = vmatpush1.bf16.msra.mxu1 %v8523_v34  ;;  %v705_v33 = vld [vmem:[#allocation2 + $0x1288] sm:$0xff] }
 0x163   :  { %5098 = vmatprep.subr.bf16.mxu0 %v8530_v35  ;;  %5416 = vmatprep.subr.bf16.mxu1 %v8532_v36  ;;  %v709_v34 = vld [vmem:[#allocation2 + $0x12a8] sm:$0xff]  ;;  %v8585_v35 = vcombine.low %v696_v23, %v700_v24  ;;  %v8587_v36 = vcombine.low %v697_v25, %v701_v26  ;;  %v760_v23 = vld [vmem:[#allocation2 + $0x1440] sm:$0xff] }
 0x164   :  { %v8596_v38 = vcombine.high %v705_v33, %v709_v34  ;;  %v764_v24 = vld [vmem:[#allocation2 + $0x1460] sm:$0xff]  ;;  %v761_v26 = vld [vmem:[#allocation2 + $0x1448] sm:$0xff] }
 0x165   :  { %5084 = vmatmul.mubr.bf16.gmra.mrb[4].mxu0 %v9313_v41  ;;  %5402 = vmatmul.mubr.bf16.gmra.mrb[4].mxu1 %v9313_v41  ;;  %v713_v41 = vld [vmem:[#allocation2 + $0x12c8] sm:$0xff]  ;;  %v9314_v25 = vld [vmem:[%s10179_s0 + $0x20] ss:$48 sps:$4 sm:$0xff]  }
 0x166   :  { %5099 = vmatpush1.bf16.msra.mxu0 %v8529_v42  ;;  %5417 = vmatpush1.bf16.msra.mxu1 %v8531_v43  ;;  %v717_v42 = vld [vmem:[#allocation2 + $0x12e8] sm:$0xff]  ;;  %v8593_v43 = vcombine.low %v704_v31, %v708_v32  ;;  %v768_v32 = vld [vmem:[#allocation2 + $0x1480] sm:$0xff] }
 0x167   :  { %5100 = vmatprep.subr.bf16.mxu0 %v8538_v44  ;;  %5418 = vmatprep.subr.bf16.mxu1 %v8540_v45  ;;  %v8595_v44 = vcombine.low %v705_v33, %v709_v34  ;;  %v8602_v45 = vcombine.high %v712_v39, %v716_v40  ;;  %v8604_v46 = vcombine.high %v713_v41, %v717_v42  ;;  %v772_v33 = vld [vmem:[#allocation2 + $0x14a0] sm:$0xff] }
 0x168   :  { %5126 = vmatprep.mubr.bf16.mxu0 %v9316_v48  ;;  %5444 = vmatprep.mubr.bf16.mxu1 %v9316_v48  ;;  %v724_v48 = vld [vmem:[#allocation2 + $0x1320] sm:$0xff] }
 0x169   :  { %v9317_v34 = vld [vmem:[%s10179_s0 + $0x84] ss:$48 sps:$4 sm:$0xff]  }
 0x16a   :  { %5101 = vmatpush1.bf16.msra.mxu0 %v8537_v51  ;;  %5419 = vmatpush1.bf16.msra.mxu1 %v8539_v52  ;;  %v8601_v51 = vcombine.low %v712_v39, %v716_v40  ;;  %v8603_v52 = vcombine.low %v713_v41, %v717_v42  ;;  %v8658_v39 = vcombine.high %v768_v32, %v772_v33  ;;  %v776_v41 = vld [vmem:[#allocation2 + $0x14c0] sm:$0xff] }
 0x16b   :  { %5102 = vmatprep.subr.bf16.mxu0 %v8546_v53  ;;  %5420 = vmatprep.subr.bf16.mxu1 %v8548_v54  ;;  %v8610_v53 = vcombine.high %v720_v47, %v724_v48  ;;  %v8612_v54 = vcombine.high %v721_v49, %v725_v50  ;;  %v780_v42 = vld [vmem:[#allocation2 + $0x14e0] sm:$0xff] }
 0x16e   :  { %5103 = vmatpush1.bf16.msra.mxu0 %v8545_v59  ;;  %5421 = vmatpush1.bf16.msra.mxu1 %v8547_v60  ;;  %v8609_v59 = vcombine.low %v720_v47, %v724_v48  ;;  %v8611_v60 = vcombine.low %v721_v49, %v725_v50  ;;  %v8666_v48 = vcombine.high %v776_v41, %v780_v42  ;;  %v784_v50 = vld [vmem:[#allocation2 + $0x1500] sm:$0xff] }
 0x16f   :  { %5104 = vmatprep.subr.bf16.mxu0 %v8554_v61  ;;  %5422 = vmatprep.subr.bf16.mxu1 %v8556_v62  ;;  %v8618_v61 = vcombine.high %v728_v55, %v732_v56  ;;  %v8620_v62 = vcombine.high %v729_v57, %v733_v58 }
 0x172   :  { %5105 = vmatpush1.bf16.msra.mxu0 %v8553_v3  ;;  %5423 = vmatpush1.bf16.msra.mxu1 %v8555_v4  ;;  %v8617_v3 = vcombine.low %v728_v55, %v732_v56  ;;  %v8619_v4 = vcombine.low %v729_v57, %v733_v58  ;;  %v8665_v55 = vcombine.low %v776_v41, %v780_v42 }
 0x173   :  { %5106 = vmatprep.subr.bf16.mxu0 %v8562_v5  ;;  %5424 = vmatprep.subr.bf16.mxu1 %v8564_v6  ;;  %v8626_v5 = vcombine.high %v736_v63, %v740_v0  ;;  %v8628_v6 = vcombine.high %v737_v1, %v741_v2 }
 0x176   :  { %5107 = vmatpush1.bf16.msra.mxu0 %v8561_v11  ;;  %5425 = vmatpush1.bf16.msra.mxu1 %v8563_v12  ;;  %v8625_v11 = vcombine.low %v736_v63, %v740_v0  ;;  %v8627_v12 = vcombine.low %v737_v1, %v741_v2 }
 0x177   :  { %5108 = vmatprep.subr.bf16.mxu0 %v8570_v13  ;;  %5426 = vmatprep.subr.bf16.mxu1 %v8572_v14  ;;  %v8634_v13 = vcombine.high %v744_v7, %v748_v8  ;;  %v8636_v14 = vcombine.high %v745_v9, %v749_v10 }
 0x17a   :  { %5109 = vmatpush1.bf16.msra.mxu0 %v8569_v19  ;;  %5427 = vmatpush1.bf16.msra.mxu1 %v8571_v20  ;;  %v8633_v19 = vcombine.low %v744_v7, %v748_v8  ;;  %v8635_v20 = vcombine.low %v745_v9, %v749_v10 }
 0x17b   :  { %5110 = vmatprep.subr.bf16.mxu0 %v8578_v21  ;;  %5428 = vmatprep.subr.bf16.mxu1 %v8580_v22  ;;  %v8642_v21 = vcombine.high %v752_v15, %v756_v16  ;;  %v8644_v22 = vcombine.high %v753_v17, %v757_v18 }
 0x17e   :  { %5111 = vmatpush1.bf16.msra.mxu0 %v8577_v27  ;;  %5429 = vmatpush1.bf16.msra.mxu1 %v8579_v28  ;;  %v765_v27 = vld [vmem:[#allocation2 + $0x1468] sm:$0xff]  ;;  %v8641_v28 = vcombine.low %v752_v15, %v756_v16 }
 0x17f   :  { %5112 = vmatprep.subr.bf16.mxu0 %v8586_v29  ;;  %5430 = vmatprep.subr.bf16.mxu1 %v8588_v30  ;;  %v8643_v29 = vcombine.low %v753_v17, %v757_v18  ;;  %v8650_v30 = vcombine.high %v760_v23, %v764_v24  ;;  %v8652_v31 = vcombine.high %v761_v26, %v765_v27 }
 0x182   :  { %5113 = vmatpush1.bf16.msra.mxu0 %v8585_v35  ;;  %5431 = vmatpush1.bf16.msra.mxu1 %v8587_v36  ;;  %v769_v35 = vld [vmem:[#allocation2 + $0x1488] sm:$0xff] }
 0x183   :  { %5114 = vmatprep.subr.bf16.mxu0 %v8594_v37  ;;  %5432 = vmatprep.subr.bf16.mxu1 %v8596_v38  ;;  %v773_v36 = vld [vmem:[#allocation2 + $0x14a8] sm:$0xff]  ;;  %v8649_v37 = vcombine.low %v760_v23, %v764_v24  ;;  %v8651_v38 = vcombine.low %v761_v26, %v765_v27  ;;  %v824_v27 = vld [vmem:[#allocation2 + $0x1640] sm:$0xff] }
 0x184   :  { %v8660_v40 = vcombine.high %v769_v35, %v773_v36  ;;  %v8659_v47 = vcombine.low %v769_v35, %v773_v36  ;;  %v832_v35 = vld [vmem:[#allocation2 + $0x1680] sm:$0xff] }
 0x185   :  { %v836_v36 = vld [vmem:[#allocation2 + $0x16a0] sm:$0xff] }
 0x186   :  { %5115 = vmatpush1.bf16.msra.mxu0 %v8593_v43  ;;  %5433 = vmatpush1.bf16.msra.mxu1 %v8595_v44  ;;  %v777_v43 = vld [vmem:[#allocation2 + $0x14c8] sm:$0xff]  ;;  %v8722_v41 = vcombine.high %v832_v35, %v836_v36 }
 0x187   :  { %5116 = vmatprep.subr.bf16.mxu0 %v8602_v45  ;;  %5434 = vmatprep.subr.bf16.mxu1 %v8604_v46  ;;  %v781_v44 = vld [vmem:[#allocation2 + $0x14e8] sm:$0xff]  ;;  %v9319_v45 = vld [vmem:[%s10179_s0 + $0x80] ss:$48 sps:$4 sm:$0xff]   ;;  %v8657_v46 = vcombine.low %v768_v32, %v772_v33 }
 0x188   :  { %v8668_v49 = vcombine.high %v777_v43, %v781_v44  ;;  %v8667_v56 = vcombine.low %v777_v43, %v781_v44  ;;  %v840_v43 = vld [vmem:[#allocation2 + $0x16c0] sm:$0xff] }
 0x189   :  { %v844_v44 = vld [vmem:[#allocation2 + $0x16e0] sm:$0xff] }
 0x18a   :  { %5117 = vmatpush1.bf16.msra.mxu0 %v8601_v51  ;;  %5435 = vmatpush1.bf16.msra.mxu1 %v8603_v52  ;;  %v788_v51 = vld [vmem:[#allocation2 + $0x1520] sm:$0xff]  ;;  %v9322_v52 = vld [vmem:[%s10179_s0 + $0x2c] ss:$48 sps:$4 sm:$0xff]  }
 0x18b   :  { %5118 = vmatprep.subr.bf16.mxu0 %v8610_v53  ;;  %5436 = vmatprep.subr.bf16.mxu1 %v8612_v54  ;;  %v785_v53 = vld [vmem:[#allocation2 + $0x1508] sm:$0xff]  ;;  %v8674_v57 = vcombine.high %v784_v50, %v788_v51  ;;  %v8673_v63 = vcombine.low %v784_v50, %v788_v51  ;;  %v848_v51 = vld [vmem:[#allocation2 + $0x1700] sm:$0xff] }
 0x18c   :  { %v789_v54 = vld [vmem:[#allocation2 + $0x1528] sm:$0xff] }
 0x18d   :  { %v8676_v58 = vcombine.high %v785_v53, %v789_v54  ;;  %v8675_v0 = vcombine.low %v785_v53, %v789_v54  ;;  %v849_v53 = vld [vmem:[#allocation2 + $0x1708] sm:$0xff] }
 0x18e   :  { %5119 = vmatpush1.bf16.msra.mxu0 %v8609_v59  ;;  %5437 = vmatpush1.bf16.msra.mxu1 %v8611_v60  ;;  %v792_v59 = vld [vmem:[#allocation2 + $0x1540] sm:$0xff]  ;;  %v853_v54 = vld [vmem:[#allocation2 + $0x1728] sm:$0xff] }
 0x18f   :  { %5120 = vmatprep.subr.bf16.mxu0 %v8618_v61  ;;  %5438 = vmatprep.subr.bf16.mxu1 %v8620_v62  ;;  %v796_v60 = vld [vmem:[#allocation2 + $0x1560] sm:$0xff]  ;;  %v793_v61 = vld [vmem:[#allocation2 + $0x1548] sm:$0xff] }
 0x190   :  { %v797_v62 = vld [vmem:[#allocation2 + $0x1568] sm:$0xff]  ;;  %v8682_v1 = vcombine.high %v792_v59, %v796_v60  ;;  %v8681_v7 = vcombine.low %v792_v59, %v796_v60  ;;  %v856_v59 = vld [vmem:[#allocation2 + $0x1740] sm:$0xff] }
 0x191   :  { %v8684_v2 = vcombine.high %v793_v61, %v797_v62  ;;  %v8683_v8 = vcombine.low %v793_v61, %v797_v62  ;;  %v860_v60 = vld [vmem:[#allocation2 + $0x1760] sm:$0xff]  ;;  %v857_v61 = vld [vmem:[#allocation2 + $0x1748] sm:$0xff] }
 0x192   :  { %5121 = vmatpush1.bf16.msra.mxu0 %v8617_v3  ;;  %5439 = vmatpush1.bf16.msra.mxu1 %v8619_v4  ;;  %v800_v3 = vld [vmem:[#allocation2 + $0x1580] sm:$0xff]  ;;  %v861_v62 = vld [vmem:[#allocation2 + $0x1768] sm:$0xff] }
 0x193   :  { %5122 = vmatprep.subr.bf16.mxu0 %v8626_v5  ;;  %5440 = vmatprep.subr.bf16.mxu1 %v8628_v6  ;;  %v804_v4 = vld [vmem:[#allocation2 + $0x15a0] sm:$0xff]  ;;  %v801_v5 = vld [vmem:[#allocation2 + $0x1588] sm:$0xff] }
 0x194   :  { %v805_v6 = vld [vmem:[#allocation2 + $0x15a8] sm:$0xff]  ;;  %v8690_v9 = vcombine.high %v800_v3, %v804_v4  ;;  %v8689_v15 = vcombine.low %v800_v3, %v804_v4  ;;  %v864_v3 = vld [vmem:[#allocation2 + $0x1780] sm:$0xff] }
 0x195   :  { %v8692_v10 = vcombine.high %v801_v5, %v805_v6  ;;  %v8691_v16 = vcombine.low %v801_v5, %v805_v6  ;;  %v868_v4 = vld [vmem:[#allocation2 + $0x17a0] sm:$0xff]  ;;  %v865_v5 = vld [vmem:[#allocation2 + $0x1788] sm:$0xff] }
 0x196   :  { %5123 = vmatpush1.bf16.msra.mxu0 %v8625_v11  ;;  %5441 = vmatpush1.bf16.msra.mxu1 %v8627_v12  ;;  %v808_v11 = vld [vmem:[#allocation2 + $0x15c0] sm:$0xff]  ;;  %v869_v6 = vld [vmem:[#allocation2 + $0x17a8] sm:$0xff] }
 0x197   :  { %5124 = vmatprep.subr.bf16.mxu0 %v8634_v13  ;;  %5442 = vmatprep.subr.bf16.mxu1 %v8636_v14  ;;  %v812_v12 = vld [vmem:[#allocation2 + $0x15e0] sm:$0xff]  ;;  %v809_v13 = vld [vmem:[#allocation2 + $0x15c8] sm:$0xff] }
 0x198   :  { %v813_v14 = vld [vmem:[#allocation2 + $0x15e8] sm:$0xff]  ;;  %v8698_v17 = vcombine.high %v808_v11, %v812_v12  ;;  %v8697_v23 = vcombine.low %v808_v11, %v812_v12  ;;  %v872_v11 = vld [vmem:[#allocation2 + $0x17c0] sm:$0xff] }
 0x199   :  { %v8700_v18 = vcombine.high %v809_v13, %v813_v14  ;;  %v8699_v24 = vcombine.low %v809_v13, %v813_v14  ;;  %v876_v12 = vld [vmem:[#allocation2 + $0x17e0] sm:$0xff]  ;;  %v873_v13 = vld [vmem:[#allocation2 + $0x17c8] sm:$0xff] }
 0x19a   :  { %5125 = vmatpush1.bf16.msra.mxu0 %v8633_v19  ;;  %5443 = vmatpush1.bf16.msra.mxu1 %v8635_v20  ;;  %v816_v19 = vld [vmem:[#allocation2 + $0x1600] sm:$0xff]  ;;  %v877_v14 = vld [vmem:[#allocation2 + $0x17e8] sm:$0xff] }
 0x19b   :  { %5147 = vmatprep.subr.bf16.mxu0 %v8642_v21  ;;  %5465 = vmatprep.subr.bf16.mxu1 %v8644_v22  ;;  %v820_v20 = vld [vmem:[#allocation2 + $0x1620] sm:$0xff]  ;;  %v817_v21 = vld [vmem:[#allocation2 + $0x1608] sm:$0xff] }
 0x19c   :  { %v821_v22 = vld [vmem:[#allocation2 + $0x1628] sm:$0xff] }
 0x19d   :  { %5127 = vmatmul.mubr.bf16.vlgmr.msra.gmra.mrb[0].mxu0 %v9314_v25  ;;  %5445 = vmatmul.mubr.bf16.vlgmr.msra.gmra.mrb[0].mxu1 %v9314_v25  ;;  %v8706_v25 = vcombine.high %v816_v19, %v820_v20  ;;  %v8708_v26 = vcombine.high %v817_v21, %v821_v22  ;;  %v8707_v32 = vcombine.low %v817_v21, %v821_v22  ;;  %v115_v21 = vld [vmem:[#allocation2 + $0x18] sm:$0xff] }
 0x19e   :  { %5148 = vmatpush1.bf16.msra.mxu0 %v8641_v28  ;;  %5466 = vmatpush1.bf16.msra.mxu1 %v8643_v29  ;;  %v828_v28 = vld [vmem:[#allocation2 + $0x1660] sm:$0xff]  ;;  %v825_v29 = vld [vmem:[#allocation2 + $0x1648] sm:$0xff]  ;;  %v119_v22 = vld [vmem:[#allocation2 + $0x38] sm:$0xff] }
 0x19f   :  { %5149 = vmatprep.subr.bf16.mxu0 %v8650_v30  ;;  %5467 = vmatprep.subr.bf16.mxu1 %v8652_v31  ;;  %v829_v30 = vld [vmem:[#allocation2 + $0x1668] sm:$0xff]  ;;  %v8705_v31 = vcombine.low %v816_v19, %v820_v20  ;;  %v8714_v33 = vcombine.high %v824_v27, %v828_v28  ;;  %v114_v19 = vld [vmem:[#allocation2 + $0x10] sm:$0xff] }
 0x1a0   :  { %5136 = vmatprep.mubr.bf16.mxu0 %v9317_v34  ;;  %5454 = vmatprep.mubr.bf16.mxu1 %v9317_v34  ;;  %v8716_v34 = vcombine.high %v825_v29, %v829_v30  ;;  %v118_v20 = vld [vmem:[#allocation2 + $0x30] sm:$0xff] }
 0x1a2   :  { %5150 = vmatpush1.bf16.msra.mxu0 %v8649_v37  ;;  %5468 = vmatpush1.bf16.msra.mxu1 %v8651_v38  ;;  %v833_v37 = vld [vmem:[#allocation2 + $0x1688] sm:$0xff] }
 0x1a3   :  { %5151 = vmatprep.subr.bf16.mxu0 %v8658_v39  ;;  %5469 = vmatprep.subr.bf16.mxu1 %v8660_v40  ;;  %v837_v38 = vld [vmem:[#allocation2 + $0x16a8] sm:$0xff]  ;;  %v8713_v39 = vcombine.low %v824_v27, %v828_v28  ;;  %v8715_v40 = vcombine.low %v825_v29, %v829_v30  ;;  %v122_v27 = vld [vmem:[#allocation2 + $0x50] sm:$0xff]  ;;  %v123_v30 = vld [vmem:[#allocation2 + $0x58] sm:$0xff] }
 0x1a4   :  { %v8724_v42 = vcombine.high %v833_v37, %v837_v38  ;;  %v126_v28 = vld [vmem:[#allocation2 + $0x70] sm:$0xff]  ;;  %v9320_v29 = vld [vmem:[%s10179_s0 + $0x28] ss:$48 sps:$4 sm:$0xff]  }
 0x1a5   :  { %5137 = vmatmul.mubr.bf16.gmra.mrb[4].mxu0 %v9319_v45  ;;  %5455 = vmatmul.mubr.bf16.gmra.mrb[4].mxu1 %v9319_v45  ;;  %v841_v45 = vld [vmem:[#allocation2 + $0x16c8] sm:$0xff] }
 0x1a6   :  { %5152 = vmatpush1.bf16.msra.mxu0 %v8657_v46  ;;  %5470 = vmatpush1.bf16.msra.mxu1 %v8659_v47  ;;  %v845_v46 = vld [vmem:[#allocation2 + $0x16e8] sm:$0xff]  ;;  %v8721_v47 = vcombine.low %v832_v35, %v836_v36 }
 0x1a7   :  { %5153 = vmatprep.subr.bf16.mxu0 %v8666_v48  ;;  %5471 = vmatprep.subr.bf16.mxu1 %v8668_v49  ;;  %v8723_v48 = vcombine.low %v833_v37, %v837_v38  ;;  %v8730_v49 = vcombine.high %v840_v43, %v844_v44  ;;  %v8732_v50 = vcombine.high %v841_v45, %v845_v46  ;;  %v9323_v36 = vld [vmem:[%s10179_s0 + $0x8c] ss:$48 sps:$4 sm:$0xff]   ;;  %v130_v37 = vld [vmem:[#allocation2 + $0x90] sm:$0xff] }
 0x1a8   :  { %5179 = vmatprep.mubr.bf16.mxu0 %v9322_v52  ;;  %5497 = vmatprep.mubr.bf16.mxu1 %v9322_v52  ;;  %v852_v52 = vld [vmem:[#allocation2 + $0x1720] sm:$0xff]  ;;  %v134_v38 = vld [vmem:[#allocation2 + $0xb0] sm:$0xff] }
 0x1aa   :  { %5154 = vmatpush1.bf16.msra.mxu0 %v8665_v55  ;;  %5472 = vmatpush1.bf16.msra.mxu1 %v8667_v56  ;;  %v8729_v55 = vcombine.low %v840_v43, %v844_v44  ;;  %v8731_v56 = vcombine.low %v841_v45, %v845_v46  ;;  %v8022_v43 = vcombine.high %v130_v37, %v134_v38  ;;  %v138_v45 = vld [vmem:[#allocation2 + $0xd0] sm:$0xff] }
 0x1ab   :  { %5155 = vmatprep.subr.bf16.mxu0 %v8674_v57  ;;  %5473 = vmatprep.subr.bf16.mxu1 %v8676_v58  ;;  %v8738_v57 = vcombine.high %v848_v51, %v852_v52  ;;  %v8740_v58 = vcombine.high %v849_v53, %v853_v54  ;;  %v142_v46 = vld [vmem:[#allocation2 + $0xf0] sm:$0xff] }
 0x1ae   :  { %5156 = vmatpush1.bf16.msra.mxu0 %v8673_v63  ;;  %5474 = vmatpush1.bf16.msra.mxu1 %v8675_v0  ;;  %v8737_v63 = vcombine.low %v848_v51, %v852_v52  ;;  %v8739_v0 = vcombine.low %v849_v53, %v853_v54  ;;  %v8030_v52 = vcombine.high %v138_v45, %v142_v46  ;;  %v146_v54 = vld [vmem:[#allocation2 + $0x110] sm:$0xff] }
 0x1af   :  { %5157 = vmatprep.subr.bf16.mxu0 %v8682_v1  ;;  %5475 = vmatprep.subr.bf16.mxu1 %v8684_v2  ;;  %v8746_v1 = vcombine.high %v856_v59, %v860_v60  ;;  %v8748_v2 = vcombine.high %v857_v61, %v861_v62 }
 0x1b2   :  { %5158 = vmatpush1.bf16.msra.mxu0 %v8681_v7  ;;  %5476 = vmatpush1.bf16.msra.mxu1 %v8683_v8  ;;  %v8745_v7 = vcombine.low %v856_v59, %v860_v60  ;;  %v8747_v8 = vcombine.low %v857_v61, %v861_v62  ;;  %v154_v62 = vld [vmem:[#allocation2 + $0x150] sm:$0xff] }
 0x1b3   :  { %5159 = vmatprep.subr.bf16.mxu0 %v8690_v9  ;;  %5477 = vmatprep.subr.bf16.mxu1 %v8692_v10  ;;  %v8754_v9 = vcombine.high %v864_v3, %v868_v4  ;;  %v8756_v10 = vcombine.high %v865_v5, %v869_v6 }
 0x1b6   :  { %5160 = vmatpush1.bf16.msra.mxu0 %v8689_v15  ;;  %5478 = vmatpush1.bf16.msra.mxu1 %v8691_v16  ;;  %v8753_v15 = vcombine.low %v864_v3, %v868_v4  ;;  %v8755_v16 = vcombine.low %v865_v5, %v869_v6 }
 0x1b7   :  { %5161 = vmatprep.subr.bf16.mxu0 %v8698_v17  ;;  %5479 = vmatprep.subr.bf16.mxu1 %v8700_v18  ;;  %v8762_v17 = vcombine.high %v872_v11, %v876_v12  ;;  %v8764_v18 = vcombine.high %v873_v13, %v877_v14 }
 0x1ba   :  { %5162 = vmatpush1.bf16.msra.mxu0 %v8697_v23  ;;  %5480 = vmatpush1.bf16.msra.mxu1 %v8699_v24  ;;  %v8761_v23 = vcombine.low %v872_v11, %v876_v12  ;;  %v8763_v24 = vcombine.low %v873_v13, %v877_v14 }
 0x1bb   :  { %5163 = vmatprep.subr.bf16.mxu0 %v8706_v25  ;;  %5481 = vmatprep.subr.bf16.mxu1 %v8708_v26  ;;  %v8006_v25 = vcombine.high %v114_v19, %v118_v20  ;;  %v8008_v26 = vcombine.high %v115_v21, %v119_v22 }
 0x1be   :  { %5164 = vmatpush1.bf16.msra.mxu0 %v8705_v31  ;;  %5482 = vmatpush1.bf16.msra.mxu1 %v8707_v32  ;;  %v127_v31 = vld [vmem:[#allocation2 + $0x78] sm:$0xff]  ;;  %v8005_v32 = vcombine.low %v114_v19, %v118_v20 }
 0x1bf   :  { %5165 = vmatprep.subr.bf16.mxu0 %v8714_v33  ;;  %5483 = vmatprep.subr.bf16.mxu1 %v8716_v34  ;;  %v8007_v33 = vcombine.low %v115_v21, %v119_v22  ;;  %v8014_v34 = vcombine.high %v122_v27, %v126_v28  ;;  %v8016_v35 = vcombine.high %v123_v30, %v127_v31 }
 0x1c2   :  { %5166 = vmatpush1.bf16.msra.mxu0 %v8713_v39  ;;  %5484 = vmatpush1.bf16.msra.mxu1 %v8715_v40  ;;  %v131_v39 = vld [vmem:[#allocation2 + $0x98] sm:$0xff] }
 0x1c3   :  { %5167 = vmatprep.subr.bf16.mxu0 %v8722_v41  ;;  %5485 = vmatprep.subr.bf16.mxu1 %v8724_v42  ;;  %v135_v40 = vld [vmem:[#allocation2 + $0xb8] sm:$0xff]  ;;  %v8013_v41 = vcombine.low %v122_v27, %v126_v28  ;;  %v8015_v42 = vcombine.low %v123_v30, %v127_v31  ;;  %v186_v31 = vld [vmem:[#allocation2 + $0x250] sm:$0xff] }
 0x1c4   :  { %v8024_v44 = vcombine.high %v131_v39, %v135_v40  ;;  %v8023_v51 = vcombine.low %v131_v39, %v135_v40  ;;  %v194_v39 = vld [vmem:[#allocation2 + $0x290] sm:$0xff] }
 0x1c5   :  { %v198_v40 = vld [vmem:[#allocation2 + $0x2b0] sm:$0xff] }
 0x1c6   :  { %5168 = vmatpush1.bf16.msra.mxu0 %v8721_v47  ;;  %5486 = vmatpush1.bf16.msra.mxu1 %v8723_v48  ;;  %v9325_v47 = vld [vmem:[%s10179_s0 + $0x88] ss:$48 sps:$4 sm:$0xff]  }
 0x1c7   :  { %5169 = vmatprep.subr.bf16.mxu0 %v8730_v49  ;;  %5487 = vmatprep.subr.bf16.mxu1 %v8732_v50  ;;  %v139_v48 = vld [vmem:[#allocation2 + $0xd8] sm:$0xff]  ;;  %v8021_v50 = vcombine.low %v130_v37, %v134_v38 }
 0x1c8   :  { %v143_v49 = vld [vmem:[#allocation2 + $0xf8] sm:$0xff] }
 0x1c9   :  { %v8032_v53 = vcombine.high %v139_v48, %v143_v49  ;;  %v8031_v59 = vcombine.low %v139_v48, %v143_v49  ;;  %v206_v48 = vld [vmem:[#allocation2 + $0x2f0] sm:$0xff]  ;;  %v203_v49 = vld [vmem:[#allocation2 + $0x2d8] sm:$0xff] }
 0x1ca   :  { %5170 = vmatpush1.bf16.msra.mxu0 %v8729_v55  ;;  %5488 = vmatpush1.bf16.msra.mxu1 %v8731_v56  ;;  %v150_v55 = vld [vmem:[#allocation2 + $0x130] sm:$0xff]  ;;  %v147_v56 = vld [vmem:[#allocation2 + $0x118] sm:$0xff] }
 0x1cb   :  { %5171 = vmatprep.subr.bf16.mxu0 %v8738_v57  ;;  %5489 = vmatprep.subr.bf16.mxu1 %v8740_v58  ;;  %v151_v57 = vld [vmem:[#allocation2 + $0x138] sm:$0xff]  ;;  %v8029_v58 = vcombine.low %v138_v45, %v142_v46  ;;  %v8038_v60 = vcombine.high %v146_v54, %v150_v55  ;;  %v8037_v3 = vcombine.low %v146_v54, %v150_v55  ;;  %v210_v55 = vld [vmem:[#allocation2 + $0x310] sm:$0xff] }
 0x1cc   :  { %v8040_v61 = vcombine.high %v147_v56, %v151_v57  ;;  %v8039_v4 = vcombine.low %v147_v56, %v151_v57  ;;  %v8086_v45 = vcombine.high %v194_v39, %v198_v40  ;;  %v214_v56 = vld [vmem:[#allocation2 + $0x330] sm:$0xff]  ;;  %v211_v57 = vld [vmem:[#allocation2 + $0x318] sm:$0xff] }
 0x1ce   :  { %5172 = vmatpush1.bf16.msra.mxu0 %v8737_v63  ;;  %5490 = vmatpush1.bf16.msra.mxu1 %v8739_v0  ;;  %v158_v63 = vld [vmem:[#allocation2 + $0x170] sm:$0xff] }
 0x1cf   :  { %5173 = vmatprep.subr.bf16.mxu0 %v8746_v1  ;;  %5491 = vmatprep.subr.bf16.mxu1 %v8748_v2  ;;  %v9582_v0 = vld [vmem:[%s10179_s0 + $0x4] ss:$48 sps:$4 sm:$0xff]   ;;  %v155_v1 = vld [vmem:[#allocation2 + $0x158] sm:$0xff]  ;;  %v8046_v5 = vcombine.high %v154_v62, %v158_v63  ;;  %v8045_v11 = vcombine.low %v154_v62, %v158_v63 }
 0x1d0   :  { %v159_v2 = vld [vmem:[#allocation2 + $0x178] sm:$0xff]  ;;  %v218_v63 = vld [vmem:[#allocation2 + $0x350] sm:$0xff] }
 0x1d1   :  { %v8048_v6 = vcombine.high %v155_v1, %v159_v2  ;;  %v8047_v12 = vcombine.low %v155_v1, %v159_v2  ;;  %v219_v1 = vld [vmem:[#allocation2 + $0x358] sm:$0xff] }
 0x1d2   :  { %5174 = vmatpush1.bf16.msra.mxu0 %v8745_v7  ;;  %5492 = vmatpush1.bf16.msra.mxu1 %v8747_v8  ;;  %v162_v7 = vld [vmem:[#allocation2 + $0x190] sm:$0xff]  ;;  %v223_v2 = vld [vmem:[#allocation2 + $0x378] sm:$0xff] }
 0x1d3   :  { %5175 = vmatprep.subr.bf16.mxu0 %v8754_v9  ;;  %5493 = vmatprep.subr.bf16.mxu1 %v8756_v10  ;;  %v166_v8 = vld [vmem:[#allocation2 + $0x1b0] sm:$0xff]  ;;  %v163_v9 = vld [vmem:[#allocation2 + $0x198] sm:$0xff] }
 0x1d4   :  { %v167_v10 = vld [vmem:[#allocation2 + $0x1b8] sm:$0xff]  ;;  %v8054_v13 = vcombine.high %v162_v7, %v166_v8  ;;  %v8053_v19 = vcombine.low %v162_v7, %v166_v8  ;;  %v226_v7 = vld [vmem:[#allocation2 + $0x390] sm:$0xff] }
 0x1d5   :  { %v8056_v14 = vcombine.high %v163_v9, %v167_v10  ;;  %v8055_v20 = vcombine.low %v163_v9, %v167_v10  ;;  %v230_v8 = vld [vmem:[#allocation2 + $0x3b0] sm:$0xff]  ;;  %v227_v9 = vld [vmem:[#allocation2 + $0x398] sm:$0xff] }
 0x1d6   :  { %5176 = vmatpush1.bf16.msra.mxu0 %v8753_v15  ;;  %5494 = vmatpush1.bf16.msra.mxu1 %v8755_v16  ;;  %v170_v15 = vld [vmem:[#allocation2 + $0x1d0] sm:$0xff]  ;;  %v231_v10 = vld [vmem:[#allocation2 + $0x3b8] sm:$0xff] }
 0x1d7   :  { %5177 = vmatprep.subr.bf16.mxu0 %v8762_v17  ;;  %5495 = vmatprep.subr.bf16.mxu1 %v8764_v18  ;;  %v174_v16 = vld [vmem:[#allocation2 + $0x1f0] sm:$0xff]  ;;  %v171_v17 = vld [vmem:[#allocation2 + $0x1d8] sm:$0xff] }
 0x1d8   :  { %v175_v18 = vld [vmem:[#allocation2 + $0x1f8] sm:$0xff]  ;;  %v8062_v21 = vcombine.high %v170_v15, %v174_v16  ;;  %v8061_v27 = vcombine.low %v170_v15, %v174_v16  ;;  %v234_v15 = vld [vmem:[#allocation2 + $0x3d0] sm:$0xff] }
 0x1d9   :  { %v8064_v22 = vcombine.high %v171_v17, %v175_v18  ;;  %v8063_v28 = vcombine.low %v171_v17, %v175_v18  ;;  %v238_v16 = vld [vmem:[#allocation2 + $0x3f0] sm:$0xff]  ;;  %v235_v17 = vld [vmem:[#allocation2 + $0x3d8] sm:$0xff] }
 0x1da   :  { %5178 = vmatpush1.bf16.msra.mxu0 %v8761_v23  ;;  %5496 = vmatpush1.bf16.msra.mxu1 %v8763_v24  ;;  %v178_v23 = vld [vmem:[#allocation2 + $0x210] sm:$0xff]  ;;  %v239_v18 = vld [vmem:[#allocation2 + $0x3f8] sm:$0xff] }
 0x1db   :  { %5518 = vmatprep.subr.bf16.mxu0 %v8006_v25  ;;  %5836 = vmatprep.subr.bf16.mxu1 %v8008_v26  ;;  %v182_v24 = vld [vmem:[#allocation2 + $0x230] sm:$0xff]  ;;  %v179_v25 = vld [vmem:[#allocation2 + $0x218] sm:$0xff] }
 0x1dc   :  { %v183_v26 = vld [vmem:[#allocation2 + $0x238] sm:$0xff] }
 0x1dd   :  { %5180 = vmatmul.mubr.bf16.vlgmr.msra.gmra.mrb[0].mxu0 %v9320_v29  ;;  %5498 = vmatmul.mubr.bf16.vlgmr.msra.gmra.mrb[0].mxu1 %v9320_v29  ;;  %v8070_v29 = vcombine.high %v178_v23, %v182_v24  ;;  %v8072_v30 = vcombine.high %v179_v25, %v183_v26 }
 0x1de   :  { %5519 = vmatpush1.bf16.msra.mxu0 %v8005_v32  ;;  %5837 = vmatpush1.bf16.msra.mxu1 %v8007_v33  ;;  %v190_v32 = vld [vmem:[#allocation2 + $0x270] sm:$0xff]  ;;  %v187_v33 = vld [vmem:[#allocation2 + $0x258] sm:$0xff] }
 0x1df   :  { %5520 = vmatprep.subr.bf16.mxu0 %v8014_v34  ;;  %5838 = vmatprep.subr.bf16.mxu1 %v8016_v35  ;;  %v191_v34 = vld [vmem:[#allocation2 + $0x278] sm:$0xff]  ;;  %v8069_v35 = vcombine.low %v178_v23, %v182_v24  ;;  %v8078_v37 = vcombine.high %v186_v31, %v190_v32  ;;  %v242_v23 = vld [vmem:[#allocation2 + $0x410] sm:$0xff] }
 0x1e0   :  { %5189 = vmatprep.mubr.bf16.mxu0 %v9323_v36  ;;  %5507 = vmatprep.mubr.bf16.mxu1 %v9323_v36  ;;  %v8071_v36 = vcombine.low %v179_v25, %v183_v26  ;;  %v8080_v38 = vcombine.high %v187_v33, %v191_v34  ;;  %v246_v24 = vld [vmem:[#allocation2 + $0x430] sm:$0xff]  ;;  %v243_v25 = vld [vmem:[#allocation2 + $0x418] sm:$0xff] }
 0x1e1   :  { %v247_v26 = vld [vmem:[#allocation2 + $0x438] sm:$0xff] }
 0x1e2   :  { %5521 = vmatpush1.bf16.msra.mxu0 %v8013_v41  ;;  %5839 = vmatpush1.bf16.msra.mxu1 %v8015_v42  ;;  %v195_v41 = vld [vmem:[#allocation2 + $0x298] sm:$0xff] }
 0x1e3   :  { %5522 = vmatprep.subr.bf16.mxu0 %v8022_v43  ;;  %5840 = vmatprep.subr.bf16.mxu1 %v8024_v44  ;;  %v199_v42 = vld [vmem:[#allocation2 + $0x2b8] sm:$0xff]  ;;  %v8077_v43 = vcombine.low %v186_v31, %v190_v32  ;;  %v8079_v44 = vcombine.low %v187_v33, %v191_v34  ;;  %v250_v31 = vld [vmem:[#allocation2 + $0x450] sm:$0xff] }
 0x1e4   :  { %v8088_v46 = vcombine.high %v195_v41, %v199_v42  ;;  %v254_v32 = vld [vmem:[#allocation2 + $0x470] sm:$0xff]  ;;  %v251_v33 = vld [vmem:[#allocation2 + $0x458] sm:$0xff] }
 0x1e5   :  { %5190 = vmatmul.mubr.bf16.gmra.mrb[4].mxu0 %v9325_v47  ;;  %5508 = vmatmul.mubr.bf16.gmra.mrb[4].mxu1 %v9325_v47  ;;  %v202_v47 = vld [vmem:[#allocation2 + $0x2d0] sm:$0xff]  ;;  %v255_v34 = vld [vmem:[#allocation2 + $0x478] sm:$0xff] }
 0x1e6   :  { %5523 = vmatpush1.bf16.msra.mxu0 %v8021_v50  ;;  %5841 = vmatpush1.bf16.msra.mxu1 %v8023_v51  ;;  %v207_v50 = vld [vmem:[#allocation2 + $0x2f8] sm:$0xff]  ;;  %v8085_v51 = vcombine.low %v194_v39, %v198_v40  ;;  %v258_v39 = vld [vmem:[#allocation2 + $0x490] sm:$0xff] }
 0x1e7   :  { %5524 = vmatprep.subr.bf16.mxu0 %v8030_v52  ;;  %5842 = vmatprep.subr.bf16.mxu1 %v8032_v53  ;;  %v8087_v52 = vcombine.low %v195_v41, %v199_v42  ;;  %v8094_v53 = vcombine.high %v202_v47, %v206_v48  ;;  %v8096_v54 = vcombine.high %v203_v49, %v207_v50  ;;  %v262_v40 = vld [vmem:[#allocation2 + $0x4b0] sm:$0xff]  ;;  %v259_v42 = vld [vmem:[#allocation2 + $0x498] sm:$0xff] }
 0x1e8   :  { %5550 = vmatprep.mubr.bf16.mxu0 %v9582_v0  ;;  %5868 = vmatprep.mubr.bf16.mxu1 %v9582_v0  ;;  %v222_v0 = vld [vmem:[#allocation2 + $0x370] sm:$0xff] }
 0x1e9   :  { %v9583_v41 = vld [vmem:[%s10179_s0] ss:$48 sps:$4 sm:$0xff]  }
 0x1ea   :  { %5525 = vmatpush1.bf16.msra.mxu0 %v8029_v58  ;;  %5843 = vmatpush1.bf16.msra.mxu1 %v8031_v59  ;;  %v215_v58 = vld [vmem:[#allocation2 + $0x338] sm:$0xff]  ;;  %v8093_v59 = vcombine.low %v202_v47, %v206_v48  ;;  %v266_v48 = vld [vmem:[#allocation2 + $0x4d0] sm:$0xff] }
 0x1eb   :  { %5526 = vmatprep.subr.bf16.mxu0 %v8038_v60  ;;  %5844 = vmatprep.subr.bf16.mxu1 %v8040_v61  ;;  %v8095_v60 = vcombine.low %v203_v49, %v207_v50  ;;  %v8102_v61 = vcombine.high %v210_v55, %v214_v56  ;;  %v8104_v62 = vcombine.high %v211_v57, %v215_v58  ;;  %v270_v49 = vld [vmem:[#allocation2 + $0x4f0] sm:$0xff] }
 0x1ec   :  { %v9584_v50 = vld [vmem:[%s10179_s0 + $0x64] ss:$48 sps:$4 sm:$0xff]  }
 0x1ee   :  { %5527 = vmatpush1.bf16.msra.mxu0 %v8037_v3  ;;  %5845 = vmatpush1.bf16.msra.mxu1 %v8039_v4  ;;  %v8101_v3 = vcombine.low %v210_v55, %v214_v56  ;;  %v8103_v4 = vcombine.low %v211_v57, %v215_v58  ;;  %v8158_v55 = vcombine.high %v266_v48, %v270_v49  ;;  %v274_v57 = vld [vmem:[#allocation2 + $0x510] sm:$0xff] }
 0x1ef   :  { %5528 = vmatprep.subr.bf16.mxu0 %v8046_v5  ;;  %5846 = vmatprep.subr.bf16.mxu1 %v8048_v6  ;;  %v8110_v5 = vcombine.high %v218_v63, %v222_v0  ;;  %v8112_v6 = vcombine.high %v219_v1, %v223_v2  ;;  %v278_v58 = vld [vmem:[#allocation2 + $0x530] sm:$0xff] }
 0x1f2   :  { %5529 = vmatpush1.bf16.msra.mxu0 %v8045_v11  ;;  %5847 = vmatpush1.bf16.msra.mxu1 %v8047_v12  ;;  %v8109_v11 = vcombine.low %v218_v63, %v222_v0  ;;  %v8111_v12 = vcombine.low %v219_v1, %v223_v2  ;;  %v8166_v0 = vcombine.high %v274_v57, %v278_v58  ;;  %v282_v2 = vld [vmem:[#allocation2 + $0x550] sm:$0xff] }
 0x1f3   :  { %5530 = vmatprep.subr.bf16.mxu0 %v8054_v13  ;;  %5848 = vmatprep.subr.bf16.mxu1 %v8056_v14  ;;  %v8118_v13 = vcombine.high %v226_v7, %v230_v8  ;;  %v8120_v14 = vcombine.high %v227_v9, %v231_v10 }
 0x1f6   :  { %5531 = vmatpush1.bf16.msra.mxu0 %v8053_v19  ;;  %5849 = vmatpush1.bf16.msra.mxu1 %v8055_v20  ;;  %v8117_v19 = vcombine.low %v226_v7, %v230_v8  ;;  %v8119_v20 = vcombine.low %v227_v9, %v231_v10  ;;  %v8165_v7 = vcombine.low %v274_v57, %v278_v58 }
 0x1f7   :  { %5532 = vmatprep.subr.bf16.mxu0 %v8062_v21  ;;  %5850 = vmatprep.subr.bf16.mxu1 %v8064_v22  ;;  %v8126_v21 = vcombine.high %v234_v15, %v238_v16  ;;  %v8128_v22 = vcombine.high %v235_v17, %v239_v18 }
 0x1fa   :  { %5533 = vmatpush1.bf16.msra.mxu0 %v8061_v27  ;;  %5851 = vmatpush1.bf16.msra.mxu1 %v8063_v28  ;;  %v8125_v27 = vcombine.low %v234_v15, %v238_v16  ;;  %v8127_v28 = vcombine.low %v235_v17, %v239_v18 }
 0x1fb   :  { %5534 = vmatprep.subr.bf16.mxu0 %v8070_v29  ;;  %5852 = vmatprep.subr.bf16.mxu1 %v8072_v30  ;;  %v8134_v29 = vcombine.high %v242_v23, %v246_v24  ;;  %v8136_v30 = vcombine.high %v243_v25, %v247_v26 }
 0x1fe   :  { %5535 = vmatpush1.bf16.msra.mxu0 %v8069_v35  ;;  %5853 = vmatpush1.bf16.msra.mxu1 %v8071_v36  ;;  %v8133_v35 = vcombine.low %v242_v23, %v246_v24  ;;  %v8135_v36 = vcombine.low %v243_v25, %v247_v26 }
 0x1ff   :  { %5536 = vmatprep.subr.bf16.mxu0 %v8078_v37  ;;  %5854 = vmatprep.subr.bf16.mxu1 %v8080_v38  ;;  %v8142_v37 = vcombine.high %v250_v31, %v254_v32  ;;  %v8144_v38 = vcombine.high %v251_v33, %v255_v34 }
 0x202   :  { %5537 = vmatpush1.bf16.msra.mxu0 %v8077_v43  ;;  %5855 = vmatpush1.bf16.msra.mxu1 %v8079_v44  ;;  %v263_v43 = vld [vmem:[#allocation2 + $0x4b8] sm:$0xff]  ;;  %v8141_v44 = vcombine.low %v250_v31, %v254_v32 }
 0x203   :  { %5538 = vmatprep.subr.bf16.mxu0 %v8086_v45  ;;  %5856 = vmatprep.subr.bf16.mxu1 %v8088_v46  ;;  %v8143_v45 = vcombine.low %v251_v33, %v255_v34  ;;  %v8150_v46 = vcombine.high %v258_v39, %v262_v40  ;;  %v8152_v47 = vcombine.high %v259_v42, %v263_v43 }
 0x206   :  { %5539 = vmatpush1.bf16.msra.mxu0 %v8085_v51  ;;  %5857 = vmatpush1.bf16.msra.mxu1 %v8087_v52  ;;  %v267_v51 = vld [vmem:[#allocation2 + $0x4d8] sm:$0xff] }
 0x207   :  { %5540 = vmatprep.subr.bf16.mxu0 %v8094_v53  ;;  %5858 = vmatprep.subr.bf16.mxu1 %v8096_v54  ;;  %v271_v52 = vld [vmem:[#allocation2 + $0x4f8] sm:$0xff]  ;;  %v8149_v53 = vcombine.low %v258_v39, %v262_v40  ;;  %v8151_v54 = vcombine.low %v259_v42, %v263_v43  ;;  %v322_v43 = vld [vmem:[#allocation2 + $0x690] sm:$0xff] }
 0x208   :  { %v8160_v56 = vcombine.high %v267_v51, %v271_v52  ;;  %v8159_v63 = vcombine.low %v267_v51, %v271_v52  ;;  %v330_v51 = vld [vmem:[#allocation2 + $0x6d0] sm:$0xff] }
 0x209   :  { %v334_v52 = vld [vmem:[#allocation2 + $0x6f0] sm:$0xff] }
 0x20a   :  { %5541 = vmatpush1.bf16.msra.mxu0 %v8093_v59  ;;  %5859 = vmatpush1.bf16.msra.mxu1 %v8095_v60  ;;  %v275_v59 = vld [vmem:[#allocation2 + $0x518] sm:$0xff]  ;;  %v8222_v57 = vcombine.high %v330_v51, %v334_v52 }
 0x20b   :  { %5542 = vmatprep.subr.bf16.mxu0 %v8102_v61  ;;  %5860 = vmatprep.subr.bf16.mxu1 %v8104_v62  ;;  %v279_v60 = vld [vmem:[#allocation2 + $0x538] sm:$0xff]  ;;  %v9585_v61 = vld [vmem:[%s10179_s0 + $0x60] ss:$48 sps:$4 sm:$0xff]   ;;  %v8157_v62 = vcombine.low %v266_v48, %v270_v49 }
 0x20c   :  { %v8168_v1 = vcombine.high %v275_v59, %v279_v60  ;;  %v8167_v8 = vcombine.low %v275_v59, %v279_v60  ;;  %v338_v59 = vld [vmem:[#allocation2 + $0x710] sm:$0xff] }
 0x20d   :  { %v342_v60 = vld [vmem:[#allocation2 + $0x730] sm:$0xff] }
 0x20e   :  { %5543 = vmatpush1.bf16.msra.mxu0 %v8101_v3  ;;  %5861 = vmatpush1.bf16.msra.mxu1 %v8103_v4  ;;  %v286_v3 = vld [vmem:[#allocation2 + $0x570] sm:$0xff]  ;;  %v9586_v4 = vld [vmem:[%s10179_s0 + $0xc] ss:$48 sps:$4 sm:$0xff]  }
 0x20f   :  { %5544 = vmatprep.subr.bf16.mxu0 %v8110_v5  ;;  %5862 = vmatprep.subr.bf16.mxu1 %v8112_v6  ;;  %v283_v5 = vld [vmem:[#allocation2 + $0x558] sm:$0xff]  ;;  %v8174_v9 = vcombine.high %v282_v2, %v286_v3  ;;  %v8173_v15 = vcombine.low %v282_v2, %v286_v3  ;;  %v346_v3 = vld [vmem:[#allocation2 + $0x750] sm:$0xff] }
 0x210   :  { %v287_v6 = vld [vmem:[#allocation2 + $0x578] sm:$0xff] }
 0x211   :  { %v8176_v10 = vcombine.high %v283_v5, %v287_v6  ;;  %v8175_v16 = vcombine.low %v283_v5, %v287_v6  ;;  %v347_v5 = vld [vmem:[#allocation2 + $0x758] sm:$0xff] }
 0x212   :  { %5545 = vmatpush1.bf16.msra.mxu0 %v8109_v11  ;;  %5863 = vmatpush1.bf16.msra.mxu1 %v8111_v12  ;;  %v290_v11 = vld [vmem:[#allocation2 + $0x590] sm:$0xff]  ;;  %v351_v6 = vld [vmem:[#allocation2 + $0x778] sm:$0xff] }
 0x213   :  { %5546 = vmatprep.subr.bf16.mxu0 %v8118_v13  ;;  %5864 = vmatprep.subr.bf16.mxu1 %v8120_v14  ;;  %v294_v12 = vld [vmem:[#allocation2 + $0x5b0] sm:$0xff]  ;;  %v291_v13 = vld [vmem:[#allocation2 + $0x598] sm:$0xff] }
 0x214   :  { %v295_v14 = vld [vmem:[#allocation2 + $0x5b8] sm:$0xff]  ;;  %v8182_v17 = vcombine.high %v290_v11, %v294_v12  ;;  %v8181_v23 = vcombine.low %v290_v11, %v294_v12  ;;  %v354_v11 = vld [vmem:[#allocation2 + $0x790] sm:$0xff] }
 0x215   :  { %v8184_v18 = vcombine.high %v291_v13, %v295_v14  ;;  %v8183_v24 = vcombine.low %v291_v13, %v295_v14  ;;  %v358_v12 = vld [vmem:[#allocation2 + $0x7b0] sm:$0xff]  ;;  %v355_v13 = vld [vmem:[#allocation2 + $0x798] sm:$0xff] }
 0x216   :  { %5547 = vmatpush1.bf16.msra.mxu0 %v8117_v19  ;;  %5865 = vmatpush1.bf16.msra.mxu1 %v8119_v20  ;;  %v298_v19 = vld [vmem:[#allocation2 + $0x5d0] sm:$0xff]  ;;  %v359_v14 = vld [vmem:[#allocation2 + $0x7b8] sm:$0xff] }
 0x217   :  { %5548 = vmatprep.subr.bf16.mxu0 %v8126_v21  ;;  %5866 = vmatprep.subr.bf16.mxu1 %v8128_v22  ;;  %v302_v20 = vld [vmem:[#allocation2 + $0x5f0] sm:$0xff]  ;;  %v299_v21 = vld [vmem:[#allocation2 + $0x5d8] sm:$0xff] }
 0x218   :  { %v303_v22 = vld [vmem:[#allocation2 + $0x5f8] sm:$0xff]  ;;  %v8190_v25 = vcombine.high %v298_v19, %v302_v20  ;;  %v8189_v31 = vcombine.low %v298_v19, %v302_v20  ;;  %v362_v19 = vld [vmem:[#allocation2 + $0x7d0] sm:$0xff] }
 0x219   :  { %v8192_v26 = vcombine.high %v299_v21, %v303_v22  ;;  %v8191_v32 = vcombine.low %v299_v21, %v303_v22  ;;  %v366_v20 = vld [vmem:[#allocation2 + $0x7f0] sm:$0xff]  ;;  %v363_v21 = vld [vmem:[#allocation2 + $0x7d8] sm:$0xff] }
 0x21a   :  { %5549 = vmatpush1.bf16.msra.mxu0 %v8125_v27  ;;  %5867 = vmatpush1.bf16.msra.mxu1 %v8127_v28  ;;  %v306_v27 = vld [vmem:[#allocation2 + $0x610] sm:$0xff]  ;;  %v367_v22 = vld [vmem:[#allocation2 + $0x7f8] sm:$0xff] }
 0x21b   :  { %5571 = vmatprep.subr.bf16.mxu0 %v8134_v29  ;;  %5889 = vmatprep.subr.bf16.mxu1 %v8136_v30  ;;  %v310_v28 = vld [vmem:[#allocation2 + $0x630] sm:$0xff]  ;;  %v307_v29 = vld [vmem:[#allocation2 + $0x618] sm:$0xff] }
 0x21c   :  { %v311_v30 = vld [vmem:[#allocation2 + $0x638] sm:$0xff]  ;;  %v8198_v33 = vcombine.high %v306_v27, %v310_v28  ;;  %v8197_v39 = vcombine.low %v306_v27, %v310_v28  ;;  %v370_v27 = vld [vmem:[#allocation2 + $0x810] sm:$0xff] }
 0x21d   :  { %5551 = vmatmul.mubr.bf16.vlgmr.msra.gmra.mrb[8].mxu0 %v9583_v41  ;;  %5869 = vmatmul.mubr.bf16.vlgmr.msra.gmra.mrb[8].mxu1 %v9583_v41  ;;  %v8200_v34 = vcombine.high %v307_v29, %v311_v30  ;;  %v8199_v40 = vcombine.low %v307_v29, %v311_v30  ;;  %v374_v28 = vld [vmem:[#allocation2 + $0x830] sm:$0xff]  ;;  %v371_v29 = vld [vmem:[#allocation2 + $0x818] sm:$0xff] }
 0x21e   :  { %5572 = vmatpush1.bf16.msra.mxu0 %v8133_v35  ;;  %5890 = vmatpush1.bf16.msra.mxu1 %v8135_v36  ;;  %v314_v35 = vld [vmem:[#allocation2 + $0x650] sm:$0xff]  ;;  %v375_v30 = vld [vmem:[#allocation2 + $0x838] sm:$0xff] }
 0x21f   :  { %5573 = vmatprep.subr.bf16.mxu0 %v8142_v37  ;;  %5891 = vmatprep.subr.bf16.mxu1 %v8144_v38  ;;  %v318_v36 = vld [vmem:[#allocation2 + $0x670] sm:$0xff]  ;;  %v315_v37 = vld [vmem:[#allocation2 + $0x658] sm:$0xff] }
 0x220   :  { %5560 = vmatprep.mubr.bf16.mxu0 %v9584_v50  ;;  %5878 = vmatprep.mubr.bf16.mxu1 %v9584_v50  ;;  %v319_v38 = vld [vmem:[#allocation2 + $0x678] sm:$0xff]  ;;  %v8206_v41 = vcombine.high %v314_v35, %v318_v36 }
 0x221   :  { %v8208_v42 = vcombine.high %v315_v37, %v319_v38  ;;  %v8207_v48 = vcombine.low %v315_v37, %v319_v38  ;;  %v379_v37 = vld [vmem:[#allocation2 + $0x858] sm:$0xff] }
 0x222   :  { %5574 = vmatpush1.bf16.msra.mxu0 %v8141_v44  ;;  %5892 = vmatpush1.bf16.msra.mxu1 %v8143_v45  ;;  %v326_v44 = vld [vmem:[#allocation2 + $0x6b0] sm:$0xff]  ;;  %v323_v45 = vld [vmem:[#allocation2 + $0x698] sm:$0xff] }
 0x223   :  { %5575 = vmatprep.subr.bf16.mxu0 %v8150_v46  ;;  %5893 = vmatprep.subr.bf16.mxu1 %v8152_v47  ;;  %v327_v46 = vld [vmem:[#allocation2 + $0x6b8] sm:$0xff]  ;;  %v8205_v47 = vcombine.low %v314_v35, %v318_v36  ;;  %v8214_v49 = vcombine.high %v322_v43, %v326_v44  ;;  %v378_v35 = vld [vmem:[#allocation2 + $0x850] sm:$0xff] }
 0x224   :  { %v8216_v50 = vcombine.high %v323_v45, %v327_v46  ;;  %v382_v36 = vld [vmem:[#allocation2 + $0x870] sm:$0xff]  ;;  %v383_v38 = vld [vmem:[#allocation2 + $0x878] sm:$0xff] }
 0x225   :  { %5561 = vmatmul.mubr.bf16.gmra.mrb[12].mxu0 %v9585_v61  ;;  %5879 = vmatmul.mubr.bf16.gmra.mrb[12].mxu1 %v9585_v61  ;;  %v339_v61 = vld [vmem:[#allocation2 + $0x718] sm:$0xff] }
 0x226   :  { %5576 = vmatpush1.bf16.msra.mxu0 %v8149_v53  ;;  %5894 = vmatpush1.bf16.msra.mxu1 %v8151_v54  ;;  %v331_v53 = vld [vmem:[#allocation2 + $0x6d8] sm:$0xff] }
 0x227   :  { %5577 = vmatprep.subr.bf16.mxu0 %v8158_v55  ;;  %5895 = vmatprep.subr.bf16.mxu1 %v8160_v56  ;;  %v335_v54 = vld [vmem:[#allocation2 + $0x6f8] sm:$0xff]  ;;  %v8213_v55 = vcombine.low %v322_v43, %v326_v44  ;;  %v8215_v56 = vcombine.low %v323_v45, %v327_v46  ;;  %v386_v43 = vld [vmem:[#allocation2 + $0x890] sm:$0xff] }
 0x228   :  { %5603 = vmatprep.mubr.bf16.mxu0 %v9586_v4  ;;  %5921 = vmatprep.mubr.bf16.mxu1 %v9586_v4  ;;  %v8224_v58 = vcombine.high %v331_v53, %v335_v54  ;;  %v350_v4 = vld [vmem:[#allocation2 + $0x770] sm:$0xff]  ;;  %v9587_v45 = vld [vmem:[%s10179_s0 + $0x8] ss:$48 sps:$4 sm:$0xff]  }
 0x229   :  { %v390_v44 = vld [vmem:[#allocation2 + $0x8b0] sm:$0xff]  ;;  %v387_v46 = vld [vmem:[#allocation2 + $0x898] sm:$0xff] }
 0x22a   :  { %5578 = vmatpush1.bf16.msra.mxu0 %v8157_v62  ;;  %5896 = vmatpush1.bf16.msra.mxu1 %v8159_v63  ;;  %v343_v62 = vld [vmem:[#allocation2 + $0x738] sm:$0xff]  ;;  %v8221_v63 = vcombine.low %v330_v51, %v334_v52  ;;  %v394_v52 = vld [vmem:[#allocation2 + $0x8d0] sm:$0xff] }
 0x22b   :  { %5579 = vmatprep.subr.bf16.mxu0 %v8166_v0  ;;  %5897 = vmatprep.subr.bf16.mxu1 %v8168_v1  ;;  %v8223_v0 = vcombine.low %v331_v53, %v335_v54  ;;  %v8230_v1 = vcombine.high %v338_v59, %v342_v60  ;;  %v8232_v2 = vcombine.high %v339_v61, %v343_v62  ;;  %v398_v53 = vld [vmem:[#allocation2 + $0x8f0] sm:$0xff]  ;;  %v9588_v54 = vld [vmem:[%s10179_s0 + $0x6c] ss:$48 sps:$4 sm:$0xff]  }
 0x22e   :  { %5580 = vmatpush1.bf16.msra.mxu0 %v8165_v7  ;;  %5898 = vmatpush1.bf16.msra.mxu1 %v8167_v8  ;;  %v8229_v7 = vcombine.low %v338_v59, %v342_v60  ;;  %v8231_v8 = vcombine.low %v339_v61, %v343_v62  ;;  %v8286_v59 = vcombine.high %v394_v52, %v398_v53  ;;  %v402_v61 = vld [vmem:[#allocation2 + $0x910] sm:$0xff] }
 0x22f   :  { %5581 = vmatprep.subr.bf16.mxu0 %v8174_v9  ;;  %5899 = vmatprep.subr.bf16.mxu1 %v8176_v10  ;;  %v8238_v9 = vcombine.high %v346_v3, %v350_v4  ;;  %v8240_v10 = vcombine.high %v347_v5, %v351_v6  ;;  %v406_v62 = vld [vmem:[#allocation2 + $0x930] sm:$0xff] }
 0x232   :  { %5582 = vmatpush1.bf16.msra.mxu0 %v8173_v15  ;;  %5900 = vmatpush1.bf16.msra.mxu1 %v8175_v16  ;;  %v8237_v15 = vcombine.low %v346_v3, %v350_v4  ;;  %v8239_v16 = vcombine.low %v347_v5, %v351_v6  ;;  %v8294_v4 = vcombine.high %v402_v61, %v406_v62  ;;  %v410_v6 = vld [vmem:[#allocation2 + $0x950] sm:$0xff] }
 0x233   :  { %5583 = vmatprep.subr.bf16.mxu0 %v8182_v17  ;;  %5901 = vmatprep.subr.bf16.mxu1 %v8184_v18  ;;  %v8246_v17 = vcombine.high %v354_v11, %v358_v12  ;;  %v8248_v18 = vcombine.high %v355_v13, %v359_v14 }
 0x236   :  { %5584 = vmatpush1.bf16.msra.mxu0 %v8181_v23  ;;  %5902 = vmatpush1.bf16.msra.mxu1 %v8183_v24  ;;  %v8245_v23 = vcombine.low %v354_v11, %v358_v12  ;;  %v8247_v24 = vcombine.low %v355_v13, %v359_v14  ;;  %v8293_v11 = vcombine.low %v402_v61, %v406_v62 }
 0x237   :  { %5585 = vmatprep.subr.bf16.mxu0 %v8190_v25  ;;  %5903 = vmatprep.subr.bf16.mxu1 %v8192_v26  ;;  %v8254_v25 = vcombine.high %v362_v19, %v366_v20  ;;  %v8256_v26 = vcombine.high %v363_v21, %v367_v22 }
 0x23a   :  { %5586 = vmatpush1.bf16.msra.mxu0 %v8189_v31  ;;  %5904 = vmatpush1.bf16.msra.mxu1 %v8191_v32  ;;  %v8253_v31 = vcombine.low %v362_v19, %v366_v20  ;;  %v8255_v32 = vcombine.low %v363_v21, %v367_v22 }
 0x23b   :  { %5587 = vmatprep.subr.bf16.mxu0 %v8198_v33  ;;  %5905 = vmatprep.subr.bf16.mxu1 %v8200_v34  ;;  %v8262_v33 = vcombine.high %v370_v27, %v374_v28  ;;  %v8264_v34 = vcombine.high %v371_v29, %v375_v30 }
 0x23e   :  { %5588 = vmatpush1.bf16.msra.mxu0 %v8197_v39  ;;  %5906 = vmatpush1.bf16.msra.mxu1 %v8199_v40  ;;  %v8261_v39 = vcombine.low %v370_v27, %v374_v28  ;;  %v8263_v40 = vcombine.low %v371_v29, %v375_v30 }
 0x23f   :  { %5589 = vmatprep.subr.bf16.mxu0 %v8206_v41  ;;  %5907 = vmatprep.subr.bf16.mxu1 %v8208_v42  ;;  %v8270_v41 = vcombine.high %v378_v35, %v382_v36  ;;  %v8272_v42 = vcombine.high %v379_v37, %v383_v38 }
 0x242   :  { %5590 = vmatpush1.bf16.msra.mxu0 %v8205_v47  ;;  %5908 = vmatpush1.bf16.msra.mxu1 %v8207_v48  ;;  %v391_v47 = vld [vmem:[#allocation2 + $0x8b8] sm:$0xff]  ;;  %v8269_v48 = vcombine.low %v378_v35, %v382_v36 }
 0x243   :  { %5591 = vmatprep.subr.bf16.mxu0 %v8214_v49  ;;  %5909 = vmatprep.subr.bf16.mxu1 %v8216_v50  ;;  %v8271_v49 = vcombine.low %v379_v37, %v383_v38  ;;  %v8278_v50 = vcombine.high %v386_v43, %v390_v44  ;;  %v8280_v51 = vcombine.high %v387_v46, %v391_v47 }
 0x246   :  { %5592 = vmatpush1.bf16.msra.mxu0 %v8213_v55  ;;  %5910 = vmatpush1.bf16.msra.mxu1 %v8215_v56  ;;  %v395_v55 = vld [vmem:[#allocation2 + $0x8d8] sm:$0xff] }
 0x247   :  { %5593 = vmatprep.subr.bf16.mxu0 %v8222_v57  ;;  %5911 = vmatprep.subr.bf16.mxu1 %v8224_v58  ;;  %v399_v56 = vld [vmem:[#allocation2 + $0x8f8] sm:$0xff]  ;;  %v8277_v57 = vcombine.low %v386_v43, %v390_v44  ;;  %v8279_v58 = vcombine.low %v387_v46, %v391_v47  ;;  %v450_v47 = vld [vmem:[#allocation2 + $0xa90] sm:$0xff] }
 0x248   :  { %v8288_v60 = vcombine.high %v395_v55, %v399_v56  ;;  %v8287_v3 = vcombine.low %v395_v55, %v399_v56  ;;  %v458_v55 = vld [vmem:[#allocation2 + $0xad0] sm:$0xff] }
 0x249   :  { %v462_v56 = vld [vmem:[#allocation2 + $0xaf0] sm:$0xff] }
 0x24a   :  { %5594 = vmatpush1.bf16.msra.mxu0 %v8221_v63  ;;  %5912 = vmatpush1.bf16.msra.mxu1 %v8223_v0  ;;  %v403_v63 = vld [vmem:[#allocation2 + $0x918] sm:$0xff]  ;;  %v8350_v61 = vcombine.high %v458_v55, %v462_v56 }
 0x24b   :  { %5595 = vmatprep.subr.bf16.mxu0 %v8230_v1  ;;  %5913 = vmatprep.subr.bf16.mxu1 %v8232_v2  ;;  %v407_v0 = vld [vmem:[#allocation2 + $0x938] sm:$0xff]  ;;  %v8285_v2 = vcombine.low %v394_v52, %v398_v53 }
 0x24c   :  { %v9589_v1 = vld [vmem:[%s10179_s0 + $0x68] ss:$48 sps:$4 sm:$0xff]   ;;  %v8296_v5 = vcombine.high %v403_v63, %v407_v0  ;;  %v8295_v12 = vcombine.low %v403_v63, %v407_v0  ;;  %v466_v63 = vld [vmem:[#allocation2 + $0xb10] sm:$0xff] }
 0x24d   :  { %v470_v0 = vld [vmem:[#allocation2 + $0xb30] sm:$0xff] }
 0x24e   :  { %5596 = vmatpush1.bf16.msra.mxu0 %v8229_v7  ;;  %5914 = vmatpush1.bf16.msra.mxu1 %v8231_v8  ;;  %v414_v7 = vld [vmem:[#allocation2 + $0x970] sm:$0xff] }
 0x24f   :  { %5597 = vmatprep.subr.bf16.mxu0 %v8238_v9  ;;  %5915 = vmatprep.subr.bf16.mxu1 %v8240_v10  ;;  %v9590_v8 = vld [vmem:[%s10179_s0 + $0x14] ss:$48 sps:$4 sm:$0xff]   ;;  %v411_v9 = vld [vmem:[#allocation2 + $0x958] sm:$0xff]  ;;  %v8302_v13 = vcombine.high %v410_v6, %v414_v7  ;;  %v8301_v19 = vcombine.low %v410_v6, %v414_v7 }
 0x250   :  { %v415_v10 = vld [vmem:[#allocation2 + $0x978] sm:$0xff]  ;;  %v474_v7 = vld [vmem:[#allocation2 + $0xb50] sm:$0xff] }
 0x251   :  { %v8304_v14 = vcombine.high %v411_v9, %v415_v10  ;;  %v8303_v20 = vcombine.low %v411_v9, %v415_v10  ;;  %v475_v9 = vld [vmem:[#allocation2 + $0xb58] sm:$0xff] }
 0x252   :  { %5598 = vmatpush1.bf16.msra.mxu0 %v8237_v15  ;;  %5916 = vmatpush1.bf16.msra.mxu1 %v8239_v16  ;;  %v418_v15 = vld [vmem:[#allocation2 + $0x990] sm:$0xff]  ;;  %v479_v10 = vld [vmem:[#allocation2 + $0xb78] sm:$0xff] }
 0x253   :  { %5599 = vmatprep.subr.bf16.mxu0 %v8246_v17  ;;  %5917 = vmatprep.subr.bf16.mxu1 %v8248_v18  ;;  %v422_v16 = vld [vmem:[#allocation2 + $0x9b0] sm:$0xff]  ;;  %v419_v17 = vld [vmem:[#allocation2 + $0x998] sm:$0xff] }
 0x254   :  { %v423_v18 = vld [vmem:[#allocation2 + $0x9b8] sm:$0xff]  ;;  %v8310_v21 = vcombine.high %v418_v15, %v422_v16  ;;  %v8309_v27 = vcombine.low %v418_v15, %v422_v16  ;;  %v482_v15 = vld [vmem:[#allocation2 + $0xb90] sm:$0xff] }
 0x255   :  { %v8312_v22 = vcombine.high %v419_v17, %v423_v18  ;;  %v8311_v28 = vcombine.low %v419_v17, %v423_v18  ;;  %v486_v16 = vld [vmem:[#allocation2 + $0xbb0] sm:$0xff]  ;;  %v483_v17 = vld [vmem:[#allocation2 + $0xb98] sm:$0xff] }
 0x256   :  { %5600 = vmatpush1.bf16.msra.mxu0 %v8245_v23  ;;  %5918 = vmatpush1.bf16.msra.mxu1 %v8247_v24  ;;  %v426_v23 = vld [vmem:[#allocation2 + $0x9d0] sm:$0xff]  ;;  %v487_v18 = vld [vmem:[#allocation2 + $0xbb8] sm:$0xff] }
 0x257   :  { %5601 = vmatprep.subr.bf16.mxu0 %v8254_v25  ;;  %5919 = vmatprep.subr.bf16.mxu1 %v8256_v26  ;;  %v430_v24 = vld [vmem:[#allocation2 + $0x9f0] sm:$0xff]  ;;  %v427_v25 = vld [vmem:[#allocation2 + $0x9d8] sm:$0xff] }
 0x258   :  { %v431_v26 = vld [vmem:[#allocation2 + $0x9f8] sm:$0xff]  ;;  %v8318_v29 = vcombine.high %v426_v23, %v430_v24  ;;  %v8317_v35 = vcombine.low %v426_v23, %v430_v24  ;;  %v490_v23 = vld [vmem:[#allocation2 + $0xbd0] sm:$0xff] }
 0x259   :  { %v8320_v30 = vcombine.high %v427_v25, %v431_v26  ;;  %v8319_v36 = vcombine.low %v427_v25, %v431_v26  ;;  %v494_v24 = vld [vmem:[#allocation2 + $0xbf0] sm:$0xff]  ;;  %v491_v25 = vld [vmem:[#allocation2 + $0xbd8] sm:$0xff] }
 0x25a   :  { %5602 = vmatpush1.bf16.msra.mxu0 %v8253_v31  ;;  %5920 = vmatpush1.bf16.msra.mxu1 %v8255_v32  ;;  %v434_v31 = vld [vmem:[#allocation2 + $0xa10] sm:$0xff]  ;;  %v495_v26 = vld [vmem:[#allocation2 + $0xbf8] sm:$0xff] }
 0x25b   :  { %5624 = vmatprep.subr.bf16.mxu0 %v8262_v33  ;;  %5942 = vmatprep.subr.bf16.mxu1 %v8264_v34  ;;  %v438_v32 = vld [vmem:[#allocation2 + $0xa30] sm:$0xff]  ;;  %v435_v33 = vld [vmem:[#allocation2 + $0xa18] sm:$0xff] }
 0x25c   :  { %v439_v34 = vld [vmem:[#allocation2 + $0xa38] sm:$0xff]  ;;  %v8326_v37 = vcombine.high %v434_v31, %v438_v32  ;;  %v8325_v43 = vcombine.low %v434_v31, %v438_v32  ;;  %v498_v31 = vld [vmem:[#allocation2 + $0xc10] sm:$0xff] }
 0x25d   :  { %5604 = vmatmul.mubr.bf16.vlgmr.msra.gmra.mrb[8].mxu0 %v9587_v45  ;;  %5922 = vmatmul.mubr.bf16.vlgmr.msra.gmra.mrb[8].mxu1 %v9587_v45  ;;  %v8328_v38 = vcombine.high %v435_v33, %v439_v34  ;;  %v8327_v44 = vcombine.low %v435_v33, %v439_v34  ;;  %v502_v32 = vld [vmem:[#allocation2 + $0xc30] sm:$0xff]  ;;  %v499_v33 = vld [vmem:[#allocation2 + $0xc18] sm:$0xff] }
 0x25e   :  { %5625 = vmatpush1.bf16.msra.mxu0 %v8261_v39  ;;  %5943 = vmatpush1.bf16.msra.mxu1 %v8263_v40  ;;  %v442_v39 = vld [vmem:[#allocation2 + $0xa50] sm:$0xff]  ;;  %v503_v34 = vld [vmem:[#allocation2 + $0xc38] sm:$0xff] }
 0x25f   :  { %5626 = vmatprep.subr.bf16.mxu0 %v8270_v41  ;;  %5944 = vmatprep.subr.bf16.mxu1 %v8272_v42  ;;  %v446_v40 = vld [vmem:[#allocation2 + $0xa70] sm:$0xff]  ;;  %v443_v41 = vld [vmem:[#allocation2 + $0xa58] sm:$0xff] }
 0x260   :  { %5613 = vmatprep.mubr.bf16.mxu0 %v9588_v54  ;;  %5931 = vmatprep.mubr.bf16.mxu1 %v9588_v54  ;;  %v447_v42 = vld [vmem:[#allocation2 + $0xa78] sm:$0xff]  ;;  %v8334_v45 = vcombine.high %v442_v39, %v446_v40 }
 0x261   :  { %v8336_v46 = vcombine.high %v443_v41, %v447_v42  ;;  %v8335_v52 = vcombine.low %v443_v41, %v447_v42  ;;  %v507_v41 = vld [vmem:[#allocation2 + $0xc58] sm:$0xff] }
 0x262   :  { %5627 = vmatpush1.bf16.msra.mxu0 %v8269_v48  ;;  %5945 = vmatpush1.bf16.msra.mxu1 %v8271_v49  ;;  %v454_v48 = vld [vmem:[#allocation2 + $0xab0] sm:$0xff]  ;;  %v451_v49 = vld [vmem:[#allocation2 + $0xa98] sm:$0xff] }
 0x263   :  { %5628 = vmatprep.subr.bf16.mxu0 %v8278_v50  ;;  %5946 = vmatprep.subr.bf16.mxu1 %v8280_v51  ;;  %v455_v50 = vld [vmem:[#allocation2 + $0xab8] sm:$0xff]  ;;  %v8333_v51 = vcombine.low %v442_v39, %v446_v40  ;;  %v8342_v53 = vcombine.high %v450_v47, %v454_v48  ;;  %v506_v39 = vld [vmem:[#allocation2 + $0xc50] sm:$0xff] }
 0x264   :  { %v8344_v54 = vcombine.high %v451_v49, %v455_v50  ;;  %v510_v40 = vld [vmem:[#allocation2 + $0xc70] sm:$0xff]  ;;  %v511_v42 = vld [vmem:[#allocation2 + $0xc78] sm:$0xff] }
 0x265   :  { %5614 = vmatmul.mubr.bf16.gmra.mrb[12].mxu0 %v9589_v1  ;;  %5932 = vmatmul.mubr.bf16.gmra.mrb[12].mxu1 %v9589_v1  ;;  %v467_v1 = vld [vmem:[#allocation2 + $0xb18] sm:$0xff] }
 0x266   :  { %5629 = vmatpush1.bf16.msra.mxu0 %v8277_v57  ;;  %5947 = vmatpush1.bf16.msra.mxu1 %v8279_v58  ;;  %v459_v57 = vld [vmem:[#allocation2 + $0xad8] sm:$0xff] }
 0x267   :  { %5630 = vmatprep.subr.bf16.mxu0 %v8286_v59  ;;  %5948 = vmatprep.subr.bf16.mxu1 %v8288_v60  ;;  %v463_v58 = vld [vmem:[#allocation2 + $0xaf8] sm:$0xff]  ;;  %v8341_v59 = vcombine.low %v450_v47, %v454_v48  ;;  %v8343_v60 = vcombine.low %v451_v49, %v455_v50  ;;  %v514_v47 = vld [vmem:[#allocation2 + $0xc90] sm:$0xff] }
 0x268   :  { %5656 = vmatprep.mubr.bf16.mxu0 %v9590_v8  ;;  %5974 = vmatprep.mubr.bf16.mxu1 %v9590_v8  ;;  %v8352_v62 = vcombine.high %v459_v57, %v463_v58  ;;  %v478_v8 = vld [vmem:[#allocation2 + $0xb70] sm:$0xff]  ;;  %v515_v50 = vld [vmem:[#allocation2 + $0xc98] sm:$0xff] }
 0x269   :  { %v518_v48 = vld [vmem:[#allocation2 + $0xcb0] sm:$0xff] }
 0x26a   :  { %5631 = vmatpush1.bf16.msra.mxu0 %v8285_v2  ;;  %5949 = vmatpush1.bf16.msra.mxu1 %v8287_v3  ;;  %v471_v2 = vld [vmem:[#allocation2 + $0xb38] sm:$0xff]  ;;  %v8349_v3 = vcombine.low %v458_v55, %v462_v56  ;;  %v9591_v49 = vld [vmem:[%s10179_s0 + $0x10] ss:$48 sps:$4 sm:$0xff]  }
 0x26b   :  { %5632 = vmatprep.subr.bf16.mxu0 %v8294_v4  ;;  %5950 = vmatprep.subr.bf16.mxu1 %v8296_v5  ;;  %v8351_v4 = vcombine.low %v459_v57, %v463_v58  ;;  %v8358_v5 = vcombine.high %v466_v63, %v470_v0  ;;  %v8360_v6 = vcombine.high %v467_v1, %v471_v2  ;;  %v522_v56 = vld [vmem:[#allocation2 + $0xcd0] sm:$0xff] }
 0x26c   :  { %v526_v57 = vld [vmem:[#allocation2 + $0xcf0] sm:$0xff] }
 0x26d   :  { %v9592_v58 = vld [vmem:[%s10179_s0 + $0x74] ss:$48 sps:$4 sm:$0xff]  }
 0x26e   :  { %5633 = vmatpush1.bf16.msra.mxu0 %v8293_v11  ;;  %5951 = vmatpush1.bf16.msra.mxu1 %v8295_v12  ;;  %v8357_v11 = vcombine.low %v466_v63, %v470_v0  ;;  %v8359_v12 = vcombine.low %v467_v1, %v471_v2  ;;  %v8414_v0 = vcombine.high %v522_v56, %v526_v57  ;;  %v530_v2 = vld [vmem:[#allocation2 + $0xd10] sm:$0xff] }
 0x26f   :  { %5634 = vmatprep.subr.bf16.mxu0 %v8302_v13  ;;  %5952 = vmatprep.subr.bf16.mxu1 %v8304_v14  ;;  %v8366_v13 = vcombine.high %v474_v7, %v478_v8  ;;  %v8368_v14 = vcombine.high %v475_v9, %v479_v10 }
 0x272   :  { %5635 = vmatpush1.bf16.msra.mxu0 %v8301_v19  ;;  %5953 = vmatpush1.bf16.msra.mxu1 %v8303_v20  ;;  %v8365_v19 = vcombine.low %v474_v7, %v478_v8  ;;  %v8367_v20 = vcombine.low %v475_v9, %v479_v10  ;;  %v9593_v7 = vld [vmem:[%s10179_s0 + $0x70] ss:$48 sps:$4 sm:$0xff]   ;;  %v8413_v8 = vcombine.low %v522_v56, %v526_v57 }
 0x273   :  { %5636 = vmatprep.subr.bf16.mxu0 %v8310_v21  ;;  %5954 = vmatprep.subr.bf16.mxu1 %v8312_v22  ;;  %v8374_v21 = vcombine.high %v482_v15, %v486_v16  ;;  %v8376_v22 = vcombine.high %v483_v17, %v487_v18 }
 0x276   :  { %5637 = vmatpush1.bf16.msra.mxu0 %v8309_v27  ;;  %5955 = vmatpush1.bf16.msra.mxu1 %v8311_v28  ;;  %v8373_v27 = vcombine.low %v482_v15, %v486_v16  ;;  %v8375_v28 = vcombine.low %v483_v17, %v487_v18  ;;  %v539_v16 = vld [vmem:[#allocation2 + $0xd58] sm:$0xff] }
 0x277   :  { %5638 = vmatprep.subr.bf16.mxu0 %v8318_v29  ;;  %5956 = vmatprep.subr.bf16.mxu1 %v8320_v30  ;;  %v8382_v29 = vcombine.high %v490_v23, %v494_v24  ;;  %v8384_v30 = vcombine.high %v491_v25, %v495_v26  ;;  %v543_v17 = vld [vmem:[#allocation2 + $0xd78] sm:$0xff] }
 0x27a   :  { %5639 = vmatpush1.bf16.msra.mxu0 %v8317_v35  ;;  %5957 = vmatpush1.bf16.msra.mxu1 %v8319_v36  ;;  %v8381_v35 = vcombine.low %v490_v23, %v494_v24  ;;  %v8383_v36 = vcombine.low %v491_v25, %v495_v26  ;;  %v8432_v25 = vcombine.high %v539_v16, %v543_v17  ;;  %v546_v26 = vld [vmem:[#allocation2 + $0xd90] sm:$0xff] }
 0x27b   :  { %5640 = vmatprep.subr.bf16.mxu0 %v8326_v37  ;;  %5958 = vmatprep.subr.bf16.mxu1 %v8328_v38  ;;  %v8390_v37 = vcombine.high %v498_v31, %v502_v32  ;;  %v8392_v38 = vcombine.high %v499_v33, %v503_v34 }
 0x27e   :  { %5641 = vmatpush1.bf16.msra.mxu0 %v8325_v43  ;;  %5959 = vmatpush1.bf16.msra.mxu1 %v8327_v44  ;;  %v8389_v43 = vcombine.low %v498_v31, %v502_v32  ;;  %v8391_v44 = vcombine.low %v499_v33, %v503_v34 }
 0x27f   :  { %5642 = vmatprep.subr.bf16.mxu0 %v8334_v45  ;;  %5960 = vmatprep.subr.bf16.mxu1 %v8336_v46  ;;  %v8398_v45 = vcombine.high %v506_v39, %v510_v40  ;;  %v8400_v46 = vcombine.high %v507_v41, %v511_v42 }
 0x282   :  { %5643 = vmatpush1.bf16.msra.mxu0 %v8333_v51  ;;  %5961 = vmatpush1.bf16.msra.mxu1 %v8335_v52  ;;  %v519_v51 = vld [vmem:[#allocation2 + $0xcb8] sm:$0xff]  ;;  %v8397_v52 = vcombine.low %v506_v39, %v510_v40  ;;  %v9966_v39 = vld [vmem:[#allocation2 + $0xdd0] sm:$0xff] }
 0x283   :  { %5644 = vmatprep.subr.bf16.mxu0 %v8342_v53  ;;  %5962 = vmatprep.subr.bf16.mxu1 %v8344_v54  ;;  %v8399_v53 = vcombine.low %v507_v41, %v511_v42  ;;  %v8406_v54 = vcombine.high %v514_v47, %v518_v48  ;;  %v8408_v55 = vcombine.high %v515_v50, %v519_v51  ;;  %v558_v40 = vld [vmem:[#allocation2 + $0xdf0] sm:$0xff] }
 0x284   :  { %v8407_v63 = vcombine.low %v515_v50, %v519_v51  ;;  %v8446_v56 = vcombine.high %v9966_v39, %v558_v40 }
 0x286   :  { %5645 = vmatpush1.bf16.msra.mxu0 %v8341_v59  ;;  %5963 = vmatpush1.bf16.msra.mxu1 %v8343_v60  ;;  %v523_v59 = vld [vmem:[#allocation2 + $0xcd8] sm:$0xff] }
 0x287   :  { %5646 = vmatprep.subr.bf16.mxu0 %v8350_v61  ;;  %5964 = vmatprep.subr.bf16.mxu1 %v8352_v62  ;;  %v527_v60 = vld [vmem:[#allocation2 + $0xcf8] sm:$0xff]  ;;  %v882_v61 = vlaneseq  ;;  %v8405_v62 = vcombine.low %v514_v47, %v518_v48 }
 0x288   :  { %v8416_v1 = vcombine.high %v523_v59, %v527_v60  ;;  %v8415_v9 = vcombine.low %v523_v59, %v527_v60  ;;  %v8445_v60 = vcombine.low %v9966_v39, %v558_v40 }
 0x28a   :  { %5647 = vmatpush1.bf16.msra.mxu0 %v8349_v3  ;;  %5965 = vmatpush1.bf16.msra.mxu1 %v8351_v4  ;;  %v534_v3 = vld [vmem:[#allocation2 + $0xd30] sm:$0xff]  ;;  %v531_v4 = vld [vmem:[#allocation2 + $0xd18] sm:$0xff] }
 0x28b   :  { %5648 = vmatprep.subr.bf16.mxu0 %v8358_v5  ;;  %5966 = vmatprep.subr.bf16.mxu1 %v8360_v6  ;;  %v535_v5 = vld [vmem:[#allocation2 + $0xd38] sm:$0xff]  ;;  %v9938_v6 = vshrl.u32 %v882_v61, 7  ;;  %v8422_v10 = vcombine.high %v530_v2, %v534_v3  ;;  %v8421_v18 = vcombine.low %v530_v2, %v534_v3 }
 0x28d   :  { %v884_v15 = vsub.s32 0, %v9938_v6  ;;  %v896_v23 = vsub.s32 3, %v9938_v6 }
 0x28e   :  { %5649 = vmatpush1.bf16.msra.mxu0 %v8357_v11  ;;  %5967 = vmatpush1.bf16.msra.mxu1 %v8359_v12  ;;  %v8424_v11 = vcombine.high %v531_v4, %v535_v5  ;;  %v538_v12 = vld [vmem:[#allocation2 + $0xd50] sm:$0xff] }
 0x28f   :  { %5650 = vmatprep.subr.bf16.mxu0 %v8366_v13  ;;  %5968 = vmatprep.subr.bf16.mxu1 %v8368_v14  ;;  %v542_v13 = vld [vmem:[#allocation2 + $0xd70] sm:$0xff]  ;;  %v9594_v14 = vld [vmem:[%s10179_s0 + $0x1c] ss:$48 sps:$4 sm:$0xff]  }
 0x290   :  { %v8430_v24 = vcombine.high %v538_v12, %v542_v13  ;;  %v8429_v33 = vcombine.low %v538_v12, %v542_v13 }
 0x292   :  { %5651 = vmatpush1.bf16.msra.mxu0 %v8365_v19  ;;  %5969 = vmatpush1.bf16.msra.mxu1 %v8367_v20  ;;  %v880_v19 = vld [vmem:[#allocation4] sm:$0xff]  ;;  %v892_v20 = vsub.s32 2, %v9938_v6 }
 0x293   :  { %5652 = vmatprep.subr.bf16.mxu0 %v8374_v21  ;;  %5970 = vmatprep.subr.bf16.mxu1 %v8376_v22  ;;  %v888_v21 = vsub.s32 1, %v9938_v6  ;;  %v8423_v22 = vcombine.low %v531_v4, %v535_v5  ;;  %v9964_v34 = vrot.slane %v880_v19, %v896_v23  ;;  %v563_v4 = vld [vmem:[#allocation2 + $0xe18] sm:$0xff] }
 0x294   :  { %v9956_v31 = vrot.slane %v880_v19, %v892_v20  ;;  %v567_v5 = vld [vmem:[#allocation2 + $0xe38] sm:$0xff] }
 0x295   :  { %v9960_v32 = vrot.slane %v880_v19, %v888_v21  ;;  %v8455_v40 = vcombine.low %v563_v4, %v567_v5 }
 0x296   :  { %5653 = vmatpush1.bf16.msra.mxu0 %v8373_v27  ;;  %5971 = vmatpush1.bf16.msra.mxu1 %v8375_v28  ;;  %v550_v27 = vld [vmem:[#allocation2 + $0xdb0] sm:$0xff]  ;;  %v9952_v28 = vrot.slane %v880_v19, %v884_v15  ;;  %v8456_v19 = vcombine.high %v563_v4, %v567_v5  ;;  %v587_v5 = vld [vmem:[#allocation2 + $0xed8] sm:$0xff] }
 0x297   :  { %5654 = vmatprep.subr.bf16.mxu0 %v8382_v29  ;;  %5972 = vmatprep.subr.bf16.mxu1 %v8384_v30  ;;  %v547_v29 = vld [vmem:[#allocation2 + $0xd98] sm:$0xff]  ;;  %v8437_v50 = vcombine.low %v546_v26, %v550_v27 }
 0x298   :  { %v551_v30 = vld [vmem:[#allocation2 + $0xdb8] sm:$0xff] }
 0x299   :  { %v8439_v51 = vcombine.low %v547_v29, %v551_v30 }
 0x29a   :  { %5655 = vmatpush1.bf16.msra.mxu0 %v8381_v35  ;;  %5973 = vmatpush1.bf16.msra.mxu1 %v8383_v36  ;;  %v8431_v35 = vcombine.low %v539_v16, %v543_v17  ;;  %v8438_v36 = vcombine.high %v546_v26, %v550_v27 }
 0x29b   :  { %5677 = vmatprep.subr.bf16.mxu0 %v8390_v37  ;;  %5995 = vmatprep.subr.bf16.mxu1 %v8392_v38  ;;  %v8440_v38 = vcombine.high %v547_v29, %v551_v30  ;;  %v571_v30 = vld [vmem:[#allocation2 + $0xe58] sm:$0xff] }
 0x29d   :  { %5657 = vmatmul.mubr.bf16.vlgmr.msra.gmra.mrb[8].mxu0 %v9591_v49  ;;  %5975 = vmatmul.mubr.bf16.vlgmr.msra.gmra.mrb[8].mxu1 %v9591_v49 }
 0x29e   :  { %5678 = vmatpush1.bf16.msra.mxu0 %v8389_v43  ;;  %5996 = vmatpush1.bf16.msra.mxu1 %v8391_v44  ;;  %v9969_v44 = vld [vmem:[#allocation2 + $0xdd8] sm:$0xff] }
 0x29f   :  { %5679 = vmatprep.subr.bf16.mxu0 %v8398_v45  ;;  %5997 = vmatprep.subr.bf16.mxu1 %v8400_v46  ;;  %v9971_v45 = vld [vmem:[#allocation2 + $0xdf8] sm:$0xff] }
 0x2a0   :  { %5666 = vmatprep.mubr.bf16.mxu0 %v9592_v58  ;;  %5984 = vmatprep.mubr.bf16.mxu1 %v9592_v58  ;;  %v8448_v61 = vcombine.high %v9969_v44, %v9971_v45  ;;  %v8447_v3 = vcombine.low %v9969_v44, %v9971_v45 }
 0x2a2   :  { %5680 = vmatpush1.bf16.msra.mxu0 %v8397_v52  ;;  %5998 = vmatpush1.bf16.msra.mxu1 %v8399_v53 }
 0x2a3   :  { %5681 = vmatprep.subr.bf16.mxu0 %v8406_v54  ;;  %5999 = vmatprep.subr.bf16.mxu1 %v8408_v55 }
 0x2a5   :  { %5667 = vmatmul.mubr.bf16.gmra.mrb[12].mxu0 %v9593_v7  ;;  %5985 = vmatmul.mubr.bf16.gmra.mrb[12].mxu1 %v9593_v7 }
 0x2a6   :  { %5682 = vmatpush1.bf16.msra.mxu0 %v8405_v62  ;;  %6000 = vmatpush1.bf16.msra.mxu1 %v8407_v63  ;;  %v9983_v62 = vld [vmem:[#allocation2 + $0xe10] sm:$0xff] }
 0x2a7   :  { %5683 = vmatprep.subr.bf16.mxu0 %v8414_v0  ;;  %6001 = vmatprep.subr.bf16.mxu1 %v8416_v1  ;;  %v9985_v63 = vld [vmem:[#allocation2 + $0xe30] sm:$0xff] }
 0x2a8   :  { %5709 = vmatprep.mubr.bf16.mxu0 %v9594_v14  ;;  %6027 = vmatprep.mubr.bf16.mxu1 %v9594_v14  ;;  %v8454_v14 = vcombine.high %v9983_v62, %v9985_v63  ;;  %v8453_v39 = vcombine.low %v9983_v62, %v9985_v63 }
 0x2aa   :  { %5684 = vmatpush1.bf16.msra.mxu0 %v8413_v8  ;;  %6002 = vmatpush1.bf16.msra.mxu1 %v8415_v9 }
 0x2ab   :  { %5685 = vmatprep.subr.bf16.mxu0 %v8422_v10  ;;  %6003 = vmatprep.subr.bf16.mxu1 %v8424_v11 }
 0x2ae   :  { %5686 = vmatpush1.bf16.msra.mxu0 %v8421_v18  ;;  %6004 = vmatpush1.bf16.msra.mxu1 %v8423_v22  ;;  %v570_v22 = vld [vmem:[#allocation2 + $0xe50] sm:$0xff] }
 0x2af   :  { %5687 = vmatprep.subr.bf16.mxu0 %v8430_v24  ;;  %6005 = vmatprep.subr.bf16.mxu1 %v8432_v25  ;;  %v574_v24 = vld [vmem:[#allocation2 + $0xe70] sm:$0xff] }
 0x2b0   :  { %v5181_v37 = vpop.f32.mrb[0].mxu0  ;;  %v5499_v42 = vpop.f32.mrb[0].mxu1  ;;  %v8462_v45 = vcombine.high %v570_v22, %v574_v24 }
 0x2b1   :  { %v9073_v41 = vadd.f32 %v5181_v37, %v9952_v28  ;;  %v5183_v43 = vpop.f32.mrb[1].mxu0  ;;  %v9081_v46 = vadd.f32 %v5499_v42, %v9956_v31  ;;  %v5501_v48 = vpop.f32.mrb[1].mxu1 }
 0x2b2   :  { %v9074_v47 = vadd.f32 %v5183_v43, %v9960_v32  ;;  %v5185_v49 = vpop.f32.mrb[2].mxu0  ;;  %5688 = vmatpush1.bf16.msra.mxu0 %v8429_v33  ;;  %v9082_v52 = vadd.f32 %v5501_v48, %v9964_v34  ;;  %v5503_v54 = vpop.f32.mrb[2].mxu1  ;;  %6006 = vmatpush1.bf16.msra.mxu1 %v8431_v35  ;;  %v575_v33 = vld [vmem:[#allocation2 + $0xe78] sm:$0xff] }
 0x2b3   :  { %v9075_v53 = vadd.f32 %v5185_v49, %v9952_v28  ;;  %v5187_v55 = vpop.f32.mrb[3].mxu0  ;;  %5689 = vmatprep.subr.bf16.mxu0 %v8438_v36  ;;  %v9083_v57 = vadd.f32 %v5503_v54, %v9956_v31  ;;  %v5505_v59 = vpop.f32.mrb[3].mxu1  ;;  %6007 = vmatprep.subr.bf16.mxu1 %v8440_v38  ;;  %v6154_v0 = vmax.f32 %v9073_v41, 0.0  ;;  %v6156_v7 = vmax.f32 %v9081_v46, 0.0 }
 0x2b4   :  { %v9076_v58 = vadd.f32 %v5187_v55, %v9960_v32  ;;  %v9084_v2 = vadd.f32 %v5505_v59, %v9964_v34  ;;  %v6155_v8 = vmax.f32 %v9074_v47, 0.0  ;;  %v6157_v11 = vmax.f32 %v9082_v52, 0.0  ;;  %v582_v52 = vld [vmem:[#allocation2 + $0xeb0] sm:$0xff] }
 0x2b5   :  { %v6162_v1 = vmax.f32 %v9075_v53, 0.0  ;;  %v6164_v9 = vmax.f32 %v9083_v57, 0.0  ;;  %v8461_v49 = vcombine.low %v570_v22, %v574_v24  ;;  %v583_v57 = vld [vmem:[#allocation2 + $0xeb8] sm:$0xff] }
 0x2b6   :  { %v6163_v10 = vmax.f32 %v9076_v58, 0.0  ;;  %5690 = vmatpush1.bf16.msra.mxu0 %v8437_v50  ;;  %v6165_v13 = vmax.f32 %v9084_v2, 0.0  ;;  %6008 = vmatpush1.bf16.msra.mxu1 %v8439_v51  ;;  %v8464_v50 = vcombine.high %v571_v30, %v575_v33  ;;  %v578_v51 = vld [vmem:[#allocation2 + $0xe90] sm:$0xff] }
 0x2b7   :  { %v9990_v12 = vpack.c.bf16 %v6162_v1, %v6154_v0  ;;  %5691 = vmatprep.subr.bf16.mxu0 %v8446_v56  ;;  %v9994_v16 = vpack.c.bf16 %v6164_v9, %v6156_v7  ;;  %6009 = vmatprep.subr.bf16.mxu1 %v8448_v61  ;;  %v579_v56 = vld [vmem:[#allocation2 + $0xe98] sm:$0xff]  ;;  %v8470_v63 = vcombine.high %v578_v51, %v582_v52  ;;  %v586_v2 = vld [vmem:[#allocation2 + $0xed0] sm:$0xff] }
 0x2b8   :  { %v9996_v17 = vpack.c.bf16 %v6163_v10, %v6155_v8  ;;  %v5191_v18 = vpop.f32.mrb[4].mxu0  ;;  %v9998_v25 = vpack.c.bf16 %v6165_v13, %v6157_v11  ;;  %v5509_v27 = vpop.f32.mrb[4].mxu1  ;;  %v591_v7 = vld [vmem:[#allocation2 + $0xef8] sm:$0xff]  ;;  %v8469_v8 = vcombine.low %v578_v51, %v582_v52  ;;  %v8471_v9 = vcombine.low %v579_v56, %v583_v57  ;;  %v594_v13 = vld [vmem:[#allocation2 + $0xf10] sm:$0xff] }
 0x2b9   :  { %v9077_v26 = vadd.f32 %v5191_v18, %v9952_v28  ;;  %v5193_v29 = vpop.f32.mrb[5].mxu0  ;;  %v9085_v35 = vadd.f32 %v5509_v27, %v9956_v31  ;;  %v5511_v37 = vpop.f32.mrb[5].mxu1  ;;  %v8480_v11 = vcombine.high %v587_v5, %v591_v7  ;;  %v595_v18 = vld [vmem:[#allocation2 + $0xf18] sm:$0xff]  ;;  %v8479_v24 = vcombine.low %v587_v5, %v591_v7 }
 0x2ba   :  { %v9078_v36 = vadd.f32 %v5193_v29, %v9960_v32  ;;  %v5195_v38 = vpop.f32.mrb[6].mxu0  ;;  %5692 = vmatpush1.bf16.msra.mxu0 %v8445_v60  ;;  %v9086_v41 = vadd.f32 %v5511_v37, %v9964_v34  ;;  %v5513_v43 = vpop.f32.mrb[6].mxu1  ;;  %6010 = vmatpush1.bf16.msra.mxu1 %v8447_v3  ;;  %v590_v3 = vld [vmem:[#allocation2 + $0xef0] sm:$0xff]  ;;  %v623_v51 = vld [vmem:[#allocation2 + $0xff8] sm:$0xff] }
 0x2bb   :  { %v9079_v42 = vadd.f32 %v5195_v38, %v9952_v28  ;;  %v5197_v44 = vpop.f32.mrb[7].mxu0  ;;  %5693 = vmatprep.subr.bf16.mxu0 %v8454_v14  ;;  %v9087_v46 = vadd.f32 %v5513_v43, %v9956_v31  ;;  %v5515_v48 = vpop.f32.mrb[7].mxu1  ;;  %6011 = vmatprep.subr.bf16.mxu1 %v8456_v19  ;;  %v6170_v53 = vmax.f32 %v9077_v26, 0.0  ;;  %v8463_v28 = vcombine.low %v571_v30, %v575_v33  ;;  %v598_v14 = vld [vmem:[#allocation2 + $0xf30] sm:$0xff]  ;;  %v599_v19 = vld [vmem:[#allocation2 + $0xf38] sm:$0xff] }
 0x2bc   :  { %v9080_v47 = vadd.f32 %v5197_v44, %v9960_v32  ;;  %v9088_v55 = vadd.f32 %v5515_v48, %v9964_v34  ;;  %v6172_v58 = vmax.f32 %v9085_v35, 0.0  ;;  %v6171_v59 = vmax.f32 %v9078_v36, 0.0  ;;  %v602_v29 = vld [vmem:[#allocation2 + $0xf50] sm:$0xff]  ;;  %v603_v33 = vld [vmem:[#allocation2 + $0xf58] sm:$0xff] }
 0x2bd   :  { %v6178_v54 = vmax.f32 %v9079_v42, 0.0  ;;  %v6180_v60 = vmax.f32 %v9087_v46, 0.0  ;;  %v6173_v31 = vmax.f32 %v9086_v41, 0.0  ;;  %v8472_v34 = vcombine.high %v579_v56, %v583_v57  ;;  %v606_v30 = vld [vmem:[#allocation2 + $0xf70] sm:$0xff]  ;;  %v607_v35 = vld [vmem:[#allocation2 + $0xf78] sm:$0xff] }
 0x2be   :  { %v6179_v61 = vmax.f32 %v9080_v47, 0.0  ;;  %5694 = vmatpush1.bf16.msra.mxu0 %v8453_v39  ;;  %v6181_v62 = vmax.f32 %v9088_v55, 0.0  ;;  %6012 = vmatpush1.bf16.msra.mxu1 %v8455_v40  ;;  %v8478_v10 = vcombine.high %v586_v2, %v590_v3  ;;  %v8477_v22 = vcombine.low %v586_v2, %v590_v3  ;;  %v610_v40 = vld [vmem:[#allocation2 + $0xf90] sm:$0xff]  ;;  %v611_v42 = vld [vmem:[#allocation2 + $0xf98] sm:$0xff] }
 0x2bf   :  { %v10010_v32 = vpack.c.bf16 %v6178_v54, %v6170_v53  ;;  %5695 = vmatprep.subr.bf16.mxu0 %v8462_v45  ;;  %v10012_v0 = vpack.c.bf16 %v6180_v60, %v6172_v58  ;;  %6013 = vmatprep.subr.bf16.mxu1 %v8464_v50  ;;  %v8486_v26 = vcombine.high %v594_v13, %v598_v14  ;;  %v614_v41 = vld [vmem:[#allocation2 + $0xfb0] sm:$0xff]  ;;  %v615_v43 = vld [vmem:[#allocation2 + $0xfb8] sm:$0xff] }
 0x2c0   :  { %v10014_v1 = vpack.c.bf16 %v6179_v61, %v6171_v59  ;;  %v10016_v4 = vpack.c.bf16 %v6181_v62, %v6173_v31  ;;  %v8488_v27 = vcombine.high %v595_v18, %v599_v19  ;;  %v8485_v36 = vcombine.low %v594_v13, %v598_v14  ;;  %v618_v48 = vld [vmem:[#allocation2 + $0xfd0] sm:$0xff]  ;;  %v619_v50 = vld [vmem:[#allocation2 + $0xfd8] sm:$0xff] }
 0x2c1   :  { %v8487_v37 = vcombine.low %v595_v18, %v599_v19  ;;  %v8494_v38 = vcombine.high %v602_v29, %v606_v30  ;;  %v8496_v39 = vcombine.high %v603_v33, %v607_v35  ;;  %v8493_v44 = vcombine.low %v602_v29, %v606_v30  ;;  %v630_v56 = vld [vmem:[#allocation2 + $0x1030] sm:$0xff]  ;;  %v627_v57 = vld [vmem:[#allocation2 + $0x1018] sm:$0xff] }
 0x2c2   :  { %5696 = vmatpush1.bf16.msra.mxu0 %v8461_v49  ;;  %6014 = vmatpush1.bf16.msra.mxu1 %v8463_v28  ;;  %v8495_v45 = vcombine.low %v603_v33, %v607_v35  ;;  %v8502_v46 = vcombine.high %v610_v40, %v614_v41  ;;  %v8504_v47 = vcombine.high %v611_v42, %v615_v43  ;;  %v622_v49 = vld [vmem:[#allocation2 + $0xff0] sm:$0xff]  ;;  %v631_v58 = vld [vmem:[#allocation2 + $0x1038] sm:$0xff] }
 0x2c3   :  { %5697 = vmatprep.subr.bf16.mxu0 %v8470_v63  ;;  %6015 = vmatprep.subr.bf16.mxu1 %v8472_v34  ;;  %v8501_v52 = vcombine.low %v610_v40, %v614_v41  ;;  %v8503_v53 = vcombine.low %v611_v42, %v615_v43  ;;  %v8510_v54 = vcombine.high %v618_v48, %v622_v49  ;;  %v626_v28 = vld [vmem:[#allocation2 + $0x1010] sm:$0xff]  ;;  %v635_v34 = vld [vmem:[#allocation2 + $0x1058] sm:$0xff] }
 0x2c4   :  { %v8512_v55 = vcombine.high %v619_v50, %v623_v51  ;;  %v8509_v59 = vcombine.low %v618_v48, %v622_v49  ;;  %v8511_v60 = vcombine.low %v619_v50, %v623_v51  ;;  %v8518_v61 = vcombine.high %v626_v28, %v630_v56  ;;  %v634_v62 = vld [vmem:[#allocation2 + $0x1050] sm:$0xff]  ;;  %v639_v2 = vld [vmem:[#allocation2 + $0x1078] sm:$0xff] }
 0x2c5   :  { %v8520_v31 = vcombine.high %v627_v57, %v631_v58  ;;  %v638_v63 = vld [vmem:[#allocation2 + $0x1070] sm:$0xff]  ;;  %v8517_v3 = vcombine.low %v626_v28, %v630_v56  ;;  %v8519_v5 = vcombine.low %v627_v57, %v631_v58  ;;  %v643_v13 = vld [vmem:[#allocation2 + $0x1098] sm:$0xff]  ;;  %v8527_v19 = vcombine.low %v635_v34, %v639_v2 }
 0x2c6   :  { %5698 = vmatpush1.bf16.msra.mxu0 %v8469_v8  ;;  %6016 = vmatpush1.bf16.msra.mxu1 %v8471_v9  ;;  %v8526_v7 = vcombine.high %v634_v62, %v638_v63  ;;  %v8528_v8 = vcombine.high %v635_v34, %v639_v2  ;;  %v642_v9 = vld [vmem:[#allocation2 + $0x1090] sm:$0xff]  ;;  %v647_v14 = vld [vmem:[#allocation2 + $0x10b8] sm:$0xff]  ;;  %v8525_v18 = vcombine.low %v634_v62, %v638_v63 }
 0x2c7   :  { %5699 = vmatprep.subr.bf16.mxu0 %v8478_v10  ;;  %6017 = vmatprep.subr.bf16.mxu1 %v8480_v11  ;;  %v646_v10 = vld [vmem:[#allocation2 + $0x10b0] sm:$0xff]  ;;  %v9595_v11 = vld [vmem:[%s10179_s0 + $0x18] ss:$48 sps:$4 sm:$0xff]   ;;  %v9596_v29 = vld [vmem:[%s10179_s0 + $0x7c] ss:$48 sps:$4 sm:$0xff]  }
 0x2c8   :  { %v651_v30 = vld [vmem:[#allocation2 + $0x10d8] sm:$0xff]  ;;  %v8533_v35 = vcombine.low %v642_v9, %v646_v10  ;;  %v662_v40 = vld [vmem:[#allocation2 + $0x1130] sm:$0xff] }
 0x2c9   :  { %v655_v33 = vld [vmem:[#allocation2 + $0x10f8] sm:$0xff]  ;;  %v666_v48 = vld [vmem:[#allocation2 + $0x1150] sm:$0xff] }
 0x2ca   :  { %5700 = vmatpush1.bf16.msra.mxu0 %v8477_v22  ;;  %6018 = vmatpush1.bf16.msra.mxu1 %v8479_v24  ;;  %v8534_v22 = vcombine.high %v642_v9, %v646_v10  ;;  %v8536_v24 = vcombine.high %v643_v13, %v647_v14  ;;  %v659_v41 = vld [vmem:[#allocation2 + $0x1118] sm:$0xff]  ;;  %v670_v49 = vld [vmem:[#allocation2 + $0x1170] sm:$0xff] }
 0x2cb   :  { %5701 = vmatprep.subr.bf16.mxu0 %v8486_v26  ;;  %6019 = vmatprep.subr.bf16.mxu1 %v8488_v27  ;;  %v650_v26 = vld [vmem:[#allocation2 + $0x10d0] sm:$0xff]  ;;  %v663_v42 = vld [vmem:[#allocation2 + $0x1138] sm:$0xff] }
 0x2cc   :  { %v654_v27 = vld [vmem:[#allocation2 + $0x10f0] sm:$0xff]  ;;  %v9597_v43 = vld [vmem:[%s10179_s0 + $0x78] ss:$48 sps:$4 sm:$0xff]  }
 0x2cd   :  { %v9598_v50 = vld [vmem:[%s10179_s0 + $0x24] ss:$48 sps:$4 sm:$0xff]   ;;  %v667_v51 = vld [vmem:[#allocation2 + $0x1158] sm:$0xff] }
 0x2ce   :  { %5702 = vmatpush1.bf16.msra.mxu0 %v8485_v36  ;;  %6020 = vmatpush1.bf16.msra.mxu1 %v8487_v37  ;;  %v8535_v36 = vcombine.low %v643_v13, %v647_v14  ;;  %v8542_v37 = vcombine.high %v650_v26, %v654_v27  ;;  %v674_v56 = vld [vmem:[#allocation2 + $0x1190] sm:$0xff]  ;;  %v675_v58 = vld [vmem:[#allocation2 + $0x1198] sm:$0xff] }
 0x2cf   :  { %5703 = vmatprep.subr.bf16.mxu0 %v8494_v38  ;;  %6021 = vmatprep.subr.bf16.mxu1 %v8496_v39  ;;  %v8544_v38 = vcombine.high %v651_v30, %v655_v33  ;;  %v658_v39 = vld [vmem:[#allocation2 + $0x1110] sm:$0xff]  ;;  %v683_v2 = vld [vmem:[#allocation2 + $0x11d8] sm:$0xff] }
 0x2d0   :  { %v678_v57 = vld [vmem:[#allocation2 + $0x11b0] sm:$0xff]  ;;  %v691_v13 = vld [vmem:[#allocation2 + $0x1218] sm:$0xff] }
 0x2d1   :  { %v682_v63 = vld [vmem:[#allocation2 + $0x11d0] sm:$0xff]  ;;  %v695_v14 = vld [vmem:[#allocation2 + $0x1238] sm:$0xff] }
 0x2d2   :  { %5704 = vmatpush1.bf16.msra.mxu0 %v8493_v44  ;;  %6022 = vmatpush1.bf16.msra.mxu1 %v8495_v45  ;;  %v8541_v44 = vcombine.low %v650_v26, %v654_v27  ;;  %v8543_v45 = vcombine.low %v651_v30, %v655_v33  ;;  %v686_v34 = vld [vmem:[#allocation2 + $0x11f0] sm:$0xff]  ;;  %v703_v30 = vld [vmem:[#allocation2 + $0x1278] sm:$0xff] }
 0x2d3   :  { %5705 = vmatprep.subr.bf16.mxu0 %v8502_v46  ;;  %6023 = vmatprep.subr.bf16.mxu1 %v8504_v47  ;;  %v8550_v46 = vcombine.high %v658_v39, %v662_v40  ;;  %v8552_v47 = vcombine.high %v659_v41, %v663_v42  ;;  %v690_v10 = vld [vmem:[#allocation2 + $0x1210] sm:$0xff] }
 0x2d4   :  { %v698_v26 = vld [vmem:[#allocation2 + $0x1250] sm:$0xff] }
 0x2d5   :  { %v702_v27 = vld [vmem:[#allocation2 + $0x1270] sm:$0xff] }
 0x2d6   :  { %5706 = vmatpush1.bf16.msra.mxu0 %v8501_v52  ;;  %6024 = vmatpush1.bf16.msra.mxu1 %v8503_v53  ;;  %v671_v52 = vld [vmem:[#allocation2 + $0x1178] sm:$0xff]  ;;  %v8549_v53 = vcombine.low %v658_v39, %v662_v40  ;;  %v710_v39 = vld [vmem:[#allocation2 + $0x12b0] sm:$0xff] }
 0x2d7   :  { %5707 = vmatprep.subr.bf16.mxu0 %v8510_v54  ;;  %6025 = vmatprep.subr.bf16.mxu1 %v8512_v55  ;;  %v8551_v54 = vcombine.low %v659_v41, %v663_v42  ;;  %v8558_v55 = vcombine.high %v666_v48, %v670_v49  ;;  %v8560_v28 = vcombine.high %v667_v51, %v671_v52  ;;  %v707_v40 = vld [vmem:[#allocation2 + $0x1298] sm:$0xff] }
 0x2d8   :  { %v711_v41 = vld [vmem:[#allocation2 + $0x12b8] sm:$0xff]  ;;  %v8589_v42 = vcombine.low %v698_v26, %v702_v27 }
 0x2da   :  { %5708 = vmatpush1.bf16.msra.mxu0 %v8509_v59  ;;  %6026 = vmatpush1.bf16.msra.mxu1 %v8511_v60  ;;  %v679_v59 = vld [vmem:[#allocation2 + $0x11b8] sm:$0xff]  ;;  %v8557_v60 = vcombine.low %v666_v48, %v670_v49 }
 0x2db   :  { %5730 = vmatprep.subr.bf16.mxu0 %v8518_v61  ;;  %6048 = vmatprep.subr.bf16.mxu1 %v8520_v31  ;;  %v8559_v61 = vcombine.low %v667_v51, %v671_v52  ;;  %v8566_v31 = vcombine.high %v674_v56, %v678_v57  ;;  %v8568_v62 = vcombine.high %v675_v58, %v679_v59  ;;  %v715_v48 = vld [vmem:[#allocation2 + $0x12d8] sm:$0xff] }
 0x2dc   :  { %v719_v49 = vld [vmem:[#allocation2 + $0x12f8] sm:$0xff]  ;;  %v8599_v51 = vcombine.low %v707_v40, %v711_v41 }
 0x2dd   :  { %5710 = vmatmul.mubr.bf16.vlgmr.msra.gmra.mrb[8].mxu0 %v9595_v11  ;;  %6028 = vmatmul.mubr.bf16.vlgmr.msra.gmra.mrb[8].mxu1 %v9595_v11  ;;  %v694_v11 = vld [vmem:[#allocation2 + $0x1230] sm:$0xff] }
 0x2de   :  { %5731 = vmatpush1.bf16.msra.mxu0 %v8517_v3  ;;  %6049 = vmatpush1.bf16.msra.mxu1 %v8519_v5  ;;  %v687_v3 = vld [vmem:[#allocation2 + $0x11f8] sm:$0xff]  ;;  %v8565_v5 = vcombine.low %v674_v56, %v678_v57  ;;  %v8581_v33 = vcombine.low %v690_v10, %v694_v11 }
 0x2df   :  { %5732 = vmatprep.subr.bf16.mxu0 %v8526_v7  ;;  %6050 = vmatprep.subr.bf16.mxu1 %v8528_v8  ;;  %v8567_v7 = vcombine.low %v675_v58, %v679_v59  ;;  %v8574_v8 = vcombine.high %v682_v63, %v686_v34  ;;  %v8576_v9 = vcombine.high %v683_v2, %v687_v3  ;;  %v727_v56 = vld [vmem:[#allocation2 + $0x1338] sm:$0xff] }
 0x2e0   :  { %5719 = vmatprep.mubr.bf16.mxu0 %v9596_v29  ;;  %6037 = vmatprep.mubr.bf16.mxu1 %v9596_v29  ;;  %v699_v29 = vld [vmem:[#allocation2 + $0x1258] sm:$0xff]  ;;  %v8607_v58 = vcombine.low %v715_v48, %v719_v49 }
 0x2e2   :  { %5733 = vmatpush1.bf16.msra.mxu0 %v8525_v18  ;;  %6051 = vmatpush1.bf16.msra.mxu1 %v8527_v19  ;;  %v8573_v18 = vcombine.low %v682_v63, %v686_v34  ;;  %v8575_v19 = vcombine.low %v683_v2, %v687_v3  ;;  %v735_v63 = vld [vmem:[#allocation2 + $0x1378] sm:$0xff] }
 0x2e3   :  { %5734 = vmatprep.subr.bf16.mxu0 %v8534_v22  ;;  %6052 = vmatprep.subr.bf16.mxu1 %v8536_v24  ;;  %v8582_v22 = vcombine.high %v690_v10, %v694_v11  ;;  %v8584_v24 = vcombine.high %v691_v13, %v695_v14  ;;  %v743_v10 = vld [vmem:[#allocation2 + $0x13b8] sm:$0xff] }
 0x2e5   :  { %5720 = vmatmul.mubr.bf16.gmra.mrb[12].mxu0 %v9597_v43  ;;  %6038 = vmatmul.mubr.bf16.gmra.mrb[12].mxu1 %v9597_v43  ;;  %v8591_v43 = vcombine.low %v699_v29, %v703_v30 }
 0x2e6   :  { %5735 = vmatpush1.bf16.msra.mxu0 %v8533_v35  ;;  %6053 = vmatpush1.bf16.msra.mxu1 %v8535_v36  ;;  %v8583_v35 = vcombine.low %v691_v13, %v695_v14  ;;  %v8590_v36 = vcombine.high %v698_v26, %v702_v27  ;;  %v751_v26 = vld [vmem:[#allocation2 + $0x13f8] sm:$0xff] }
 0x2e7   :  { %5736 = vmatprep.subr.bf16.mxu0 %v8542_v37  ;;  %6054 = vmatprep.subr.bf16.mxu1 %v8544_v38  ;;  %v8592_v37 = vcombine.high %v699_v29, %v703_v30  ;;  %v706_v38 = vld [vmem:[#allocation2 + $0x1290] sm:$0xff] }
 0x2e8   :  { %5762 = vmatprep.mubr.bf16.mxu0 %v9598_v50  ;;  %6080 = vmatprep.mubr.bf16.mxu1 %v9598_v50  ;;  %v8597_v50 = vcombine.low %v706_v38, %v710_v39 }
 0x2ea   :  { %5737 = vmatpush1.bf16.msra.mxu0 %v8541_v44  ;;  %6055 = vmatpush1.bf16.msra.mxu1 %v8543_v45  ;;  %v8598_v44 = vcombine.high %v706_v38, %v710_v39  ;;  %v8600_v45 = vcombine.high %v707_v40, %v711_v41  ;;  %v759_v38 = vld [vmem:[#allocation2 + $0x1438] sm:$0xff] }
 0x2eb   :  { %5738 = vmatprep.subr.bf16.mxu0 %v8550_v46  ;;  %6056 = vmatprep.subr.bf16.mxu1 %v8552_v47  ;;  %v714_v46 = vld [vmem:[#allocation2 + $0x12d0] sm:$0xff] }
 0x2ec   :  { %v718_v47 = vld [vmem:[#allocation2 + $0x12f0] sm:$0xff] }
 0x2ed   :  { %v8606_v52 = vcombine.high %v714_v46, %v718_v47  ;;  %v8605_v57 = vcombine.low %v714_v46, %v718_v47  ;;  %v767_v46 = vld [vmem:[#allocation2 + $0x1478] sm:$0xff] }
 0x2ee   :  { %5739 = vmatpush1.bf16.msra.mxu0 %v8549_v53  ;;  %6057 = vmatpush1.bf16.msra.mxu1 %v8551_v54  ;;  %v8608_v53 = vcombine.high %v715_v48, %v719_v49  ;;  %v722_v54 = vld [vmem:[#allocation2 + $0x1310] sm:$0xff] }
 0x2ef   :  { %5740 = vmatprep.subr.bf16.mxu0 %v8558_v55  ;;  %6058 = vmatprep.subr.bf16.mxu1 %v8560_v28  ;;  %v726_v55 = vld [vmem:[#allocation2 + $0x1330] sm:$0xff]  ;;  %v723_v28 = vld [vmem:[#allocation2 + $0x1318] sm:$0xff] }
 0x2f0   :  { %v8614_v59 = vcombine.high %v722_v54, %v726_v55  ;;  %v8613_v34 = vcombine.low %v722_v54, %v726_v55  ;;  %v8615_v2 = vcombine.low %v723_v28, %v727_v56  ;;  %v771_v54 = vld [vmem:[#allocation2 + $0x1498] sm:$0xff] }
 0x2f1   :  { %v775_v55 = vld [vmem:[#allocation2 + $0x14b8] sm:$0xff] }
 0x2f2   :  { %5741 = vmatpush1.bf16.msra.mxu0 %v8557_v60  ;;  %6059 = vmatpush1.bf16.msra.mxu1 %v8559_v61  ;;  %v8616_v60 = vcombine.high %v723_v28, %v727_v56  ;;  %v730_v61 = vld [vmem:[#allocation2 + $0x1350] sm:$0xff] }
 0x2f3   :  { %5742 = vmatprep.subr.bf16.mxu0 %v8566_v31  ;;  %6060 = vmatprep.subr.bf16.mxu1 %v8568_v62  ;;  %v734_v31 = vld [vmem:[#allocation2 + $0x1370] sm:$0xff]  ;;  %v731_v62 = vld [vmem:[#allocation2 + $0x1358] sm:$0xff] }
 0x2f4   :  { %v8622_v3 = vcombine.high %v730_v61, %v734_v31  ;;  %v8621_v11 = vcombine.low %v730_v61, %v734_v31  ;;  %v8623_v13 = vcombine.low %v731_v62, %v735_v63  ;;  %v9600_v61 = vld [vmem:[%s10179_s0 + $0x84] ss:$48 sps:$4 sm:$0xff]   ;;  %v779_v31 = vld [vmem:[#allocation2 + $0x14d8] sm:$0xff] }
 0x2f6   :  { %5743 = vmatpush1.bf16.msra.mxu0 %v8565_v5  ;;  %6061 = vmatpush1.bf16.msra.mxu1 %v8567_v7  ;;  %v8624_v5 = vcombine.high %v731_v62, %v735_v63  ;;  %v738_v7 = vld [vmem:[#allocation2 + $0x1390] sm:$0xff]  ;;  %v783_v62 = vld [vmem:[#allocation2 + $0x14f8] sm:$0xff] }
 0x2f7   :  { %5744 = vmatprep.subr.bf16.mxu0 %v8574_v8  ;;  %6062 = vmatprep.subr.bf16.mxu1 %v8576_v9  ;;  %v742_v8 = vld [vmem:[#allocation2 + $0x13b0] sm:$0xff]  ;;  %v739_v9 = vld [vmem:[#allocation2 + $0x1398] sm:$0xff] }
 0x2f8   :  { %v8630_v14 = vcombine.high %v738_v7, %v742_v8  ;;  %v8629_v27 = vcombine.low %v738_v7, %v742_v8  ;;  %v8631_v29 = vcombine.low %v739_v9, %v743_v10  ;;  %v790_v7 = vld [vmem:[#allocation2 + $0x1530] sm:$0xff]  ;;  %v787_v8 = vld [vmem:[#allocation2 + $0x1518] sm:$0xff] }
 0x2fa   :  { %5745 = vmatpush1.bf16.msra.mxu0 %v8573_v18  ;;  %6063 = vmatpush1.bf16.msra.mxu1 %v8575_v19  ;;  %v8632_v18 = vcombine.high %v739_v9, %v743_v10  ;;  %v746_v19 = vld [vmem:[#allocation2 + $0x13d0] sm:$0xff]  ;;  %v791_v9 = vld [vmem:[#allocation2 + $0x1538] sm:$0xff] }
 0x2fb   :  { %5746 = vmatprep.subr.bf16.mxu0 %v8582_v22  ;;  %6064 = vmatprep.subr.bf16.mxu1 %v8584_v24  ;;  %v750_v22 = vld [vmem:[#allocation2 + $0x13f0] sm:$0xff]  ;;  %v747_v24 = vld [vmem:[#allocation2 + $0x13d8] sm:$0xff] }
 0x2fc   :  { %v8638_v30 = vcombine.high %v746_v19, %v750_v22  ;;  %v8637_v39 = vcombine.low %v746_v19, %v750_v22  ;;  %v8639_v40 = vcombine.low %v747_v24, %v751_v26  ;;  %v9601_v10 = vld [vmem:[%s10179_s0 + $0x80] ss:$48 sps:$4 sm:$0xff]  }
 0x2fd   :  { %v794_v19 = vld [vmem:[#allocation2 + $0x1550] sm:$0xff] }
 0x2fe   :  { %5747 = vmatpush1.bf16.msra.mxu0 %v8581_v33  ;;  %6065 = vmatpush1.bf16.msra.mxu1 %v8583_v35  ;;  %v8640_v33 = vcombine.high %v747_v24, %v751_v26  ;;  %v754_v35 = vld [vmem:[#allocation2 + $0x1410] sm:$0xff]  ;;  %v9602_v24 = vld [vmem:[%s10179_s0 + $0x2c] ss:$48 sps:$4 sm:$0xff]  }
 0x2ff   :  { %5748 = vmatprep.subr.bf16.mxu0 %v8590_v36  ;;  %6066 = vmatprep.subr.bf16.mxu1 %v8592_v37  ;;  %v758_v36 = vld [vmem:[#allocation2 + $0x1430] sm:$0xff]  ;;  %v755_v37 = vld [vmem:[#allocation2 + $0x1418] sm:$0xff] }
 0x300   :  { %v8646_v41 = vcombine.high %v754_v35, %v758_v36  ;;  %v8645_v47 = vcombine.low %v754_v35, %v758_v36  ;;  %v8647_v48 = vcombine.low %v755_v37, %v759_v38  ;;  %v798_v22 = vld [vmem:[#allocation2 + $0x1570] sm:$0xff]  ;;  %v795_v26 = vld [vmem:[#allocation2 + $0x1558] sm:$0xff] }
 0x301   :  { %v802_v36 = vld [vmem:[#allocation2 + $0x1590] sm:$0xff] }
 0x302   :  { %5749 = vmatpush1.bf16.msra.mxu0 %v8589_v42  ;;  %6067 = vmatpush1.bf16.msra.mxu1 %v8591_v43  ;;  %v8648_v42 = vcombine.high %v755_v37, %v759_v38  ;;  %v762_v43 = vld [vmem:[#allocation2 + $0x1450] sm:$0xff]  ;;  %v803_v38 = vld [vmem:[#allocation2 + $0x1598] sm:$0xff] }
 0x303   :  { %5750 = vmatprep.subr.bf16.mxu0 %v8598_v44  ;;  %6068 = vmatprep.subr.bf16.mxu1 %v8600_v45  ;;  %v766_v44 = vld [vmem:[#allocation2 + $0x1470] sm:$0xff]  ;;  %v763_v45 = vld [vmem:[#allocation2 + $0x1458] sm:$0xff] }
 0x304   :  { %v8654_v49 = vcombine.high %v762_v43, %v766_v44  ;;  %v8653_v28 = vcombine.low %v762_v43, %v766_v44  ;;  %v8655_v56 = vcombine.low %v763_v45, %v767_v46  ;;  %v806_v37 = vld [vmem:[#allocation2 + $0x15b0] sm:$0xff] }
 0x305   :  { %v810_v44 = vld [vmem:[#allocation2 + $0x15d0] sm:$0xff] }
 0x306   :  { %5751 = vmatpush1.bf16.msra.mxu0 %v8597_v50  ;;  %6069 = vmatpush1.bf16.msra.mxu1 %v8599_v51  ;;  %v8656_v50 = vcombine.high %v763_v45, %v767_v46  ;;  %v770_v51 = vld [vmem:[#allocation2 + $0x1490] sm:$0xff]  ;;  %v811_v46 = vld [vmem:[#allocation2 + $0x15d8] sm:$0xff] }
 0x307   :  { %5752 = vmatprep.subr.bf16.mxu0 %v8606_v52  ;;  %6070 = vmatprep.subr.bf16.mxu1 %v8608_v53  ;;  %v774_v52 = vld [vmem:[#allocation2 + $0x14b0] sm:$0xff] }
 0x308   :  { %v9599_v53 = vld [vmem:[%s10179_s0 + $0x20] ss:$48 sps:$4 sm:$0xff]   ;;  %v8661_v63 = vcombine.low %v770_v51, %v774_v52 }
 0x309   :  { %v814_v45 = vld [vmem:[#allocation2 + $0x15f0] sm:$0xff] }
 0x30a   :  { %5753 = vmatpush1.bf16.msra.mxu0 %v8605_v57  ;;  %6071 = vmatpush1.bf16.msra.mxu1 %v8607_v58  ;;  %v8662_v57 = vcombine.high %v770_v51, %v774_v52  ;;  %v8664_v58 = vcombine.high %v771_v54, %v775_v55  ;;  %v818_v52 = vld [vmem:[#allocation2 + $0x1610] sm:$0xff] }
 0x30b   :  { %5754 = vmatprep.subr.bf16.mxu0 %v8614_v59  ;;  %6072 = vmatprep.subr.bf16.mxu1 %v8616_v60  ;;  %v778_v59 = vld [vmem:[#allocation2 + $0x14d0] sm:$0xff] }
 0x30c   :  { %v782_v60 = vld [vmem:[#allocation2 + $0x14f0] sm:$0xff] }
 0x30e   :  { %5755 = vmatpush1.bf16.msra.mxu0 %v8613_v34  ;;  %6073 = vmatpush1.bf16.msra.mxu1 %v8615_v2  ;;  %v8663_v34 = vcombine.low %v771_v54, %v775_v55  ;;  %v8670_v2 = vcombine.high %v778_v59, %v782_v60  ;;  %v819_v54 = vld [vmem:[#allocation2 + $0x1618] sm:$0xff] }
 0x30f   :  { %5756 = vmatprep.subr.bf16.mxu0 %v8622_v3  ;;  %6074 = vmatprep.subr.bf16.mxu1 %v8624_v5  ;;  %v8672_v3 = vcombine.high %v779_v31, %v783_v62  ;;  %v786_v5 = vld [vmem:[#allocation2 + $0x1510] sm:$0xff]  ;;  %v823_v55 = vld [vmem:[#allocation2 + $0x1638] sm:$0xff] }
 0x312   :  { %5757 = vmatpush1.bf16.msra.mxu0 %v8621_v11  ;;  %6075 = vmatpush1.bf16.msra.mxu1 %v8623_v13  ;;  %v8669_v11 = vcombine.low %v778_v59, %v782_v60  ;;  %v8671_v13 = vcombine.low %v779_v31, %v783_v62  ;;  %v826_v59 = vld [vmem:[#allocation2 + $0x1650] sm:$0xff]  ;;  %v831_v31 = vld [vmem:[#allocation2 + $0x1678] sm:$0xff] }
 0x313   :  { %5758 = vmatprep.subr.bf16.mxu0 %v8630_v14  ;;  %6076 = vmatprep.subr.bf16.mxu1 %v8632_v18  ;;  %v8678_v14 = vcombine.high %v786_v5, %v790_v7  ;;  %v8680_v18 = vcombine.high %v787_v8, %v791_v9  ;;  %v830_v60 = vld [vmem:[#allocation2 + $0x1670] sm:$0xff] }
 0x316   :  { %5759 = vmatpush1.bf16.msra.mxu0 %v8629_v27  ;;  %6077 = vmatpush1.bf16.msra.mxu1 %v8631_v29  ;;  %v799_v27 = vld [vmem:[#allocation2 + $0x1578] sm:$0xff]  ;;  %v8677_v29 = vcombine.low %v786_v5, %v790_v7  ;;  %v838_v5 = vld [vmem:[#allocation2 + $0x16b0] sm:$0xff] }
 0x317   :  { %5760 = vmatprep.subr.bf16.mxu0 %v8638_v30  ;;  %6078 = vmatprep.subr.bf16.mxu1 %v8640_v33  ;;  %v8679_v30 = vcombine.low %v787_v8, %v791_v9  ;;  %v8686_v33 = vcombine.high %v794_v19, %v798_v22  ;;  %v8688_v35 = vcombine.high %v795_v26, %v799_v27  ;;  %v835_v7 = vld [vmem:[#allocation2 + $0x1698] sm:$0xff] }
 0x318   :  { %v839_v8 = vld [vmem:[#allocation2 + $0x16b8] sm:$0xff]  ;;  %v8717_v9 = vcombine.low %v826_v59, %v830_v60 }
 0x31a   :  { %5761 = vmatpush1.bf16.msra.mxu0 %v8637_v39  ;;  %6079 = vmatpush1.bf16.msra.mxu1 %v8639_v40  ;;  %v807_v39 = vld [vmem:[#allocation2 + $0x15b8] sm:$0xff]  ;;  %v8685_v40 = vcombine.low %v794_v19, %v798_v22 }
 0x31b   :  { %5783 = vmatprep.subr.bf16.mxu0 %v8646_v41  ;;  %6101 = vmatprep.subr.bf16.mxu1 %v8648_v42  ;;  %v8687_v41 = vcombine.low %v795_v26, %v799_v27  ;;  %v8694_v42 = vcombine.high %v802_v36, %v806_v37  ;;  %v8696_v43 = vcombine.high %v803_v38, %v807_v39  ;;  %v843_v19 = vld [vmem:[#allocation2 + $0x16d8] sm:$0xff] }
 0x31c   :  { %v847_v22 = vld [vmem:[#allocation2 + $0x16f8] sm:$0xff]  ;;  %v8727_v26 = vcombine.low %v835_v7, %v839_v8 }
 0x31d   :  { %5763 = vmatmul.mubr.bf16.vlgmr.msra.gmra.mrb[8].mxu0 %v9599_v53  ;;  %6081 = vmatmul.mubr.bf16.vlgmr.msra.gmra.mrb[8].mxu1 %v9599_v53  ;;  %v822_v53 = vld [vmem:[#allocation2 + $0x1630] sm:$0xff] }
 0x31e   :  { %5784 = vmatpush1.bf16.msra.mxu0 %v8645_v47  ;;  %6102 = vmatpush1.bf16.msra.mxu1 %v8647_v48  ;;  %v815_v47 = vld [vmem:[#allocation2 + $0x15f8] sm:$0xff]  ;;  %v8693_v48 = vcombine.low %v802_v36, %v806_v37  ;;  %v8709_v62 = vcombine.low %v818_v52, %v822_v53 }
 0x31f   :  { %5785 = vmatprep.subr.bf16.mxu0 %v8654_v49  ;;  %6103 = vmatprep.subr.bf16.mxu1 %v8656_v50  ;;  %v8695_v49 = vcombine.low %v803_v38, %v807_v39  ;;  %v8702_v50 = vcombine.high %v810_v44, %v814_v45  ;;  %v8704_v51 = vcombine.high %v811_v46, %v815_v47  ;;  %v855_v36 = vld [vmem:[#allocation2 + $0x1738] sm:$0xff] }
 0x320   :  { %5772 = vmatprep.mubr.bf16.mxu0 %v9600_v61  ;;  %6090 = vmatprep.mubr.bf16.mxu1 %v9600_v61  ;;  %v827_v61 = vld [vmem:[#allocation2 + $0x1658] sm:$0xff]  ;;  %v8735_v38 = vcombine.low %v843_v19, %v847_v22 }
 0x322   :  { %5786 = vmatpush1.bf16.msra.mxu0 %v8653_v28  ;;  %6104 = vmatpush1.bf16.msra.mxu1 %v8655_v56  ;;  %v8701_v28 = vcombine.low %v810_v44, %v814_v45  ;;  %v8703_v56 = vcombine.low %v811_v46, %v815_v47  ;;  %v863_v44 = vld [vmem:[#allocation2 + $0x1778] sm:$0xff] }
 0x323   :  { %5787 = vmatprep.subr.bf16.mxu0 %v8662_v57  ;;  %6105 = vmatprep.subr.bf16.mxu1 %v8664_v58  ;;  %v8710_v57 = vcombine.high %v818_v52, %v822_v53  ;;  %v8712_v58 = vcombine.high %v819_v54, %v823_v55  ;;  %v871_v52 = vld [vmem:[#allocation2 + $0x17b8] sm:$0xff] }
 0x325   :  { %5773 = vmatmul.mubr.bf16.gmra.mrb[12].mxu0 %v9601_v10  ;;  %6091 = vmatmul.mubr.bf16.gmra.mrb[12].mxu1 %v9601_v10  ;;  %v8719_v10 = vcombine.low %v827_v61, %v831_v31 }
 0x326   :  { %5788 = vmatpush1.bf16.msra.mxu0 %v8661_v63  ;;  %6106 = vmatpush1.bf16.msra.mxu1 %v8663_v34  ;;  %v8711_v63 = vcombine.low %v819_v54, %v823_v55  ;;  %v8718_v34 = vcombine.high %v826_v59, %v830_v60  ;;  %v879_v59 = vld [vmem:[#allocation2 + $0x17f8] sm:$0xff] }
 0x327   :  { %5789 = vmatprep.subr.bf16.mxu0 %v8670_v2  ;;  %6107 = vmatprep.subr.bf16.mxu1 %v8672_v3  ;;  %v8720_v2 = vcombine.high %v827_v61, %v831_v31  ;;  %v834_v3 = vld [vmem:[#allocation2 + $0x1690] sm:$0xff] }
 0x328   :  { %5815 = vmatprep.mubr.bf16.mxu0 %v9602_v24  ;;  %6133 = vmatprep.mubr.bf16.mxu1 %v9602_v24  ;;  %v8725_v24 = vcombine.low %v834_v3, %v838_v5 }
 0x32a   :  { %5790 = vmatpush1.bf16.msra.mxu0 %v8669_v11  ;;  %6108 = vmatpush1.bf16.msra.mxu1 %v8671_v13  ;;  %v8726_v11 = vcombine.high %v834_v3, %v838_v5  ;;  %v8728_v13 = vcombine.high %v835_v7, %v839_v8  ;;  %v9329_v3 = vld [vmem:[#allocation6 + $0xc8] ss:$12 sps:$4 sm:$0xff]   ;;  %v9326_v5 = vld [vmem:[#allocation6] ss:$12 sps:$4 sm:$0xff]  }
 0x32b   :  { %5791 = vmatprep.subr.bf16.mxu0 %v8678_v14  ;;  %6109 = vmatprep.subr.bf16.mxu1 %v8680_v18  ;;  %v842_v14 = vld [vmem:[#allocation2 + $0x16d0] sm:$0xff] }
 0x32c   :  { %v846_v18 = vld [vmem:[#allocation2 + $0x16f0] sm:$0xff] }
 0x32d   :  { %v8734_v27 = vcombine.high %v842_v14, %v846_v18  ;;  %v8733_v37 = vcombine.low %v842_v14, %v846_v18  ;;  %v9330_v7 = vld [vmem:[#allocation6 + $0x8] ss:$12 sps:$4 sm:$0xff]  }
 0x32e   :  { %5792 = vmatpush1.bf16.msra.mxu0 %v8677_v29  ;;  %6110 = vmatpush1.bf16.msra.mxu1 %v8679_v30  ;;  %v8736_v29 = vcombine.high %v843_v19, %v847_v22  ;;  %v850_v30 = vld [vmem:[#allocation2 + $0x1710] sm:$0xff]  ;;  %v9338_v14 = vld [vmem:[#allocation6 + $0x34] ss:$12 sps:$4 sm:$0xff]   ;;  %v9339_v19 = vld [vmem:[#allocation6 + $0xf8] ss:$12 sps:$4 sm:$0xff]  }
 0x32f   :  { %5793 = vmatprep.subr.bf16.mxu0 %v8686_v33  ;;  %6111 = vmatprep.subr.bf16.mxu1 %v8688_v35  ;;  %v854_v33 = vld [vmem:[#allocation2 + $0x1730] sm:$0xff]  ;;  %v851_v35 = vld [vmem:[#allocation2 + $0x1718] sm:$0xff] }
 0x330   :  { %v8742_v39 = vcombine.high %v850_v30, %v854_v33  ;;  %v8741_v45 = vcombine.low %v850_v30, %v854_v33  ;;  %v8743_v46 = vcombine.low %v851_v35, %v855_v36  ;;  %v9333_v8 = vld [vmem:[#allocation6 + $0x1c] ss:$12 sps:$4 sm:$0xff]   ;;  %v9604_v18 = vld [vmem:[%s10179_s0 + $0x8c] ss:$48 sps:$4 sm:$0xff]  }
 0x331   :  { %v9336_v22 = vld [vmem:[#allocation6 + $0x30] ss:$12 sps:$4 sm:$0xff]   ;;  %v9341_v30 = vld [vmem:[#allocation6 + $0x48] ss:$12 sps:$4 sm:$0xff]  }
 0x332   :  { %5794 = vmatpush1.bf16.msra.mxu0 %v8685_v40  ;;  %6112 = vmatpush1.bf16.msra.mxu1 %v8687_v41  ;;  %v8744_v40 = vcombine.high %v851_v35, %v855_v36  ;;  %v858_v41 = vld [vmem:[#allocation2 + $0x1750] sm:$0xff]  ;;  %v9345_v33 = vld [vmem:[#allocation6 + $0x50] ss:$12 sps:$4 sm:$0xff]  }
 0x333   :  { %5795 = vmatprep.subr.bf16.mxu0 %v8694_v42  ;;  %6113 = vmatprep.subr.bf16.mxu1 %v8696_v43  ;;  %v862_v42 = vld [vmem:[#allocation2 + $0x1770] sm:$0xff]  ;;  %v859_v43 = vld [vmem:[#allocation2 + $0x1758] sm:$0xff] }
 0x334   :  { %v8750_v47 = vcombine.high %v858_v41, %v862_v42  ;;  %v8749_v53 = vcombine.low %v858_v41, %v862_v42  ;;  %v8751_v54 = vcombine.low %v859_v43, %v863_v44  ;;  %v9348_v35 = vld [vmem:[#allocation6 + $0x64] ss:$12 sps:$4 sm:$0xff]   ;;  %v9349_v36 = vld [vmem:[#allocation6 + $0x128] ss:$12 sps:$4 sm:$0xff]   ;;  %v9355_v42 = vld [vmem:[#allocation6 + $0x80] ss:$12 sps:$4 sm:$0xff]  }
 0x335   :  { %v9351_v41 = vld [vmem:[#allocation6 + $0x78] ss:$12 sps:$4 sm:$0xff]  }
 0x336   :  { %5796 = vmatpush1.bf16.msra.mxu0 %v8693_v48  ;;  %6114 = vmatpush1.bf16.msra.mxu1 %v8695_v49  ;;  %v8752_v48 = vcombine.high %v859_v43, %v863_v44  ;;  %v866_v49 = vld [vmem:[#allocation2 + $0x1790] sm:$0xff]  ;;  %v9358_v43 = vld [vmem:[#allocation6 + $0x94] ss:$12 sps:$4 sm:$0xff]   ;;  %v9359_v44 = vld [vmem:[#allocation6 + $0x158] ss:$12 sps:$4 sm:$0xff]  }
 0x337   :  { %5797 = vmatprep.subr.bf16.mxu0 %v8702_v50  ;;  %6115 = vmatprep.subr.bf16.mxu1 %v8704_v51  ;;  %v870_v50 = vld [vmem:[#allocation2 + $0x17b0] sm:$0xff]  ;;  %v867_v51 = vld [vmem:[#allocation2 + $0x1798] sm:$0xff] }
 0x338   :  { %v8758_v55 = vcombine.high %v866_v49, %v870_v50  ;;  %v8757_v60 = vcombine.low %v866_v49, %v870_v50  ;;  %v8759_v61 = vcombine.low %v867_v51, %v871_v52  ;;  %v9365_v49 = vld [vmem:[#allocation6 + $0xb0] ss:$12 sps:$4 sm:$0xff]  }
 0x339   :  { %v9368_v50 = vld [vmem:[#allocation6 + $0xc4] ss:$12 sps:$4 sm:$0xff]  }
 0x33a   :  { %5798 = vmatpush1.bf16.msra.mxu0 %v8701_v28  ;;  %6116 = vmatpush1.bf16.msra.mxu1 %v8703_v56  ;;  %v8760_v28 = vcombine.high %v867_v51, %v871_v52  ;;  %v874_v56 = vld [vmem:[#allocation2 + $0x17d0] sm:$0xff] }
 0x33b   :  { %5799 = vmatprep.subr.bf16.mxu0 %v8710_v57  ;;  %6117 = vmatprep.subr.bf16.mxu1 %v8712_v58  ;;  %v878_v57 = vld [vmem:[#allocation2 + $0x17f0] sm:$0xff]  ;;  %v875_v58 = vld [vmem:[#allocation2 + $0x17d8] sm:$0xff] }
 0x33c   :  { %v8766_v31 = vcombine.high %v874_v56, %v878_v57  ;;  %v9369_v51 = vld [vmem:[#allocation6 + $0x248] ss:$12 sps:$4 sm:$0xff]   ;;  %v9366_v52 = vld [vmem:[#allocation6 + $0xc0] ss:$12 sps:$4 sm:$0xff]  }
 0x33e   :  { %5800 = vmatpush1.bf16.msra.mxu0 %v8709_v62  ;;  %6118 = vmatpush1.bf16.msra.mxu1 %v8711_v63  ;;  %v8768_v62 = vcombine.high %v875_v58, %v879_v59  ;;  %v8765_v63 = vcombine.low %v874_v56, %v878_v57  ;;  %v9375_v56 = vld [vmem:[#allocation6 + $0x1a0] ss:$12 sps:$4 sm:$0xff]  }
 0x33f   :  { %5801 = vmatprep.subr.bf16.mxu0 %v8718_v34  ;;  %6119 = vmatprep.subr.bf16.mxu1 %v8720_v2  ;;  %v8767_v34 = vcombine.low %v875_v58, %v879_v59  ;;  %v9328_v2 = vld [vmem:[#allocation6 + $0x4] ss:$12 sps:$4 sm:$0xff]   ;;  %v9378_v57 = vld [vmem:[#allocation6 + $0xf4] ss:$12 sps:$4 sm:$0xff]  }
 0x340   :  { %v9379_v58 = vld [vmem:[#allocation6 + $0x278] ss:$12 sps:$4 sm:$0xff]   ;;  %v9376_v59 = vld [vmem:[#allocation6 + $0xf0] ss:$12 sps:$4 sm:$0xff]  }
 0x342   :  { %5802 = vmatpush1.bf16.msra.mxu0 %v8717_v9  ;;  %6120 = vmatpush1.bf16.msra.mxu1 %v8719_v10  ;;  %v9334_v9 = vld [vmem:[#allocation6 + $0xe0] ss:$12 sps:$4 sm:$0xff]  }
 0x343   :  { %5803 = vmatprep.subr.bf16.mxu0 %v8726_v11  ;;  %6121 = vmatprep.subr.bf16.mxu1 %v8728_v13  ;;  %v9603_v10 = vld [vmem:[%s10179_s0 + $0x28] ss:$48 sps:$4 sm:$0xff]   ;;  %v9331_v11 = vld [vmem:[#allocation6 + $0x18] ss:$12 sps:$4 sm:$0xff]  }
 0x344   :  { %v9335_v13 = vld [vmem:[#allocation6 + $0x20] ss:$12 sps:$4 sm:$0xff]  }
 0x346   :  { %5804 = vmatpush1.bf16.msra.mxu0 %v8725_v24  ;;  %6122 = vmatpush1.bf16.msra.mxu1 %v8727_v26  ;;  %v9340_v24 = vld [vmem:[#allocation6 + $0x38] ss:$12 sps:$4 sm:$0xff]  }
 0x347   :  { %5805 = vmatprep.subr.bf16.mxu0 %v8734_v27  ;;  %6123 = vmatprep.subr.bf16.mxu1 %v8736_v29  ;;  %v9343_v26 = vld [vmem:[#allocation6 + $0x4c] ss:$12 sps:$4 sm:$0xff]   ;;  %v9605_v27 = vld [vmem:[%s10179_s0 + $0x88] ss:$48 sps:$4 sm:$0xff]  }
 0x348   :  { %v9344_v29 = vld [vmem:[#allocation6 + $0x110] ss:$12 sps:$4 sm:$0xff]  }
 0x34a   :  { %5806 = vmatpush1.bf16.msra.mxu0 %v8733_v37  ;;  %6124 = vmatpush1.bf16.msra.mxu1 %v8735_v38  ;;  %v9346_v37 = vld [vmem:[#allocation6 + $0x60] ss:$12 sps:$4 sm:$0xff]   ;;  %v9350_v38 = vld [vmem:[#allocation6 + $0x68] ss:$12 sps:$4 sm:$0xff]  }
 0x34b   :  { %5807 = vmatprep.subr.bf16.mxu0 %v8742_v39  ;;  %6125 = vmatprep.subr.bf16.mxu1 %v8744_v40  ;;  %v9353_v39 = vld [vmem:[#allocation6 + $0x7c] ss:$12 sps:$4 sm:$0xff]   ;;  %v9354_v40 = vld [vmem:[#allocation6 + $0x140] ss:$12 sps:$4 sm:$0xff]  }
 0x34e   :  { %5808 = vmatpush1.bf16.msra.mxu0 %v8741_v45  ;;  %6126 = vmatpush1.bf16.msra.mxu1 %v8743_v46  ;;  %v9360_v45 = vld [vmem:[#allocation6 + $0x98] ss:$12 sps:$4 sm:$0xff]  }
 0x34f   :  { %5809 = vmatprep.subr.bf16.mxu0 %v8750_v47  ;;  %6127 = vmatprep.subr.bf16.mxu1 %v8752_v48  ;;  %v9363_v46 = vld [vmem:[#allocation6 + $0xac] ss:$12 sps:$4 sm:$0xff]   ;;  %v9364_v47 = vld [vmem:[#allocation6 + $0x170] ss:$12 sps:$4 sm:$0xff]   ;;  %v9361_v48 = vld [vmem:[#allocation6 + $0xa8] ss:$12 sps:$4 sm:$0xff]  }
 0x352   :  { %5810 = vmatpush1.bf16.msra.mxu0 %v8749_v53  ;;  %6128 = vmatpush1.bf16.msra.mxu1 %v8751_v54  ;;  %v9370_v53 = vld [vmem:[#allocation6 + $0x188] ss:$12 sps:$4 sm:$0xff]  }
 0x353   :  { %5811 = vmatprep.subr.bf16.mxu0 %v8758_v55  ;;  %6129 = vmatprep.subr.bf16.mxu1 %v8760_v28  ;;  %v9373_v54 = vld [vmem:[#allocation6 + $0xdc] ss:$12 sps:$4 sm:$0xff]   ;;  %v9374_v55 = vld [vmem:[#allocation6 + $0x260] ss:$12 sps:$4 sm:$0xff]   ;;  %v9371_v28 = vld [vmem:[#allocation6 + $0xd8] ss:$12 sps:$4 sm:$0xff]  }
 0x356   :  { %5812 = vmatpush1.bf16.msra.mxu0 %v8757_v60  ;;  %6130 = vmatpush1.bf16.msra.mxu1 %v8759_v61  ;;  %v9380_v60 = vld [vmem:[#allocation6 + $0x1b8] ss:$12 sps:$4 sm:$0xff]  }
 0x357   :  { %5813 = vmatprep.subr.bf16.mxu0 %v8766_v31  ;;  %6131 = vmatprep.subr.bf16.mxu1 %v8768_v62  ;;  %v9383_v61 = vld [vmem:[#allocation6 + $0x10c] ss:$12 sps:$4 sm:$0xff]   ;;  %v9384_v31 = vld [vmem:[#allocation6 + $0x290] ss:$12 sps:$4 sm:$0xff]   ;;  %v9381_v62 = vld [vmem:[#allocation6 + $0x108] ss:$12 sps:$4 sm:$0xff]  }
 0x35a   :  { %5814 = vmatpush1.bf16.msra.mxu0 %v8765_v63  ;;  %6132 = vmatpush1.bf16.msra.mxu1 %v8767_v34  ;;  %v9385_v63 = vld [vmem:[#allocation6 + $0x1d0] ss:$12 sps:$4 sm:$0xff]  }
 0x35b   :  { %6842 = vmatprep.subr.bf16.mxu0 %v9328_v2  ;;  %8961 = vmatprep.subr.bf16.mxu1 %v9329_v3  ;;  %v9388_v34 = vld [vmem:[#allocation6 + $0x124] ss:$12 sps:$4 sm:$0xff]   ;;  %v9389_v2 = vld [vmem:[#allocation6 + $0x2a8] ss:$12 sps:$4 sm:$0xff]   ;;  %v9386_v3 = vld [vmem:[#allocation6 + $0x120] ss:$12 sps:$4 sm:$0xff]  }
 0x35d   :  { %5816 = vmatmul.mubr.bf16.vlgmr.msra.gmra.mrb[8].mxu0 %v9603_v10  ;;  %6134 = vmatmul.mubr.bf16.vlgmr.msra.gmra.mrb[8].mxu1 %v9603_v10  ;;  %v9395_v10 = vld [vmem:[#allocation6 + $0x200] ss:$12 sps:$4 sm:$0xff]  }
 0x35e   :  { %6843 = vmatpush1.bf16.msra.mxu0 %v9326_v5  ;;  %8962 = vmatpush3.bf16.msra.mxu1 %v9330_v7  ;;  %v9390_v5 = vld [vmem:[#allocation6 + $0x1e8] ss:$12 sps:$4 sm:$0xff]  }
 0x35f   :  { %6844 = vmatprep.subr.bf16.mxu0 %v9333_v8  ;;  %8963 = vmatprep.subr.bf16.mxu1 %v9334_v9  ;;  %v9393_v7 = vld [vmem:[#allocation6 + $0x13c] ss:$12 sps:$4 sm:$0xff]   ;;  %v9394_v8 = vld [vmem:[#allocation6 + $0x2c0] ss:$12 sps:$4 sm:$0xff]   ;;  %v9391_v9 = vld [vmem:[#allocation6 + $0x138] ss:$12 sps:$4 sm:$0xff]  }
 0x360   :  { %5825 = vmatprep.mubr.bf16.mxu0 %v9604_v18  ;;  %6143 = vmatprep.mubr.bf16.mxu1 %v9604_v18  ;;  %v9400_v18 = vld [vmem:[#allocation6 + $0x218] ss:$12 sps:$4 sm:$0xff]  }
 0x362   :  { %6845 = vmatpush1.bf16.msra.mxu0 %v9331_v11  ;;  %8964 = vmatpush3.bf16.msra.mxu1 %v9335_v13  ;;  %v9398_v11 = vld [vmem:[#allocation6 + $0x154] ss:$12 sps:$4 sm:$0xff]   ;;  %v9399_v13 = vld [vmem:[#allocation6 + $0x2d8] ss:$12 sps:$4 sm:$0xff]  }
 0x363   :  { %6846 = vmatprep.subr.bf16.mxu0 %v9338_v14  ;;  %8965 = vmatprep.subr.bf16.mxu1 %v9339_v19  ;;  %v9396_v14 = vld [vmem:[#allocation6 + $0x150] ss:$12 sps:$4 sm:$0xff]   ;;  %v9403_v19 = vld [vmem:[#allocation6 + $0x16c] ss:$12 sps:$4 sm:$0xff]  }
 0x365   :  { %5826 = vmatmul.mubr.bf16.gmra.mrb[12].mxu0 %v9605_v27  ;;  %6144 = vmatmul.mubr.bf16.gmra.mrb[12].mxu1 %v9605_v27  ;;  %v9408_v27 = vld [vmem:[#allocation6 + $0x184] ss:$12 sps:$4 sm:$0xff]  }
 0x366   :  { %6847 = vmatpush1.bf16.msra.mxu0 %v9336_v22  ;;  %6874 = vmatprep.mubr.bf16.mxu0 %v9996_v17  ;;  %v9404_v22 = vld [vmem:[#allocation6 + $0x2f0] ss:$12 sps:$4 sm:$0xff]  }
 0x367   :  { %8966 = vmatpush3.bf16.msra.mxu1 %v9340_v24  ;;  %6980 = vmatprep.mubr.bf16.mxu1 %v9996_v17  ;;  %v9356_v17 = vld [vmem:[#allocation6 + $0x90] ss:$12 sps:$4 sm:$0xff]   ;;  %v9401_v24 = vld [vmem:[#allocation6 + $0x168] ss:$12 sps:$4 sm:$0xff]  }
 0x368   :  { %6848 = vmatprep.subr.bf16.mxu0 %v9343_v26  ;;  %8967 = vmatprep.subr.bf16.mxu1 %v9344_v29  ;;  %v9405_v26 = vld [vmem:[#allocation6 + $0x230] ss:$12 sps:$4 sm:$0xff]  }
 0x369   :  { %v9456_v29 = vld [vmem:[#allocation7 + $0x4] ss:$12 sps:$4 sm:$0xff]  }
 0x36a   :  { %6849 = vmatpush1.bf16.msra.mxu0 %v9341_v30  ;;  %v9406_v30 = vld [vmem:[#allocation6 + $0x180] ss:$12 sps:$4 sm:$0xff]  }
 0x36b   :  { %8968 = vmatpush3.bf16.msra.mxu1 %v9345_v33  ;;  %6850 = vmatprep.subr.bf16.mxu0 %v9348_v35  ;;  %v9411_v33 = vld [vmem:[#allocation6 + $0x19c] ss:$12 sps:$4 sm:$0xff]   ;;  %v9454_v35 = vld [vmem:[#allocation7] ss:$12 sps:$4 sm:$0xff]  }
 0x36c   :  { %8969 = vmatprep.subr.bf16.mxu1 %v9349_v36  ;;  %v9459_v36 = vld [vmem:[#allocation7 + $0x1c] ss:$12 sps:$4 sm:$0xff]  }
 0x36e   :  { %6851 = vmatpush1.bf16.msra.mxu0 %v9346_v37  ;;  %v9409_v37 = vld [vmem:[#allocation6 + $0x198] ss:$12 sps:$4 sm:$0xff]  }
 0x36f   :  { %8970 = vmatpush3.bf16.msra.mxu1 %v9350_v38  ;;  %6852 = vmatprep.subr.bf16.mxu0 %v9353_v39  ;;  %v9414_v38 = vld [vmem:[#allocation6 + $0x1b4] ss:$12 sps:$4 sm:$0xff]   ;;  %v9457_v39 = vld [vmem:[#allocation7 + $0x18] ss:$12 sps:$4 sm:$0xff]  }
 0x370   :  { %8971 = vmatprep.subr.bf16.mxu1 %v9354_v40  ;;  %v9462_v40 = vld [vmem:[#allocation7 + $0x34] ss:$12 sps:$4 sm:$0xff]  }
 0x372   :  { %6853 = vmatpush1.bf16.msra.mxu0 %v9351_v41  ;;  %v9412_v41 = vld [vmem:[#allocation6 + $0x1b0] ss:$12 sps:$4 sm:$0xff]  }
 0x373   :  { %8972 = vmatpush3.bf16.msra.mxu1 %v9355_v42  ;;  %6854 = vmatprep.subr.bf16.mxu0 %v9358_v43  ;;  %v9417_v42 = vld [vmem:[#allocation6 + $0x1cc] ss:$12 sps:$4 sm:$0xff]   ;;  %v9415_v43 = vld [vmem:[#allocation6 + $0x1c8] ss:$12 sps:$4 sm:$0xff]  }
 0x374   :  { %8973 = vmatprep.subr.bf16.mxu1 %v9359_v44  ;;  %v9420_v44 = vld [vmem:[#allocation6 + $0x1e4] ss:$12 sps:$4 sm:$0xff]  }
 0x376   :  { %6855 = vmatpush1.bf16.msra.mxu0 %v9356_v17  ;;  %v9463_v17 = vld [vmem:[#allocation7 + $0x48] ss:$12 sps:$4 sm:$0xff]  }
 0x377   :  { %8974 = vmatpush3.bf16.msra.mxu1 %v9360_v45  ;;  %6856 = vmatprep.subr.bf16.mxu0 %v9363_v46  ;;  %v9468_v45 = vld [vmem:[#allocation7 + $0x64] ss:$12 sps:$4 sm:$0xff]   ;;  %v9418_v46 = vld [vmem:[#allocation6 + $0x1e0] ss:$12 sps:$4 sm:$0xff]  }
 0x378   :  { %8975 = vmatprep.subr.bf16.mxu1 %v9364_v47  ;;  %v9423_v47 = vld [vmem:[#allocation6 + $0x1fc] ss:$12 sps:$4 sm:$0xff]  }
 0x37a   :  { %6857 = vmatpush1.bf16.msra.mxu0 %v9361_v48  ;;  %v9471_v48 = vld [vmem:[#allocation7 + $0x7c] ss:$12 sps:$4 sm:$0xff]  }
 0x37b   :  { %8976 = vmatpush3.bf16.msra.mxu1 %v9365_v49  ;;  %6858 = vmatprep.subr.bf16.mxu0 %v9368_v50  ;;  %v9421_v49 = vld [vmem:[#allocation6 + $0x1f8] ss:$12 sps:$4 sm:$0xff]  }
 0x37c   :  { %8989 = vmatprep.subr.bf16.mxu1 %v9369_v51  ;;  %v9469_v50 = vld [vmem:[#allocation7 + $0x78] ss:$12 sps:$4 sm:$0xff]   ;;  %v9474_v51 = vld [vmem:[#allocation7 + $0x94] ss:$12 sps:$4 sm:$0xff]  }
 0x37e   :  { %6981 = vmatmul.mubr.bf16.vlgmr.msra.gmra.mrb[16].mxu1 %v9990_v12  ;;  %6859 = vmatpush1.bf16.msra.mxu0 %v9366_v52  ;;  %v9424_v52 = vld [vmem:[#allocation6 + $0x210] ss:$12 sps:$4 sm:$0xff]  }
 0x37f   :  { %6988 = vmatprep.mubr.bf16.mxu1 %v10014_v1  ;;  %8990 = vmatpush3.bf16.msra.mxu1 %v9370_v53  ;;  %v9429_v53 = vld [vmem:[#allocation6 + $0x22c] ss:$12 sps:$4 sm:$0xff]  }
 0x380   :  { %6860 = vmatprep.subr.bf16.mxu0 %v9373_v54  ;;  %8991 = vmatprep.subr.bf16.mxu1 %v9374_v55  ;;  %v9472_v54 = vld [vmem:[#allocation7 + $0x90] ss:$12 sps:$4 sm:$0xff]   ;;  %v9477_v55 = vld [vmem:[#allocation7 + $0xac] ss:$12 sps:$4 sm:$0xff]  }
 0x382   :  { %6861 = vmatpush1.bf16.msra.mxu0 %v9371_v28  ;;  %v9427_v28 = vld [vmem:[#allocation6 + $0x228] ss:$12 sps:$4 sm:$0xff]  }
 0x383   :  { %8992 = vmatpush3.bf16.msra.mxu1 %v9375_v56  ;;  %6862 = vmatprep.subr.bf16.mxu0 %v9378_v57  ;;  %v9432_v56 = vld [vmem:[#allocation6 + $0x244] ss:$12 sps:$4 sm:$0xff]   ;;  %v9475_v57 = vld [vmem:[#allocation7 + $0xa8] ss:$12 sps:$4 sm:$0xff]  }
 0x384   :  { %8993 = vmatprep.subr.bf16.mxu1 %v9379_v58  ;;  %v9480_v58 = vld [vmem:[#allocation7 + $0xc4] ss:$12 sps:$4 sm:$0xff]  }
 0x386   :  { %6989 = vmatmul.mubr.bf16.gmra.mrb[20].mxu1 %v10010_v32  ;;  %6863 = vmatpush1.bf16.msra.mxu0 %v9376_v59  ;;  %v9430_v59 = vld [vmem:[#allocation6 + $0x240] ss:$12 sps:$4 sm:$0xff]  }
 0x387   :  { %8994 = vmatpush3.bf16.msra.mxu1 %v9380_v60  ;;  %7029 = vmatprep.mubr.bf16.mxu1 %v9998_v25  ;;  %v9435_v60 = vld [vmem:[#allocation6 + $0x25c] ss:$12 sps:$4 sm:$0xff]  }
 0x388   :  { %6864 = vmatprep.subr.bf16.mxu0 %v9383_v61  ;;  %8995 = vmatprep.subr.bf16.mxu1 %v9384_v31  ;;  %v9478_v61 = vld [vmem:[#allocation7 + $0xc0] ss:$12 sps:$4 sm:$0xff]   ;;  %v9485_v31 = vld [vmem:[#allocation7 + $0xdc] ss:$12 sps:$4 sm:$0xff]  }
 0x38a   :  { %6865 = vmatpush1.bf16.msra.mxu0 %v9381_v62  ;;  %v9433_v62 = vld [vmem:[#allocation6 + $0x258] ss:$12 sps:$4 sm:$0xff]  }
 0x38b   :  { %8996 = vmatpush3.bf16.msra.mxu1 %v9385_v63  ;;  %6866 = vmatprep.subr.bf16.mxu0 %v9388_v34  ;;  %v9438_v63 = vld [vmem:[#allocation6 + $0x274] ss:$12 sps:$4 sm:$0xff]   ;;  %v9483_v34 = vld [vmem:[#allocation7 + $0xd8] ss:$12 sps:$4 sm:$0xff]  }
 0x38c   :  { %8997 = vmatprep.subr.bf16.mxu1 %v9389_v2  ;;  %v9490_v2 = vld [vmem:[#allocation7 + $0xf4] ss:$12 sps:$4 sm:$0xff]  }
 0x38e   :  { %6867 = vmatpush1.bf16.msra.mxu0 %v9386_v3  ;;  %v9436_v3 = vld [vmem:[#allocation6 + $0x270] ss:$12 sps:$4 sm:$0xff]  }
 0x38f   :  { %8998 = vmatpush3.bf16.msra.mxu1 %v9390_v5  ;;  %6868 = vmatprep.subr.bf16.mxu0 %v9393_v7  ;;  %v9441_v5 = vld [vmem:[#allocation6 + $0x28c] ss:$12 sps:$4 sm:$0xff]   ;;  %v9488_v7 = vld [vmem:[#allocation7 + $0xf0] ss:$12 sps:$4 sm:$0xff]  }
 0x390   :  { %8999 = vmatprep.subr.bf16.mxu1 %v9394_v8  ;;  %v9495_v8 = vld [vmem:[#allocation7 + $0x10c] ss:$12 sps:$4 sm:$0xff]  }
 0x392   :  { %6869 = vmatpush1.bf16.msra.mxu0 %v9391_v9  ;;  %v9439_v9 = vld [vmem:[#allocation6 + $0x288] ss:$12 sps:$4 sm:$0xff]  }
 0x393   :  { %9000 = vmatpush3.bf16.msra.mxu1 %v9395_v10  ;;  %6870 = vmatprep.subr.bf16.mxu0 %v9398_v11  ;;  %v9444_v10 = vld [vmem:[#allocation6 + $0x2a4] ss:$12 sps:$4 sm:$0xff]   ;;  %v9493_v11 = vld [vmem:[#allocation7 + $0x108] ss:$12 sps:$4 sm:$0xff]  }
 0x394   :  { %9001 = vmatprep.subr.bf16.mxu1 %v9399_v13  ;;  %v9500_v13 = vld [vmem:[#allocation7 + $0x124] ss:$12 sps:$4 sm:$0xff]  }
 0x396   :  { %6871 = vmatpush1.bf16.msra.mxu0 %v9396_v14  ;;  %v9442_v14 = vld [vmem:[#allocation6 + $0x2a0] ss:$12 sps:$4 sm:$0xff]  }
 0x397   :  { %9002 = vmatpush3.bf16.msra.mxu1 %v9400_v18  ;;  %6872 = vmatprep.subr.bf16.mxu0 %v9403_v19  ;;  %v9447_v18 = vld [vmem:[#allocation6 + $0x2bc] ss:$12 sps:$4 sm:$0xff]   ;;  %v9498_v19 = vld [vmem:[#allocation7 + $0x120] ss:$12 sps:$4 sm:$0xff]  }
 0x398   :  { %9003 = vmatprep.subr.bf16.mxu1 %v9404_v22  ;;  %v9505_v22 = vld [vmem:[#allocation7 + $0x13c] ss:$12 sps:$4 sm:$0xff]  }
 0x39a   :  { %6873 = vmatpush1.bf16.msra.mxu0 %v9401_v24  ;;  %v9445_v24 = vld [vmem:[#allocation6 + $0x2b8] ss:$12 sps:$4 sm:$0xff]  }
 0x39b   :  { %9004 = vmatpush3.bf16.msra.mxu1 %v9405_v26  ;;  %6895 = vmatprep.subr.bf16.mxu0 %v9408_v27  ;;  %v9450_v26 = vld [vmem:[#allocation6 + $0x2d4] ss:$12 sps:$4 sm:$0xff]   ;;  %v9503_v27 = vld [vmem:[#allocation7 + $0x138] ss:$12 sps:$4 sm:$0xff]  }
 0x39c   :  { %7686 = vmatprep.subr.bf16.mxu1 %v9456_v29  ;;  %v9510_v29 = vld [vmem:[#allocation7 + $0x154] ss:$12 sps:$4 sm:$0xff]  }
 0x39d   :  { %6875 = vmatmul.mubr.bf16.vlgmr.msra.gmra.mrb[16].mxu0 %v9990_v12  ;;  %v9460_v12 = vld [vmem:[#allocation7 + $0x30] ss:$12 sps:$4 sm:$0xff]  }
 0x39e   :  { %7030 = vmatmul.mubr.bf16.vlgmr.msra.gmra.mrb[24].mxu1 %v9994_v16  ;;  %6884 = vmatprep.mubr.bf16.mxu0 %v10014_v1  ;;  %v9465_v1 = vld [vmem:[#allocation7 + $0x4c] ss:$12 sps:$4 sm:$0xff]  }
 0x39f   :  { %6896 = vmatpush1.bf16.msra.mxu0 %v9406_v30  ;;  %7037 = vmatprep.mubr.bf16.mxu1 %v10016_v4  ;;  %v9448_v30 = vld [vmem:[#allocation6 + $0x2d0] ss:$12 sps:$4 sm:$0xff]  }
 0x3a0   :  { %6897 = vmatprep.subr.bf16.mxu0 %v9411_v33  ;;  %7687 = vmatpush1.bf16.msra.mxu1 %v9454_v35  ;;  %v9453_v33 = vld [vmem:[#allocation6 + $0x2ec] ss:$12 sps:$4 sm:$0xff]   ;;  %v9508_v35 = vld [vmem:[#allocation7 + $0x150] ss:$12 sps:$4 sm:$0xff]  }
 0x3a1   :  { %7688 = vmatprep.subr.bf16.mxu1 %v9459_v36  ;;  %v9515_v36 = vld [vmem:[#allocation7 + $0x16c] ss:$12 sps:$4 sm:$0xff]  }
 0x3a3   :  { %6898 = vmatpush1.bf16.msra.mxu0 %v9409_v37  ;;  %v9451_v37 = vld [vmem:[#allocation6 + $0x2e8] ss:$12 sps:$4 sm:$0xff]  }
 0x3a4   :  { %6899 = vmatprep.subr.bf16.mxu0 %v9414_v38  ;;  %7689 = vmatpush1.bf16.msra.mxu1 %v9457_v39  ;;  %v9481_v38 = vld [vmem:[#allocation7 + $0xc8] ss:$12 sps:$4 sm:$0xff]  }
 0x3a5   :  { %6885 = vmatmul.mubr.bf16.gmra.mrb[20].mxu0 %v10010_v32  ;;  %7690 = vmatprep.subr.bf16.mxu1 %v9462_v40  ;;  %v9466_v32 = vld [vmem:[#allocation7 + $0x60] ss:$12 sps:$4 sm:$0xff]   ;;  %v9513_v39 = vld [vmem:[#allocation7 + $0x168] ss:$12 sps:$4 sm:$0xff]   ;;  %v9520_v40 = vld [vmem:[#allocation7 + $0x184] ss:$12 sps:$4 sm:$0xff]  }
 0x3a6   :  { %7038 = vmatmul.mubr.bf16.gmra.mrb[28].mxu1 %v10012_v0  ;;  %6927 = vmatprep.mubr.bf16.mxu0 %v9998_v25  ;;  %v9426_v25 = vld [vmem:[#allocation6 + $0x214] ss:$12 sps:$4 sm:$0xff]  }
 0x3a7   :  { %6900 = vmatpush1.bf16.msra.mxu0 %v9412_v41  ;;  %v9482_v41 = vld [vmem:[#allocation7 + $0x8] ss:$12 sps:$4 sm:$0xff]  }
 0x3a8   :  { %6901 = vmatprep.subr.bf16.mxu0 %v9417_v42  ;;  %7691 = vmatpush1.bf16.msra.mxu1 %v9460_v12  ;;  %v9486_v42 = vld [vmem:[#allocation7 + $0xe0] ss:$12 sps:$4 sm:$0xff]  }
 0x3a9   :  { %7692 = vmatprep.subr.bf16.mxu1 %v9465_v1  ;;  %v9487_v12 = vld [vmem:[#allocation7 + $0x20] ss:$12 sps:$4 sm:$0xff]   ;;  %v9491_v1 = vld [vmem:[#allocation7 + $0xf8] ss:$12 sps:$4 sm:$0xff]  }
 0x3ab   :  { %6902 = vmatpush1.bf16.msra.mxu0 %v9415_v43  ;;  %v9492_v43 = vld [vmem:[#allocation7 + $0x38] ss:$12 sps:$4 sm:$0xff]  }
 0x3ac   :  { %6903 = vmatprep.subr.bf16.mxu0 %v9420_v44  ;;  %7693 = vmatpush1.bf16.msra.mxu1 %v9463_v17  ;;  %v9496_v44 = vld [vmem:[#allocation7 + $0x110] ss:$12 sps:$4 sm:$0xff]  }
 0x3ad   :  { %7694 = vmatprep.subr.bf16.mxu1 %v9468_v45  ;;  %v9497_v17 = vld [vmem:[#allocation7 + $0x50] ss:$12 sps:$4 sm:$0xff]   ;;  %v9501_v45 = vld [vmem:[#allocation7 + $0x128] ss:$12 sps:$4 sm:$0xff]  }
 0x3af   :  { %6904 = vmatpush1.bf16.msra.mxu0 %v9418_v46  ;;  %v9502_v46 = vld [vmem:[#allocation7 + $0x68] ss:$12 sps:$4 sm:$0xff]  }
 0x3b0   :  { %6905 = vmatprep.subr.bf16.mxu0 %v9423_v47  ;;  %7695 = vmatpush1.bf16.msra.mxu1 %v9466_v32  ;;  %v9511_v47 = vld [vmem:[#allocation7 + $0x158] ss:$12 sps:$4 sm:$0xff]  }
 0x3b1   :  { %7696 = vmatprep.subr.bf16.mxu1 %v9471_v48  ;;  %v9512_v32 = vld [vmem:[#allocation7 + $0x98] ss:$12 sps:$4 sm:$0xff]   ;;  %v9516_v48 = vld [vmem:[#allocation7 + $0x170] ss:$12 sps:$4 sm:$0xff]  }
 0x3b3   :  { %6906 = vmatpush1.bf16.msra.mxu0 %v9421_v49  ;;  %v9517_v49 = vld [vmem:[#allocation7 + $0xb0] ss:$12 sps:$4 sm:$0xff]  }
 0x3b4   :  { %6907 = vmatprep.subr.bf16.mxu0 %v9426_v25  ;;  %7697 = vmatpush1.bf16.msra.mxu1 %v9469_v50  ;;  %v900_v25 = vsub.s32 4, %v9938_v6  ;;  %v908_v50 = vsub.s32 6, %v9938_v6 }
 0x3b5   :  { %7698 = vmatprep.subr.bf16.mxu1 %v9474_v51  ;;  %v904_v51 = vsub.s32 5, %v9938_v6 }
 0x3b7   :  { %6908 = vmatpush1.bf16.msra.mxu0 %v9424_v52  ;;  %v912_v52 = vsub.s32 7, %v9938_v6 }
 0x3b8   :  { %6909 = vmatprep.subr.bf16.mxu0 %v9429_v53  ;;  %7699 = vmatpush1.bf16.msra.mxu1 %v9472_v54  ;;  %v9606_v53 = vld [vmem:[#allocation4] sm:$0xff] }
 0x3b9   :  { %7700 = vmatprep.subr.bf16.mxu1 %v9477_v55  ;;  %v901_v54 = vrot.slane %v9606_v53, %v900_v25  ;;  %v909_v55 = vrot.slane %v9606_v53, %v908_v50 }
 0x3bb   :  { %6910 = vmatpush1.bf16.msra.mxu0 %v9427_v28  ;;  %v905_v28 = vrot.slane %v9606_v53, %v904_v51 }
 0x3bc   :  { %6911 = vmatprep.subr.bf16.mxu0 %v9432_v56  ;;  %7701 = vmatpush1.bf16.msra.mxu1 %v9475_v57  ;;  %v913_v56 = vrot.slane %v9606_v53, %v912_v52  ;;  %v9530_v53 = vld [vmem:[#allocation7 + $0x1b4] ss:$12 sps:$4 sm:$0xff]  }
 0x3bd   :  { %7702 = vmatprep.subr.bf16.mxu1 %v9480_v58 }
 0x3bf   :  { %6912 = vmatpush1.bf16.msra.mxu0 %v9430_v59 }
 0x3c0   :  { %6913 = vmatprep.subr.bf16.mxu0 %v9435_v60  ;;  %7703 = vmatpush1.bf16.msra.mxu1 %v9478_v61 }
 0x3c1   :  { %7704 = vmatprep.subr.bf16.mxu1 %v9485_v31 }
 0x3c3   :  { %6914 = vmatpush1.bf16.msra.mxu0 %v9433_v62 }
 0x3c4   :  { %6915 = vmatprep.subr.bf16.mxu0 %v9438_v63  ;;  %7705 = vmatpush1.bf16.msra.mxu1 %v9483_v34 }
 0x3c5   :  { %7706 = vmatprep.subr.bf16.mxu1 %v9490_v2 }
 0x3c7   :  { %6916 = vmatpush1.bf16.msra.mxu0 %v9436_v3 }
 0x3c8   :  { %6917 = vmatprep.subr.bf16.mxu0 %v9441_v5  ;;  %7707 = vmatpush1.bf16.msra.mxu1 %v9488_v7 }
 0x3c9   :  { %7708 = vmatprep.subr.bf16.mxu1 %v9495_v8 }
 0x3cb   :  { %6918 = vmatpush1.bf16.msra.mxu0 %v9439_v9 }
 0x3cc   :  { %6919 = vmatprep.subr.bf16.mxu0 %v9444_v10  ;;  %7709 = vmatpush1.bf16.msra.mxu1 %v9493_v11 }
 0x3cd   :  { %7710 = vmatprep.subr.bf16.mxu1 %v9500_v13 }
 0x3cf   :  { %6920 = vmatpush1.bf16.msra.mxu0 %v9442_v14 }
 0x3d0   :  { %6921 = vmatprep.subr.bf16.mxu0 %v9447_v18  ;;  %7711 = vmatpush1.bf16.msra.mxu1 %v9498_v19 }
 0x3d1   :  { %7712 = vmatprep.subr.bf16.mxu1 %v9505_v22 }
 0x3d3   :  { %6922 = vmatpush1.bf16.msra.mxu0 %v9445_v24 }
 0x3d4   :  { %6923 = vmatprep.subr.bf16.mxu0 %v9450_v26  ;;  %7713 = vmatpush1.bf16.msra.mxu1 %v9503_v27 }
 0x3d5   :  { %7714 = vmatprep.subr.bf16.mxu1 %v9510_v29 }
 0x3d7   :  { %6924 = vmatpush1.bf16.msra.mxu0 %v9448_v30 }
 0x3d8   :  { %6925 = vmatprep.subr.bf16.mxu0 %v9453_v33  ;;  %7715 = vmatpush1.bf16.msra.mxu1 %v9508_v35  ;;  %v9518_v35 = vld [vmem:[#allocation7 + $0x180] ss:$12 sps:$4 sm:$0xff]  }
 0x3d9   :  { %7716 = vmatprep.subr.bf16.mxu1 %v9515_v36  ;;  %v9522_v36 = vld [vmem:[#allocation7 + $0x188] ss:$12 sps:$4 sm:$0xff]  }
 0x3db   :  { %6926 = vmatpush1.bf16.msra.mxu0 %v9451_v37 }
 0x3dc   :  { %9017 = vmatprep.subr.bf16.mxu0 %v9481_v38  ;;  %7717 = vmatpush1.bf16.msra.mxu1 %v9513_v39 }
 0x3dd   :  { %7739 = vmatprep.subr.bf16.mxu1 %v9520_v40 }
 0x3de   :  { %6928 = vmatmul.mubr.bf16.vlgmr.msra.gmra.mrb[16].mxu0 %v9994_v16  ;;  %v9506_v16 = vld [vmem:[#allocation7 + $0x140] ss:$12 sps:$4 sm:$0xff]  }
 0x3df   :  { %6937 = vmatprep.mubr.bf16.mxu0 %v10016_v4  ;;  %9018 = vmatpush3.bf16.msra.mxu0 %v9482_v41  ;;  %v9507_v4 = vld [vmem:[#allocation7 + $0x80] ss:$12 sps:$4 sm:$0xff]   ;;  %v9525_v41 = vld [vmem:[#allocation7 + $0x19c] ss:$12 sps:$4 sm:$0xff]  }
 0x3e0   :  { %9019 = vmatprep.subr.bf16.mxu0 %v9486_v42  ;;  %v9526_v42 = vld [vmem:[#allocation7 + $0x260] ss:$12 sps:$4 sm:$0xff]  }
 0x3e3   :  { %9020 = vmatpush3.bf16.msra.mxu0 %v9487_v12 }
 0x3e4   :  { %9021 = vmatprep.subr.bf16.mxu0 %v9491_v1 }
 0x3e6   :  { %6938 = vmatmul.mubr.bf16.gmra.mrb[20].mxu0 %v10012_v0  ;;  %v9521_v0 = vld [vmem:[#allocation7 + $0x248] ss:$12 sps:$4 sm:$0xff]  }
 0x3e7   :  { %9022 = vmatpush3.bf16.msra.mxu0 %v9492_v43 }
 0x3e8   :  { %9023 = vmatprep.subr.bf16.mxu0 %v9496_v44 }
 0x3eb   :  { %9024 = vmatpush3.bf16.msra.mxu0 %v9497_v17 }
 0x3ec   :  { %9025 = vmatprep.subr.bf16.mxu0 %v9501_v45 }
 0x3ef   :  { %9026 = vmatpush3.bf16.msra.mxu0 %v9502_v46 }
 0x3f0   :  { %9027 = vmatprep.subr.bf16.mxu0 %v9506_v16 }
 0x3f3   :  { %9028 = vmatpush3.bf16.msra.mxu0 %v9507_v4 }
 0x3f4   :  { %9029 = vmatprep.subr.bf16.mxu0 %v9511_v47 }
 0x3f7   :  { %9030 = vmatpush3.bf16.msra.mxu0 %v9512_v32 }
 0x3f8   :  { %9031 = vmatprep.subr.bf16.mxu0 %v9516_v48  ;;  %v9523_v48 = vld [vmem:[#allocation7 + $0x198] ss:$12 sps:$4 sm:$0xff]  }
 0x3fb   :  { %9032 = vmatpush3.bf16.msra.mxu0 %v9517_v49  ;;  %v9527_v49 = vld [vmem:[#allocation7 + $0x1a0] ss:$12 sps:$4 sm:$0xff]  }
 0x3fc   :  { %9045 = vmatprep.subr.bf16.mxu0 %v9521_v0 }
 0x430   :  { %v5817_v57 = vpop.f32.mrb[8].mxu0  ;;  %v6135_v59 = vpop.f32.mrb[8].mxu1 }
 0x431   :  { %v9089_v58 = vadd.f32 %v5817_v57, %v901_v54  ;;  %v5819_v60 = vpop.f32.mrb[9].mxu0  ;;  %v9097_v61 = vadd.f32 %v6135_v59, %v909_v55  ;;  %v6137_v62 = vpop.f32.mrb[9].mxu1  ;;  %v9531_v57 = vld [vmem:[#allocation7 + $0x278] ss:$12 sps:$4 sm:$0xff]  }
 0x432   :  { %v9090_v31 = vadd.f32 %v5819_v60, %v905_v28  ;;  %v5821_v63 = vpop.f32.mrb[10].mxu0  ;;  %v9098_v34 = vadd.f32 %v6137_v62, %v913_v56  ;;  %v6139_v3 = vpop.f32.mrb[10].mxu1 }
 0x433   :  { %v9091_v2 = vadd.f32 %v5821_v63, %v901_v54  ;;  %v5823_v5 = vpop.f32.mrb[11].mxu0  ;;  %v9099_v7 = vadd.f32 %v6139_v3, %v909_v55  ;;  %v6141_v9 = vpop.f32.mrb[11].mxu1  ;;  %v6158_v10 = vmax.f32 %v9089_v58, 0.0  ;;  %v6160_v14 = vmax.f32 %v9097_v61, 0.0  ;;  %v9528_v63 = vld [vmem:[#allocation7 + $0x1b0] ss:$12 sps:$4 sm:$0xff]  }
 0x434   :  { %v9092_v8 = vadd.f32 %v5823_v5, %v905_v28  ;;  %v9100_v13 = vadd.f32 %v6141_v9, %v913_v56  ;;  %v6159_v18 = vmax.f32 %v9090_v31, 0.0  ;;  %v6161_v24 = vmax.f32 %v9098_v34, 0.0  ;;  %v9532_v34 = vld [vmem:[#allocation7 + $0x1b8] ss:$12 sps:$4 sm:$0xff]   ;;  %v9536_v3 = vld [vmem:[#allocation7 + $0x290] ss:$12 sps:$4 sm:$0xff]  }
 0x435   :  { %v6166_v11 = vmax.f32 %v9091_v2, 0.0  ;;  %v6168_v19 = vmax.f32 %v9099_v7, 0.0  ;;  %v9533_v5 = vld [vmem:[#allocation7 + $0x1c8] ss:$12 sps:$4 sm:$0xff]   ;;  %v9537_v7 = vld [vmem:[#allocation7 + $0x1d0] ss:$12 sps:$4 sm:$0xff]  }
 0x436   :  { %v6167_v22 = vmax.f32 %v9092_v8, 0.0  ;;  %v6169_v27 = vmax.f32 %v9100_v13, 0.0  ;;  %v9540_v8 = vld [vmem:[#allocation7 + $0x1e4] ss:$12 sps:$4 sm:$0xff]   ;;  %v9541_v9 = vld [vmem:[#allocation7 + $0x2a8] ss:$12 sps:$4 sm:$0xff]  }
 0x437   :  { %v6190_v26 = vpack.c.bf16 %v6166_v11, %v6158_v10  ;;  %v10075_v29 = vpack.c.bf16 %v6168_v19, %v6160_v14  ;;  %v9538_v10 = vld [vmem:[#allocation7 + $0x1e0] ss:$12 sps:$4 sm:$0xff]   ;;  %v9542_v11 = vld [vmem:[#allocation7 + $0x1e8] ss:$12 sps:$4 sm:$0xff]  }
 0x438   :  { %v6191_v30 = vpack.c.bf16 %v6167_v22, %v6159_v18  ;;  %v5827_v33 = vpop.f32.mrb[12].mxu0  ;;  %v6193_v37 = vpack.c.bf16 %v6169_v27, %v6161_v24  ;;  %v6145_v39 = vpop.f32.mrb[12].mxu1  ;;  %v9545_v13 = vld [vmem:[#allocation7 + $0x1fc] ss:$12 sps:$4 sm:$0xff]   ;;  %v9546_v14 = vld [vmem:[#allocation7 + $0x2c0] ss:$12 sps:$4 sm:$0xff]  }
 0x439   :  { %v9093_v38 = vadd.f32 %v5827_v33, %v901_v54  ;;  %v5829_v40 = vpop.f32.mrb[13].mxu0  ;;  %v9101_v12 = vadd.f32 %v6145_v39, %v909_v55  ;;  %v6147_v43 = vpop.f32.mrb[13].mxu1  ;;  %v9543_v18 = vld [vmem:[#allocation7 + $0x1f8] ss:$12 sps:$4 sm:$0xff]   ;;  %v9547_v19 = vld [vmem:[#allocation7 + $0x200] ss:$12 sps:$4 sm:$0xff]  }
 0x43a   :  { %v9094_v1 = vadd.f32 %v5829_v40, %v905_v28  ;;  %v5831_v44 = vpop.f32.mrb[14].mxu0  ;;  %7718 = vmatprep.mubr.bf16.mxu1 %v6191_v30  ;;  %7824 = vmatprep.mubr.bf16.mxu0 %v6191_v30  ;;  %v9102_v17 = vadd.f32 %v6147_v43, %v913_v56  ;;  %v6149_v46 = vpop.f32.mrb[14].mxu1  ;;  %v9550_v22 = vld [vmem:[#allocation7 + $0x214] ss:$12 sps:$4 sm:$0xff]   ;;  %v9551_v24 = vld [vmem:[#allocation7 + $0x2d8] ss:$12 sps:$4 sm:$0xff]  }
 0x43b   :  { %v9095_v45 = vadd.f32 %v5831_v44, %v901_v54  ;;  %v5833_v16 = vpop.f32.mrb[15].mxu0  ;;  %7719 = vmatmul.mubr.bf16.vlgmr.msra.gmra.mrb[32].mxu1 %v6190_v26  ;;  %7825 = vmatmul.mubr.bf16.vlgmr.msra.gmra.mrb[24].mxu0 %v6190_v26  ;;  %v9103_v4 = vadd.f32 %v6149_v46, %v909_v55  ;;  %v6151_v32 = vpop.f32.mrb[15].mxu1  ;;  %v6174_v0 = vmax.f32 %v9093_v38, 0.0  ;;  %v6176_v58 = vmax.f32 %v9101_v12, 0.0  ;;  %v9548_v26 = vld [vmem:[#allocation7 + $0x210] ss:$12 sps:$4 sm:$0xff]  }
 0x43c   :  { %v9096_v47 = vadd.f32 %v5833_v16, %v905_v28  ;;  %7740 = vmatpush1.bf16.msra.mxu1 %v9518_v35  ;;  %9046 = vmatpush3.bf16.msra.mxu0 %v9522_v36  ;;  %v9104_v52 = vadd.f32 %v6151_v32, %v913_v56  ;;  %v6175_v54 = vmax.f32 %v9094_v1, 0.0  ;;  %v6177_v61 = vmax.f32 %v9102_v17, 0.0  ;;  %v9535_v56 = vld [vmem:[#allocation7 + $0x1cc] ss:$12 sps:$4 sm:$0xff]   ;;  %v9556_v35 = vld [vmem:[#allocation7 + $0x2f0] ss:$12 sps:$4 sm:$0xff]  }
 0x43d   :  { %v6182_v50 = vmax.f32 %v9095_v45, 0.0  ;;  %7741 = vmatprep.subr.bf16.mxu1 %v9525_v41  ;;  %9047 = vmatprep.subr.bf16.mxu0 %v9526_v42  ;;  %v6184_v59 = vmax.f32 %v9103_v4, 0.0  ;;  %v9552_v27 = vld [vmem:[#allocation7 + $0x218] ss:$12 sps:$4 sm:$0xff]   ;;  %v9553_v40 = vld [vmem:[#allocation7 + $0x228] ss:$12 sps:$4 sm:$0xff]  }
 0x43e   :  { %v6183_v60 = vmax.f32 %v9096_v47, 0.0  ;;  %v6185_v55 = vmax.f32 %v9104_v52, 0.0  ;;  %v9555_v33 = vld [vmem:[#allocation7 + $0x22c] ss:$12 sps:$4 sm:$0xff]   ;;  %v9557_v41 = vld [vmem:[#allocation7 + $0x230] ss:$12 sps:$4 sm:$0xff]  }
 0x43f   :  { %v6198_v31 = vpack.c.bf16 %v6182_v50, %v6174_v0  ;;  %v10077_v28 = vpack.c.bf16 %v6184_v59, %v6176_v58  ;;  %v9560_v12 = vld [vmem:[#allocation7 + $0x244] ss:$12 sps:$4 sm:$0xff]   ;;  %v9558_v1 = vld [vmem:[#allocation7 + $0x240] ss:$12 sps:$4 sm:$0xff]   ;;  %v9563_v44 = vld [vmem:[#allocation7 + $0x25c] ss:$12 sps:$4 sm:$0xff]  }
 0x440   :  { %v6199_v62 = vpack.c.bf16 %v6183_v60, %v6175_v54  ;;  %7742 = vmatpush1.bf16.msra.mxu1 %v9523_v48  ;;  %9048 = vmatpush3.bf16.msra.mxu0 %v9527_v49  ;;  %v10079_v2 = vpack.c.bf16 %v6185_v55, %v6177_v61  ;;  %v9561_v4 = vld [vmem:[#allocation7 + $0x258] ss:$12 sps:$4 sm:$0xff]   ;;  %v9566_v32 = vld [vmem:[#allocation7 + $0x274] ss:$12 sps:$4 sm:$0xff]   ;;  %v9564_v48 = vld [vmem:[#allocation7 + $0x270] ss:$12 sps:$4 sm:$0xff]  }
 0x441   :  { %7743 = vmatprep.subr.bf16.mxu1 %v9530_v53  ;;  %9049 = vmatprep.subr.bf16.mxu0 %v9531_v57  ;;  %v9569_v49 = vld [vmem:[#allocation7 + $0x28c] ss:$12 sps:$4 sm:$0xff]   ;;  %v9567_v0 = vld [vmem:[#allocation7 + $0x288] ss:$12 sps:$4 sm:$0xff]   ;;  %v9572_v50 = vld [vmem:[#allocation7 + $0x2a4] ss:$12 sps:$4 sm:$0xff]  }
 0x442   :  { %7728 = vmatprep.mubr.bf16.mxu1 %v6199_v62  ;;  %7832 = vmatprep.mubr.bf16.mxu0 %v6199_v62  ;;  %v9570_v52 = vld [vmem:[#allocation7 + $0x2a0] ss:$12 sps:$4 sm:$0xff]   ;;  %v9575_v53 = vld [vmem:[#allocation7 + $0x2bc] ss:$12 sps:$4 sm:$0xff]   ;;  %v9573_v57 = vld [vmem:[#allocation7 + $0x2b8] ss:$12 sps:$4 sm:$0xff]  }
 0x443   :  { %7729 = vmatmul.mubr.bf16.gmra.mrb[36].mxu1 %v6198_v31  ;;  %7833 = vmatmul.mubr.bf16.gmra.mrb[28].mxu0 %v6198_v31  ;;  %v9578_v58 = vld [vmem:[#allocation7 + $0x2d4] ss:$12 sps:$4 sm:$0xff]   ;;  %v9576_v59 = vld [vmem:[#allocation7 + $0x2d0] ss:$12 sps:$4 sm:$0xff]   ;;  %v9581_v61 = vld [vmem:[#allocation7 + $0x2ec] ss:$12 sps:$4 sm:$0xff]  }
 0x444   :  { %7744 = vmatpush1.bf16.msra.mxu1 %v9528_v63  ;;  %9050 = vmatpush3.bf16.msra.mxu0 %v9532_v34  ;;  %v10084_v54 = vld [vmem:[#allocation9] sm:$0x3f] }
 0x445   :  { %7771 = vmatprep.mubr.bf16.mxu1 %v6193_v37  ;;  %7873 = vmatprep.mubr.bf16.mxu0 %v6193_v37  ;;  %v7903_v62 = vrot.slane %v10084_v54, %v892_v20 }
 0x446   :  { %7745 = vmatprep.subr.bf16.mxu1 %v9535_v56  ;;  %9051 = vmatprep.subr.bf16.mxu0 %v9536_v3  ;;  %v9579_v56 = vld [vmem:[#allocation7 + $0x2e8] ss:$12 sps:$4 sm:$0xff]  }
 0x448   :  { %7746 = vmatpush1.bf16.msra.mxu1 %v9533_v5  ;;  %9052 = vmatpush3.bf16.msra.mxu0 %v9537_v7 }
 0x449   :  { %7747 = vmatprep.subr.bf16.mxu1 %v9540_v8  ;;  %9053 = vmatprep.subr.bf16.mxu0 %v9541_v9 }
 0x44c   :  { %7748 = vmatpush1.bf16.msra.mxu1 %v9538_v10  ;;  %9054 = vmatpush3.bf16.msra.mxu0 %v9542_v11 }
 0x44d   :  { %7749 = vmatprep.subr.bf16.mxu1 %v9545_v13  ;;  %9055 = vmatprep.subr.bf16.mxu0 %v9546_v14 }
 0x450   :  { %7750 = vmatpush1.bf16.msra.mxu1 %v9543_v18  ;;  %9056 = vmatpush3.bf16.msra.mxu0 %v9547_v19 }
 0x451   :  { %v8977_v30 = vpop.f32.mrb[16].mxu1  ;;  %7751 = vmatprep.subr.bf16.mxu1 %v9550_v22  ;;  %9057 = vmatprep.subr.bf16.mxu0 %v9551_v24 }
 0x452   :  { %v8978_v36 = vpop.f32.mrb[17].mxu1 }
 0x453   :  { %v8979_v37 = vadd.f32 %v8978_v36, %v8977_v30  ;;  %v8980_v38 = vpop.f32.mrb[18].mxu1 }
 0x454   :  { %v8981_v39 = vpop.f32.mrb[19].mxu1  ;;  %7752 = vmatpush1.bf16.msra.mxu1 %v9548_v26  ;;  %9058 = vmatpush3.bf16.msra.mxu0 %v9552_v27 }
 0x455   :  { %v8982_v42 = vadd.f32 %v8981_v39, %v8980_v38  ;;  %7753 = vmatprep.subr.bf16.mxu1 %v9555_v33  ;;  %9059 = vmatprep.subr.bf16.mxu0 %v9556_v35 }
 0x458   :  { %7754 = vmatpush1.bf16.msra.mxu1 %v9553_v40  ;;  %9060 = vmatpush3.bf16.msra.mxu0 %v9557_v41 }
 0x459   :  { %v8983_v43 = vpop.f32.mrb[20].mxu1  ;;  %7755 = vmatprep.subr.bf16.mxu1 %v9560_v12 }
 0x45a   :  { %v8984_v17 = vpop.f32.mrb[21].mxu1 }
 0x45b   :  { %v8985_v45 = vadd.f32 %v8984_v17, %v8983_v43  ;;  %v8986_v46 = vpop.f32.mrb[22].mxu1  ;;  %7874 = vmatmul.mubr.bf16.vlgmr.msra.gmra.mrb[32].mxu0 %v10075_v29 }
 0x45c   :  { %v8987_v16 = vpop.f32.mrb[23].mxu1  ;;  %7756 = vmatpush1.bf16.msra.mxu1 %v9558_v1  ;;  %7881 = vmatprep.mubr.bf16.mxu0 %v10079_v2 }
 0x45d   :  { %v8988_v47 = vadd.f32 %v8987_v16, %v8986_v46  ;;  %7757 = vmatprep.subr.bf16.mxu1 %v9563_v44 }
 0x460   :  { %7758 = vmatpush1.bf16.msra.mxu1 %v9561_v4 }
 0x461   :  { %7759 = vmatprep.subr.bf16.mxu1 %v9566_v32 }
 0x463   :  { %7882 = vmatmul.mubr.bf16.gmra.mrb[36].mxu0 %v10077_v28 }
 0x464   :  { %7760 = vmatpush1.bf16.msra.mxu1 %v9564_v48 }
 0x465   :  { %7761 = vmatprep.subr.bf16.mxu1 %v9569_v49 }
 0x468   :  { %7762 = vmatpush1.bf16.msra.mxu1 %v9567_v0 }
 0x469   :  { %7763 = vmatprep.subr.bf16.mxu1 %v9572_v50 }
 0x46c   :  { %7764 = vmatpush1.bf16.msra.mxu1 %v9570_v52 }
 0x46d   :  { %7765 = vmatprep.subr.bf16.mxu1 %v9575_v53 }
 0x470   :  { %7766 = vmatpush1.bf16.msra.mxu1 %v9573_v57  ;;  %v7915_v57 = vrot.slane %v10084_v54, %v904_v51 }
 0x471   :  { %v9005_v60 = vpop.f32.mrb[24].mxu1  ;;  %7767 = vmatprep.subr.bf16.mxu1 %v9578_v58 }
 0x472   :  { %v9006_v31 = vpop.f32.mrb[25].mxu1 }
 0x473   :  { %v9007_v55 = vadd.f32 %v9006_v31, %v9005_v60  ;;  %v9008_v63 = vpop.f32.mrb[26].mxu1 }
 0x474   :  { %v9009_v34 = vpop.f32.mrb[27].mxu1  ;;  %7768 = vmatpush1.bf16.msra.mxu1 %v9576_v59 }
 0x475   :  { %v7032_v3 = vadd.f32 %v9007_v55, %v8979_v37  ;;  %v9010_v5 = vadd.f32 %v9009_v34, %v9008_v63  ;;  %7769 = vmatprep.subr.bf16.mxu1 %v9581_v61 }
 0x477   :  { %v7924_v7 = vadd.f32 %v7903_v62, %v7032_v3  ;;  %v7035_v8 = vadd.f32 %v9010_v5, %v8982_v42 }
 0x478   :  { %7770 = vmatpush1.bf16.msra.mxu1 %v9579_v56 }
 0x479   :  { %7948 = vst [vmem:[%s10185_s6 + $0x10] sm:$0xff] %v7924_v7  ;;  %v7930_v9 = vadd.f32 %v7903_v62, %v7035_v8  ;;  %v9011_v10 = vpop.f32.mrb[28].mxu1 }
 0x47a   :  { %v9012_v11 = vpop.f32.mrb[29].mxu1 }
 0x47b   :  { %7954 = vst [vmem:[%s10185_s6 + $0x40] sm:$0xff] %v7930_v9  ;;  %v9013_v20 = vadd.f32 %v9012_v11, %v9011_v10  ;;  %v9014_v13 = vpop.f32.mrb[30].mxu1  ;;  %7772 = vmatmul.mubr.bf16.vlgmr.msra.gmra.mrb[32].mxu1 %v10075_v29  ;;  %v7895_v29 = vrot.slane %v10084_v54, %v884_v15  ;;  %v7907_v11 = vrot.slane %v10084_v54, %v896_v23 }
 0x47c   :  { %v9015_v14 = vpop.f32.mrb[31].mxu1  ;;  %7781 = vmatprep.mubr.bf16.mxu1 %v10079_v2  ;;  %v7899_v2 = vrot.slane %v10084_v54, %v888_v21 }
 0x47d   :  { %v7040_v18 = vadd.f32 %v9013_v20, %v8985_v45  ;;  %v9016_v19 = vadd.f32 %v9015_v14, %v9014_v13  ;;  %v7911_v20 = vrot.slane %v10084_v54, %v900_v25 }
 0x47f   :  { %v7936_v22 = vadd.f32 %v7903_v62, %v7040_v18  ;;  %v7043_v24 = vadd.f32 %v9016_v19, %v8988_v47 }
 0x481   :  { %7960 = vst [vmem:[%s10185_s6 + $0x70] sm:$0xff] %v7936_v22  ;;  %v7942_v26 = vadd.f32 %v7903_v62, %v7043_v24 }
 0x483   :  { %7966 = vst [vmem:[%s10185_s6 + $0xa0] sm:$0xff] %v7942_v26  ;;  %7782 = vmatmul.mubr.bf16.gmra.mrb[36].mxu1 %v10077_v28 }
 0x4b1   :  { %v6929_v27 = vpop.f32.mrb[16].mxu0 }
 0x4b2   :  { %v7922_v30 = vadd.f32 %v7895_v29, %v6929_v27  ;;  %v6931_v33 = vpop.f32.mrb[17].mxu0 }
 0x4b3   :  { %v7923_v35 = vadd.f32 %v7899_v2, %v6931_v33  ;;  %v6933_v36 = vpop.f32.mrb[18].mxu0 }
 0x4b4   :  { %7946 = vst [vmem:[%s10185_s6] sm:$0xff] %v7922_v30  ;;  %v7928_v37 = vadd.f32 %v7895_v29, %v6933_v36  ;;  %v6935_v38 = vpop.f32.mrb[19].mxu0 }
 0x4b5   :  { %7947 = vst [vmem:[%s10185_s6 + $0x8] sm:$0xff] %v7923_v35  ;;  %v7929_v15 = vadd.f32 %v7899_v2, %v6935_v38 }
 0x4b6   :  { %7952 = vst [vmem:[%s10185_s6 + $0x30] sm:$0xff] %v7928_v37 }
 0x4b7   :  { %7953 = vst [vmem:[%s10185_s6 + $0x38] sm:$0xff] %v7929_v15 }
 0x4b9   :  { %v6939_v21 = vpop.f32.mrb[20].mxu0 }
 0x4ba   :  { %v7934_v28 = vadd.f32 %v7895_v29, %v6939_v21  ;;  %v6941_v39 = vpop.f32.mrb[21].mxu0 }
 0x4bb   :  { %v7935_v40 = vadd.f32 %v7899_v2, %v6941_v39  ;;  %v6943_v41 = vpop.f32.mrb[22].mxu0 }
 0x4bc   :  { %7958 = vst [vmem:[%s10185_s6 + $0x60] sm:$0xff] %v7934_v28  ;;  %v7940_v42 = vadd.f32 %v7895_v29, %v6943_v41  ;;  %v6945_v12 = vpop.f32.mrb[23].mxu0 }
 0x4bd   :  { %7959 = vst [vmem:[%s10185_s6 + $0x68] sm:$0xff] %v7935_v40  ;;  %v7941_v1 = vadd.f32 %v7899_v2, %v6945_v12 }
 0x4be   :  { %7964 = vst [vmem:[%s10185_s6 + $0x90] sm:$0xff] %v7940_v42 }
 0x4bf   :  { %7965 = vst [vmem:[%s10185_s6 + $0x98] sm:$0xff] %v7941_v1 }
 0x50e   :  { %v9033_v43 = vpop.f32.mrb[24].mxu0 }
 0x50f   :  { %v9034_v44 = vpop.f32.mrb[25].mxu0 }
 0x510   :  { %v9035_v17 = vadd.f32 %v9034_v44, %v9033_v43  ;;  %v9036_v45 = vpop.f32.mrb[26].mxu0 }
 0x511   :  { %v9037_v46 = vpop.f32.mrb[27].mxu0 }
 0x512   :  { %v9038_v16 = vadd.f32 %v9037_v46, %v9036_v45 }
 0x516   :  { %v9039_v4 = vpop.f32.mrb[28].mxu0 }
 0x517   :  { %v9040_v47 = vpop.f32.mrb[29].mxu0 }
 0x518   :  { %v9041_v32 = vadd.f32 %v9040_v47, %v9039_v4  ;;  %v9042_v48 = vpop.f32.mrb[30].mxu0 }
 0x519   :  { %v9043_v49 = vpop.f32.mrb[31].mxu0 }
 0x51a   :  { %v9044_v0 = vadd.f32 %v9043_v49, %v9042_v48 }
 0x52e   :  { %v9061_v50 = vpop.f32.mrb[32].mxu0 }
 0x52f   :  { %v9062_v52 = vpop.f32.mrb[33].mxu0 }
 0x530   :  { %v9063_v53 = vadd.f32 %v9062_v52, %v9061_v50  ;;  %v9064_v58 = vpop.f32.mrb[34].mxu0 }
 0x531   :  { %v9065_v59 = vpop.f32.mrb[35].mxu0 }
 0x532   :  { %v7876_v60 = vadd.f32 %v9063_v53, %v9035_v17  ;;  %v9066_v61 = vadd.f32 %v9065_v59, %v9064_v58 }
 0x534   :  { %v7927_v31 = vadd.f32 %v7915_v57, %v7876_v60  ;;  %v7879_v55 = vadd.f32 %v9066_v61, %v9038_v16 }
 0x536   :  { %7951 = vst [vmem:[%s10185_s6 + $0x28] sm:$0xff] %v7927_v31  ;;  %v7933_v62 = vadd.f32 %v7915_v57, %v7879_v55  ;;  %v9067_v63 = vpop.f32.mrb[36].mxu0 }
 0x537   :  { %v9068_v34 = vpop.f32.mrb[37].mxu0 }
 0x538   :  { %7957 = vst [vmem:[%s10185_s6 + $0x58] sm:$0xff] %v7933_v62  ;;  %v9069_v56 = vadd.f32 %v9068_v34, %v9067_v63  ;;  %v9070_v3 = vpop.f32.mrb[38].mxu0 }
 0x539   :  { %v9071_v51 = vpop.f32.mrb[39].mxu0 }
 0x53a   :  { %v7884_v5 = vadd.f32 %v9069_v56, %v9041_v32  ;;  %v9072_v7 = vadd.f32 %v9071_v51, %v9070_v3 }
 0x53c   :  { %v7939_v8 = vadd.f32 %v7915_v57, %v7884_v5  ;;  %v7887_v9 = vadd.f32 %v9072_v7, %v9044_v0 }
 0x53e   :  { %7963 = vst [vmem:[%s10185_s6 + $0x88] sm:$0xff] %v7939_v8  ;;  %v7945_v10 = vadd.f32 %v7915_v57, %v7887_v9 }
 0x540   :  { %7969 = vst [vmem:[%s10185_s6 + $0xb8] sm:$0xff] %v7945_v10 }
 0x54e   :  { %v7773_v13 = vpop.f32.mrb[32].mxu1 }
 0x54f   :  { %v7925_v14 = vadd.f32 %v7907_v11, %v7773_v13  ;;  %v7775_v18 = vpop.f32.mrb[33].mxu1 }
 0x550   :  { %v7926_v19 = vadd.f32 %v7911_v20, %v7775_v18  ;;  %v7777_v22 = vpop.f32.mrb[34].mxu1 }
 0x551   :  { %7949 = vst [vmem:[%s10185_s6 + $0x18] sm:$0xff] %v7925_v14  ;;  %v7931_v24 = vadd.f32 %v7907_v11, %v7777_v22  ;;  %v7779_v26 = vpop.f32.mrb[35].mxu1 }
 0x552   :  { %7950 = vst [vmem:[%s10185_s6 + $0x20] sm:$0xff] %v7926_v19  ;;  %v7932_v23 = vadd.f32 %v7911_v20, %v7779_v26 }
 0x553   :  { %7955 = vst [vmem:[%s10185_s6 + $0x48] sm:$0xff] %v7931_v24 }
 0x554   :  { %7956 = vst [vmem:[%s10185_s6 + $0x50] sm:$0xff] %v7932_v23 }
 0x556   :  { %v7783_v6 = vpop.f32.mrb[36].mxu1 }
 0x557   :  { %v7937_v25 = vadd.f32 %v7907_v11, %v7783_v6  ;;  %v7785_v54 = vpop.f32.mrb[37].mxu1 }
 0x558   :  { %v7938_v29 = vadd.f32 %v7911_v20, %v7785_v54  ;;  %v7787_v2 = vpop.f32.mrb[38].mxu1 }
 0x559   :  { %7961 = vst [vmem:[%s10185_s6 + $0x78] sm:$0xff] %v7937_v25  ;;  %v7943_v27 = vadd.f32 %v7907_v11, %v7787_v2  ;;  %v7789_v30 = vpop.f32.mrb[39].mxu1 }
 0x55a   :  { %7962 = vst [vmem:[%s10185_s6 + $0x80] sm:$0xff] %v7938_v29  ;;  %v7944_v33 = vadd.f32 %v7911_v20, %v7789_v30 }
 0x55b   :  { %7967 = vst [vmem:[%s10185_s6 + $0xa8] sm:$0xff] %v7943_v27 }
 0x55c   :  { %7968 = vst [vmem:[%s10185_s6 + $0xb0] sm:$0xff] %v7944_v33 }
 0x55d   :  { %7974 = vsyncpa [#allocation3], 1 }
 0x55e   :  { %7975 = vsyncpa [#allocation5], 1 }
 0x55f   :  { %7976 = vsyncpa [#allocation8], 1 }

</bundles_post_ra>
